<compile_context>
chip_gen: v6e
topology: v6e:2x2x1
jax: 0.10.0
libtpu: 0.0.40
codegen_flags: <defaults>
</compile_context>

<pallas_src>
import jax
import jax.numpy as jnp
from jax.experimental import pallas as pl
from jax.experimental.pallas import tpu as pltpu


# ----------------------------------------------------------------------------- helpers

def _round_up(x, m):
    return ((x + m - 1) // m) * m


def _vmem_budget_bytes():
    """~75% of physical VMEM (fallback 64 MiB if the query is unavailable)."""
    try:
        cap = pltpu.get_tpu_info().vmem_capacity_bytes
    except Exception:
        cap = 64 * 1024 * 1024
    return int(cap * 0.75)


def _pick_batch_block(B):
    """Split the (padded) batch into 2 parallel blocks when large enough so the second
    TensorCore on v7x gets work; keep a single block for small (test-sized) batches."""
    if B >= 32 and B % 32 == 0:
        return B // 2
    return B


def _pick_time_chunk(T, bytes_per_tc, resident_bytes, vmem_budget, max_chunk=64):
    """Largest divisor of T such that the double-buffered per-chunk working set fits the
    VMEM budget (minus resident weights/scratch and a small headroom)."""
    headroom = 2 * 1024 * 1024
    avail = max(vmem_budget - resident_bytes - headroom, bytes_per_tc)
    cap = max(1, min(max_chunk, avail // max(bytes_per_tc, 1)))
    for c in range(min(T, int(cap)), 0, -1):
        if T % c == 0:
            return c
    return 1


# ----------------------------------------------------------------------------- kernel

def _bigru_chunk_kernel(gif_ref, gib_ref, whhf_hbm, whhb_hbm, bn_ref,
                        yf_ref, yb_ref,
                        whhf_vm, whhb_vm, hf_sc, hb_sc):
    """One time-chunk of a fused fwd+bwd GRU layer.  Grid = (batch blocks, time chunks);
    the time axis is sequential ("arbitrary"), batch blocks are independent ("parallel").

    gif_ref : (Tc, B, 3H) bf16  precomputed fwd input gates (x@W_ih^T + b_ih + b_hh_{r,z})
    gib_ref : (Tc, B, 3H) bf16  same for the backward direction; chunks delivered reversed
    whh*_hbm: (H, 3H)     bf16  recurrent weights (raw HBM refs, copied once to VMEM)
    bn_ref  : (1, 2H)     f32   [b_hh_n_fwd | b_hh_n_bwd] (must stay inside r-gated term)
    yf_ref  : (Tc, B, H)  bf16  forward outputs
    yb_ref  : (Tc, B, H)  bf16  backward outputs
    whh*_vm : (H, 3H)     bf16  single-buffered resident copies of the recurrent weights
    h*_sc   : (B, H)      f32   carried hidden state (fwd / bwd), read+written once per chunk
    """
    c = pl.program_id(1)
    Tc = gif_ref.shape[0]
    B = yf_ref.shape[1]
    H = yf_ref.shape[-1]

    @pl.when(c == 0)
    def _():
        # Resident recurrent weights: one DMA per batch block, single-buffered in VMEM.
        pltpu.sync_copy(whhf_hbm, whhf_vm)
        pltpu.sync_copy(whhb_hbm, whhb_vm)
        hf_sc[...] = jnp.zeros_like(hf_sc)
        hb_sc[...] = jnp.zeros_like(hb_sc)

    # Loop-invariant values hoisted above the recurrence (JAX does not CSE broadcasts).
    whh_f = whhf_vm[...]
    whh_b = whhb_vm[...]
    bn_f = jnp.broadcast_to(bn_ref[:, :H], (B, H))
    bn_b = jnp.broadcast_to(bn_ref[:, H:], (B, H))

    def step(i, carry):
        h_f, h_b = carry                                          # (B, H) f32 each, in vregs
        # Two dense recurrent matmuls (bf16 MXU operands, f32 accumulate).
        gh_f = jnp.dot(h_f.astype(jnp.bfloat16), whh_f,
                       preferred_element_type=jnp.float32)        # (B, 3H)
        gh_b = jnp.dot(h_b.astype(jnp.bfloat16), whh_b,
                       preferred_element_type=jnp.float32)        # (B, 3H)

        gi_f = gif_ref[i].astype(jnp.float32)                     # fwd: chunk-local step i
        j = Tc - 1 - i
        gi_b = gib_ref[j].astype(jnp.float32)                     # bwd: chunk in reverse

        # PyTorch gate order [r | z | n]; b_hh_n stays inside the r-gated term.
        r_f = jax.nn.sigmoid(gi_f[:, :H] + gh_f[:, :H])
        z_f = jax.nn.sigmoid(gi_f[:, H:2 * H] + gh_f[:, H:2 * H])
        n_f = jnp.tanh(gi_f[:, 2 * H:] + r_f * (gh_f[:, 2 * H:] + bn_f))
        h_f_new = (1.0 - z_f) * n_f + z_f * h_f

        r_b = jax.nn.sigmoid(gi_b[:, :H] + gh_b[:, :H])
        z_b = jax.nn.sigmoid(gi_b[:, H:2 * H] + gh_b[:, H:2 * H])
        n_b = jnp.tanh(gi_b[:, 2 * H:] + r_b * (gh_b[:, 2 * H:] + bn_b))
        h_b_new = (1.0 - z_b) * n_b + z_b * h_b

        yf_ref[i] = h_f_new.astype(yf_ref.dtype)
        yb_ref[j] = h_b_new.astype(yb_ref.dtype)
        return (h_f_new, h_b_new)

    h_f, h_b = jax.lax.fori_loop(0, Tc, step, (hf_sc[...], hb_sc[...]),
                                 unroll=min(Tc, 8))
    hf_sc[...] = h_f
    hb_sc[...] = h_b


# ----------------------------------------------------------------------------- wrapper

def bigru_layer(xs, p_fwd, p_bwd, *, vmem_budget):
    """One bidirectional GRU layer.  xs: list of time-major (T, B, Di) feature slabs whose
    (virtual) concatenation is the layer input.  Returns (y_f, y_b), each (T, B, H) bf16."""
    T, B = xs[0].shape[0], xs[0].shape[1]
    H = p_fwd["w_hh"].shape[1]

    # Fused fwd+bwd input projection: gi = concat(xs,-1) @ [W_ih_f; W_ih_b]^T + biases,
    # hoisted out of the serial recurrence; the concat is never materialized (the stacked
    # weight is split column-wise per feature slab).  bf16 operands, f32 accumulate.
    w_stk = jnp.concatenate([p_fwd["w_ih"], p_bwd["w_ih"]], axis=0)          # (6H, D)

    def fold_bias(p):  # b_ih + b_hh for r,z only (b_hh_n must stay inside the r-gated term)
        return p["b_ih"] + jnp.concatenate([p["b_hh"][:2 * H],
                                            jnp.zeros((H,), p["b_hh"].dtype)])
    bias = jnp.concatenate([fold_bias(p_fwd), fold_bias(p_bwd)])             # (6H,)

    gi = None
    off = 0
    for x in xs:
        d = x.shape[-1]
        w = w_stk[:, off:off + d]
        part = jnp.einsum("tbd,gd->tbg",
                          x.astype(jnp.bfloat16), w.astype(jnp.bfloat16),
                          preferred_element_type=jnp.float32)                # (T, B, 6H)
        gi = part if gi is None else gi + part
        off += d
    gi = gi + bias.reshape(1, 1, 6 * H)
    gi_f = gi[..., :3 * H].astype(jnp.bfloat16)
    gi_b = gi[..., 3 * H:].astype(jnp.bfloat16)

    whh_f = p_fwd["w_hh"].T.astype(jnp.bfloat16)                             # (H, 3H)
    whh_b = p_bwd["w_hh"].T.astype(jnp.bfloat16)
    bn = jnp.concatenate([p_fwd["b_hh"][2 * H:],
                          p_bwd["b_hh"][2 * H:]]).reshape(1, 2 * H).astype(jnp.float32)

    Bb = _pick_batch_block(B)
    nB = B // Bb

    # VMEM-budget-derived time chunk: bf16 gi (x2 dirs) + bf16 y (x2 dirs), double-buffered.
    bytes_per_tc = 2 * 2 * (Bb * 3 * H * 2) + 2 * 2 * (Bb * H * 2)
    resident = 2 * (H * 3 * H * 2) + 2 * (Bb * H * 4) + 2 * (2 * H * 4)
    Tc = _pick_time_chunk(T, bytes_per_tc, resident, vmem_budget)
    nC = T // Tc

    y_f, y_b = pl.pallas_call(
        _bigru_chunk_kernel,
        out_shape=(jax.ShapeDtypeStruct((T, B, H), jnp.bfloat16),
                   jax.ShapeDtypeStruct((T, B, H), jnp.bfloat16)),
        grid_spec=pltpu.PrefetchScalarGridSpec(
            num_scalar_prefetch=0,
            grid=(nB, nC),
            in_specs=[
                pl.BlockSpec((Tc, Bb, 3 * H), lambda b, c: (c, b, 0)),            # gi fwd
                pl.BlockSpec((Tc, Bb, 3 * H), lambda b, c: (nC - 1 - c, b, 0)),   # gi bwd (rev)
                pl.BlockSpec(memory_space=pl.ANY),                                # W_hh fwd (HBM)
                pl.BlockSpec(memory_space=pl.ANY),                                # W_hh bwd (HBM)
                pl.BlockSpec((1, 2 * H), lambda b, c: (0, 0)),                    # b_hh_n [f|b]
            ],
            out_specs=[
                pl.BlockSpec((Tc, Bb, H), lambda b, c: (c, b, 0)),                # y_f chunk
                pl.BlockSpec((Tc, Bb, H), lambda b, c: (nC - 1 - c, b, 0)),       # y_b chunk
            ],
            scratch_shapes=[
                pltpu.VMEM((H, 3 * H), jnp.bfloat16),     # resident W_hh fwd (single buffer)
                pltpu.VMEM((H, 3 * H), jnp.bfloat16),     # resident W_hh bwd (single buffer)
                pltpu.VMEM((Bb, H), jnp.float32),         # carried h fwd
                pltpu.VMEM((Bb, H), jnp.float32),         # carried h bwd
            ]),
        compiler_params=pltpu.CompilerParams(
            dimension_semantics=("parallel", "arbitrary"),   # batch parallel, time sequential
            vmem_limit_bytes=vmem_budget),
    )(gi_f, gi_b, whh_f, whh_b, bn)
    return y_f, y_b


# ----------------------------------------------------------------------------- params / forward

def init_encoder_params(key, vocab_size, embedding_size, hidden_size, num_layers):
    params = {}
    key, k_emb = jax.random.split(key)
    # nn.init.xavier_normal_ on the embedding weight.
    std = (2.0 / (vocab_size + embedding_size)) ** 0.5
    params["embedding"] = std * jax.random.normal(
        k_emb, (vocab_size, embedding_size), jnp.float32)

    bound = 1.0 / (hidden_size ** 0.5)  # PyTorch RNN default init: U(-1/sqrt(H), 1/sqrt(H))
    layers = []
    for l in range(num_layers):
        in_dim = embedding_size if l == 0 else 2 * hidden_size
        dirs = []
        for _d in range(2):             # forward, reverse
            key, k1, k2, k3, k4 = jax.random.split(key, 5)
            dirs.append(dict(
                w_ih=jax.random.uniform(k1, (3 * hidden_size, in_dim), jnp.float32, -bound, bound),
                w_hh=jax.random.uniform(k2, (3 * hidden_size, hidden_size), jnp.float32, -bound, bound),
                b_ih=jax.random.uniform(k3, (3 * hidden_size,), jnp.float32, -bound, bound),
                b_hh=jax.random.uniform(k4, (3 * hidden_size,), jnp.float32, -bound, bound),
            ))
        layers.append(dirs)
    params["gru"] = layers
    return params


def encoder_forward(params, input_batch, input_len=None):
    """input_batch: (B, T) int32 token ids.  input_len is accepted but unused, matching the
    reference forward (it never reads input_len / does not pack sequences)."""
    del input_len
    B, T = input_batch.shape

    # Pad batch to a sublane-friendly multiple (padded rows are discarded at the end).
    B_pad = _round_up(B, 16)
    ids = input_batch if B_pad == B else jnp.pad(input_batch, ((0, B_pad - B), (0, 0)))

    # Embedding gather directly in time-major layout (only the tiny id array is transposed).
    emb = jnp.take(params["embedding"], ids.T, axis=0)              # (T, B_pad, E)
    # TODO(synk): training-mode dropout omitted; module treated as eval() -> identity.

    vmem_budget = _vmem_budget_bytes()
    xs = [emb]
    hiddens = []
    for p_fwd, p_bwd in params["gru"]:
        y_f, y_b = bigru_layer(xs, p_fwd, p_bwd, vmem_budget=vmem_budget)
        xs = [y_f, y_b]              # next layer consumes [y_f | y_b] via split W_ih (no concat)
        hiddens.append(y_f[-1])      # fwd final hidden = state after last time step
        hiddens.append(y_b[0])       # bwd final hidden = state after time step 0

    out = jnp.concatenate(xs, axis=-1)                               # (T, B_pad, 2H) bf16
    output = jnp.transpose(out, (1, 0, 2))[:B].astype(jnp.float32)   # (B, T, 2H) batch_first
    hidden = jnp.stack(hiddens, axis=0)[:, :B].astype(jnp.float32)   # (num_layers*2, B, H)
    return output, hidden


if __name__ == "__main__":
    # Small shapes consistent with the module.
    batch, seq_len = 2, 8
    vocab_size, embedding_size, hidden_size, num_layers = 50, 32, 32, 2

    key = jax.random.PRNGKey(0)
    k_params, k_tok = jax.random.split(key)
    params = init_encoder_params(k_params, vocab_size, embedding_size,
                                 hidden_size, num_layers)

    input_batch = jax.random.randint(k_tok, (batch, seq_len), 0, vocab_size,
                                     dtype=jnp.int32)
    input_len = jnp.full((batch,), seq_len, dtype=jnp.int32)

    fwd = jax.jit(encoder_forward)
    output, hidden = fwd(params, input_batch, input_len)
    jax.block_until_ready((output, hidden))

    assert output.shape == (batch, seq_len, 2 * hidden_size)
    assert hidden.shape == (num_layers * 2, batch, hidden_size)
    assert output.dtype == jnp.float32 and hidden.dtype == jnp.float32
    assert bool(jnp.all(jnp.isfinite(output))) and bool(jnp.all(jnp.isfinite(hidden)))

    print("KERNEL_OK")
</pallas_src>

<mosaic_0001>
module attributes {stable_mosaic.version = 11 : i64} {
  func.func @_bigru_chunk_kernel(%arg0: i32, %arg1: i32, %arg2: memref<8x16x96xbf16, #tpu.memory_space<vmem>>, %arg3: memref<8x16x96xbf16, #tpu.memory_space<vmem>>, %arg4: memref<32x96xbf16, #tpu.memory_space<any>>, %arg5: memref<32x96xbf16, #tpu.memory_space<any>>, %arg6: memref<1x64xf32, #tpu.memory_space<vmem>>, %arg7: memref<8x16x32xbf16, #tpu.memory_space<vmem>>, %arg8: memref<8x16x32xbf16, #tpu.memory_space<vmem>>, %arg9: memref<32x96xbf16, #tpu.memory_space<vmem>>, %arg10: memref<32x96xbf16, #tpu.memory_space<vmem>>, %arg11: memref<16x32xf32, #tpu.memory_space<vmem>>, %arg12: memref<16x32xf32, #tpu.memory_space<vmem>>) attributes {dimension_semantics = [#tpu.dimension_semantics<parallel>, #tpu.dimension_semantics<arbitrary>], iteration_bounds = array<i64: 1, 1>, scalar_prefetch = 0 : i64, scratch_operands = 4 : i64, tpu.core_type = #tpu.core_type<tc>, window_params = [{transform_indices = @transform_0, window_bounds = array<i64: 8, 16, 96>}, {transform_indices = @transform_1, window_bounds = array<i64: 8, 16, 96>}, {}, {}, {pipeline_mode = #tpu.pipeline_mode<synchronous>, transform_indices = @transform_4, window_bounds = array<i64: 1, 64>}, {transform_indices = @transform_5, window_bounds = array<i64: 8, 16, 32>}, {transform_indices = @transform_6, window_bounds = array<i64: 8, 16, 32>}]} {
    %c0_i32 = arith.constant 0 : i32
    %0 = arith.cmpi eq, %arg1, %c0_i32 : i32
    %1 = arith.extui %0 : i1 to i32
    %c0_i32_0 = arith.constant 0 : i32
    %2 = arith.cmpi ne, %1, %c0_i32_0 : i32
    scf.if %2 {
      "tpu.region"() ({
        %635 = tpu.sem_alloc : memref<!tpu.dma_semaphore, #tpu.memory_space<semaphore_mem>>
        tpu.enqueue_dma source(%arg4 : memref<32x96xbf16, #tpu.memory_space<any>>) target(%arg9 : memref<32x96xbf16, #tpu.memory_space<vmem>>) target_semaphore(%635 : memref<!tpu.dma_semaphore, #tpu.memory_space<semaphore_mem>>)
        tpu.wait_dma2 semaphore(%635 : memref<!tpu.dma_semaphore, #tpu.memory_space<semaphore_mem>>) src(%arg4 : memref<32x96xbf16, #tpu.memory_space<any>>) dst(%arg9 : memref<32x96xbf16, #tpu.memory_space<vmem>>)
        tpu.yield
      }) : () -> ()
      "tpu.region"() ({
        %635 = tpu.sem_alloc : memref<!tpu.dma_semaphore, #tpu.memory_space<semaphore_mem>>
        tpu.enqueue_dma source(%arg5 : memref<32x96xbf16, #tpu.memory_space<any>>) target(%arg10 : memref<32x96xbf16, #tpu.memory_space<vmem>>) target_semaphore(%635 : memref<!tpu.dma_semaphore, #tpu.memory_space<semaphore_mem>>)
        tpu.wait_dma2 semaphore(%635 : memref<!tpu.dma_semaphore, #tpu.memory_space<semaphore_mem>>) src(%arg5 : memref<32x96xbf16, #tpu.memory_space<any>>) dst(%arg10 : memref<32x96xbf16, #tpu.memory_space<vmem>>)
        tpu.yield
      }) : () -> ()
      %cst_151 = arith.constant 0.000000e+00 : f32
      %631 = vector.broadcast %cst_151 : f32 to vector<16x32xf32>
      %c0_152 = arith.constant 0 : index
      %c0_153 = arith.constant 0 : index
      %632 = vector.load %arg11[%c0_152, %c0_153] : memref<16x32xf32, #tpu.memory_space<vmem>>, vector<16x32xf32>
      tpu.vector_store %arg11[%c0_152, %c0_153], %631 {strides = array<i32>} : memref<16x32xf32, #tpu.memory_space<vmem>>, vector<16x32xf32>,
      %cst_154 = arith.constant 0.000000e+00 : f32
      %633 = vector.broadcast %cst_154 : f32 to vector<16x32xf32>
      %c0_155 = arith.constant 0 : index
      %c0_156 = arith.constant 0 : index
      %634 = vector.load %arg12[%c0_155, %c0_156] : memref<16x32xf32, #tpu.memory_space<vmem>>, vector<16x32xf32>
      tpu.vector_store %arg12[%c0_155, %c0_156], %633 {strides = array<i32>} : memref<16x32xf32, #tpu.memory_space<vmem>>, vector<16x32xf32>,
    } else {
    }
    %c0 = arith.constant 0 : index
    %c0_1 = arith.constant 0 : index
    %3 = vector.load %arg9[%c0, %c0_1] : memref<32x96xbf16, #tpu.memory_space<vmem>>, vector<32x96xbf16>
    %c0_2 = arith.constant 0 : index
    %c0_3 = arith.constant 0 : index
    %4 = vector.load %arg10[%c0_2, %c0_3] : memref<32x96xbf16, #tpu.memory_space<vmem>>, vector<32x96xbf16>
    %c0_4 = arith.constant 0 : index
    %c0_5 = arith.constant 0 : index
    %5 = vector.load %arg6[%c0_4, %c0_5] : memref<1x64xf32, #tpu.memory_space<vmem>>, vector<1x32xf32>
    %6 = vector.shape_cast %5 : vector<1x32xf32> to vector<1x32xf32>
    %7 = vector.broadcast %6 : vector<1x32xf32> to vector<16x32xf32>
    %c0_6 = arith.constant 0 : index
    %c32 = arith.constant 32 : index
    %8 = vector.load %arg6[%c0_6, %c32] : memref<1x64xf32, #tpu.memory_space<vmem>>, vector<1x32xf32>
    %9 = vector.shape_cast %8 : vector<1x32xf32> to vector<1x32xf32>
    %10 = vector.broadcast %9 : vector<1x32xf32> to vector<16x32xf32>
    %c0_7 = arith.constant 0 : index
    %c0_8 = arith.constant 0 : index
    %11 = vector.load %arg11[%c0_7, %c0_8] : memref<16x32xf32, #tpu.memory_space<vmem>>, vector<16x32xf32>
    %c0_9 = arith.constant 0 : index
    %c0_10 = arith.constant 0 : index
    %12 = vector.load %arg12[%c0_9, %c0_10] : memref<16x32xf32, #tpu.memory_space<vmem>>, vector<16x32xf32>
    %c0_i32_11 = arith.constant 0 : i32
    %13 = arith.truncf %11 : vector<16x32xf32> to vector<16x32xbf16>
    %cst = arith.constant dense<0.000000e+00> : vector<16x96xf32>
    %14 = tpu.matmul %13, %3, %cst {dimension_numbers = #tpu.dot_dimension_numbers<[1], [0], [0], [1], [0, 0, 1, 1], [], []>} : vector<16x32xbf16>, vector<32x96xbf16>, vector<16x96xf32> -> vector<16x96xf32>
    %15 = arith.truncf %12 : vector<16x32xf32> to vector<16x32xbf16>
    %cst_12 = arith.constant dense<0.000000e+00> : vector<16x96xf32>
    %16 = tpu.matmul %15, %4, %cst_12 {dimension_numbers = #tpu.dot_dimension_numbers<[1], [0], [0], [1], [0, 0, 1, 1], [], []>} : vector<16x32xbf16>, vector<32x96xbf16>, vector<16x96xf32> -> vector<16x96xf32>
    %17 = arith.index_cast %c0_i32_11 : i32 to index
    %c0_13 = arith.constant 0 : index
    %c0_14 = arith.constant 0 : index
    %18 = vector.load %arg2[%17, %c0_13, %c0_14] : memref<8x16x96xbf16, #tpu.memory_space<vmem>>, vector<1x16x96xbf16>
    %19 = vector.shape_cast %18 : vector<1x16x96xbf16> to vector<16x96xbf16>
    %20 = arith.extf %19 : vector<16x96xbf16> to vector<16x96xf32>
    %c7_i32 = arith.constant 7 : i32
    %21 = arith.subi %c7_i32, %c0_i32_11 : i32
    %22 = arith.index_cast %21 : i32 to index
    %c0_15 = arith.constant 0 : index
    %c0_16 = arith.constant 0 : index
    %23 = vector.load %arg3[%22, %c0_15, %c0_16] : memref<8x16x96xbf16, #tpu.memory_space<vmem>>, vector<1x16x96xbf16>
    %24 = vector.shape_cast %23 : vector<1x16x96xbf16> to vector<16x96xbf16>
    %25 = arith.extf %24 : vector<16x96xbf16> to vector<16x96xf32>
    %26 = vector.extract_strided_slice %20 {offsets = [0, 0], sizes = [16, 32], strides = [1, 1]} : vector<16x96xf32> to vector<16x32xf32>
    %27 = vector.extract_strided_slice %14 {offsets = [0, 0], sizes = [16, 32], strides = [1, 1]} : vector<16x96xf32> to vector<16x32xf32>
    %28 = arith.addf %26, %27 : vector<16x32xf32>
    %29 = arith.negf %28 : vector<16x32xf32>
    %30 = math.exp %29 : vector<16x32xf32>
    %cst_17 = arith.constant 1.000000e+00 : f32
    %31 = vector.broadcast %cst_17 : f32 to vector<16x32xf32>
    %32 = arith.addf %31, %30 : vector<16x32xf32>
    %33 = arith.divf %31, %32 : vector<16x32xf32>
    %34 = vector.extract_strided_slice %20 {offsets = [0, 32], sizes = [16, 32], strides = [1, 1]} : vector<16x96xf32> to vector<16x32xf32>
    %35 = vector.extract_strided_slice %14 {offsets = [0, 32], sizes = [16, 32], strides = [1, 1]} : vector<16x96xf32> to vector<16x32xf32>
    %36 = arith.addf %34, %35 : vector<16x32xf32>
    %37 = arith.negf %36 : vector<16x32xf32>
    %38 = math.exp %37 : vector<16x32xf32>
    %cst_18 = arith.constant 1.000000e+00 : f32
    %39 = vector.broadcast %cst_18 : f32 to vector<16x32xf32>
    %40 = arith.addf %39, %38 : vector<16x32xf32>
    %41 = arith.divf %39, %40 : vector<16x32xf32>
    %42 = vector.extract_strided_slice %20 {offsets = [0, 64], sizes = [16, 32], strides = [1, 1]} : vector<16x96xf32> to vector<16x32xf32>
    %43 = vector.extract_strided_slice %14 {offsets = [0, 64], sizes = [16, 32], strides = [1, 1]} : vector<16x96xf32> to vector<16x32xf32>
    %44 = arith.addf %43, %7 : vector<16x32xf32>
    %45 = arith.mulf %33, %44 : vector<16x32xf32>
    %46 = arith.addf %42, %45 : vector<16x32xf32>
    %47 = math.tanh %46 : vector<16x32xf32>
    %cst_19 = arith.constant 1.000000e+00 : f32
    %48 = vector.broadcast %cst_19 : f32 to vector<16x32xf32>
    %49 = arith.subf %48, %41 : vector<16x32xf32>
    %50 = arith.mulf %49, %47 : vector<16x32xf32>
    %51 = arith.mulf %41, %11 : vector<16x32xf32>
    %52 = arith.addf %50, %51 : vector<16x32xf32>
    %53 = vector.extract_strided_slice %25 {offsets = [0, 0], sizes = [16, 32], strides = [1, 1]} : vector<16x96xf32> to vector<16x32xf32>
    %54 = vector.extract_strided_slice %16 {offsets = [0, 0], sizes = [16, 32], strides = [1, 1]} : vector<16x96xf32> to vector<16x32xf32>
    %55 = arith.addf %53, %54 : vector<16x32xf32>
    %56 = arith.negf %55 : vector<16x32xf32>
    %57 = math.exp %56 : vector<16x32xf32>
    %cst_20 = arith.constant 1.000000e+00 : f32
    %58 = vector.broadcast %cst_20 : f32 to vector<16x32xf32>
    %59 = arith.addf %58, %57 : vector<16x32xf32>
    %60 = arith.divf %58, %59 : vector<16x32xf32>
    %61 = vector.extract_strided_slice %25 {offsets = [0, 32], sizes = [16, 32], strides = [1, 1]} : vector<16x96xf32> to vector<16x32xf32>
    %62 = vector.extract_strided_slice %16 {offsets = [0, 32], sizes = [16, 32], strides = [1, 1]} : vector<16x96xf32> to vector<16x32xf32>
    %63 = arith.addf %61, %62 : vector<16x32xf32>
    %64 = arith.negf %63 : vector<16x32xf32>
    %65 = math.exp %64 : vector<16x32xf32>
    %cst_21 = arith.constant 1.000000e+00 : f32
    %66 = vector.broadcast %cst_21 : f32 to vector<16x32xf32>
    %67 = arith.addf %66, %65 : vector<16x32xf32>
    %68 = arith.divf %66, %67 : vector<16x32xf32>
    %69 = vector.extract_strided_slice %25 {offsets = [0, 64], sizes = [16, 32], strides = [1, 1]} : vector<16x96xf32> to vector<16x32xf32>
    %70 = vector.extract_strided_slice %16 {offsets = [0, 64], sizes = [16, 32], strides = [1, 1]} : vector<16x96xf32> to vector<16x32xf32>
    %71 = arith.addf %70, %10 : vector<16x32xf32>
    %72 = arith.mulf %60, %71 : vector<16x32xf32>
    %73 = arith.addf %69, %72 : vector<16x32xf32>
    %74 = math.tanh %73 : vector<16x32xf32>
    %cst_22 = arith.constant 1.000000e+00 : f32
    %75 = vector.broadcast %cst_22 : f32 to vector<16x32xf32>
    %76 = arith.subf %75, %68 : vector<16x32xf32>
    %77 = arith.mulf %76, %74 : vector<16x32xf32>
    %78 = arith.mulf %68, %12 : vector<16x32xf32>
    %79 = arith.addf %77, %78 : vector<16x32xf32>
    %80 = arith.truncf %52 : vector<16x32xf32> to vector<16x32xbf16>
    %81 = arith.index_cast %c0_i32_11 : i32 to index
    %c0_23 = arith.constant 0 : index
    %c0_24 = arith.constant 0 : index
    %82 = vector.load %arg7[%81, %c0_23, %c0_24] : memref<8x16x32xbf16, #tpu.memory_space<vmem>>, vector<1x16x32xbf16>
    %83 = vector.shape_cast %82 : vector<1x16x32xbf16> to vector<16x32xbf16>
    %84 = vector.shape_cast %80 : vector<16x32xbf16> to vector<1x16x32xbf16>
    tpu.vector_store %arg7[%81, %c0_23, %c0_24], %84 {strides = array<i32>} : memref<8x16x32xbf16, #tpu.memory_space<vmem>>, vector<1x16x32xbf16>,
    %85 = arith.truncf %79 : vector<16x32xf32> to vector<16x32xbf16>
    %86 = arith.index_cast %21 : i32 to index
    %c0_25 = arith.constant 0 : index
    %c0_26 = arith.constant 0 : index
    %87 = vector.load %arg8[%86, %c0_25, %c0_26] : memref<8x16x32xbf16, #tpu.memory_space<vmem>>, vector<1x16x32xbf16>
    %88 = vector.shape_cast %87 : vector<1x16x32xbf16> to vector<16x32xbf16>
    %89 = vector.shape_cast %85 : vector<16x32xbf16> to vector<1x16x32xbf16>
    tpu.vector_store %arg8[%86, %c0_25, %c0_26], %89 {strides = array<i32>} : memref<8x16x32xbf16, #tpu.memory_space<vmem>>, vector<1x16x32xbf16>,
    %c1_i32 = arith.constant 1 : i32
    %90 = arith.truncf %52 : vector<16x32xf32> to vector<16x32xbf16>
    %cst_27 = arith.constant dense<0.000000e+00> : vector<16x96xf32>
    %91 = tpu.matmul %90, %3, %cst_27 {dimension_numbers = #tpu.dot_dimension_numbers<[1], [0], [0], [1], [0, 0, 1, 1], [], []>} : vector<16x32xbf16>, vector<32x96xbf16>, vector<16x96xf32> -> vector<16x96xf32>
    %92 = arith.truncf %79 : vector<16x32xf32> to vector<16x32xbf16>
    %cst_28 = arith.constant dense<0.000000e+00> : vector<16x96xf32>
    %93 = tpu.matmul %92, %4, %cst_28 {dimension_numbers = #tpu.dot_dimension_numbers<[1], [0], [0], [1], [0, 0, 1, 1], [], []>} : vector<16x32xbf16>, vector<32x96xbf16>, vector<16x96xf32> -> vector<16x96xf32>
    %94 = arith.index_cast %c1_i32 : i32 to index
    %c0_29 = arith.constant 0 : index
    %c0_30 = arith.constant 0 : index
    %95 = vector.load %arg2[%94, %c0_29, %c0_30] : memref<8x16x96xbf16, #tpu.memory_space<vmem>>, vector<1x16x96xbf16>
    %96 = vector.shape_cast %95 : vector<1x16x96xbf16> to vector<16x96xbf16>
    %97 = arith.extf %96 : vector<16x96xbf16> to vector<16x96xf32>
    %c7_i32_31 = arith.constant 7 : i32
    %98 = arith.subi %c7_i32_31, %c1_i32 : i32
    %99 = arith.index_cast %98 : i32 to index
    %c0_32 = arith.constant 0 : index
    %c0_33 = arith.constant 0 : index
    %100 = vector.load %arg3[%99, %c0_32, %c0_33] : memref<8x16x96xbf16, #tpu.memory_space<vmem>>, vector<1x16x96xbf16>
    %101 = vector.shape_cast %100 : vector<1x16x96xbf16> to vector<16x96xbf16>
    %102 = arith.extf %101 : vector<16x96xbf16> to vector<16x96xf32>
    %103 = vector.extract_strided_slice %97 {offsets = [0, 0], sizes = [16, 32], strides = [1, 1]} : vector<16x96xf32> to vector<16x32xf32>
    %104 = vector.extract_strided_slice %91 {offsets = [0, 0], sizes = [16, 32], strides = [1, 1]} : vector<16x96xf32> to vector<16x32xf32>
    %105 = arith.addf %103, %104 : vector<16x32xf32>
    %106 = arith.negf %105 : vector<16x32xf32>
    %107 = math.exp %106 : vector<16x32xf32>
    %cst_34 = arith.constant 1.000000e+00 : f32
    %108 = vector.broadcast %cst_34 : f32 to vector<16x32xf32>
    %109 = arith.addf %108, %107 : vector<16x32xf32>
    %110 = arith.divf %108, %109 : vector<16x32xf32>
    %111 = vector.extract_strided_slice %97 {offsets = [0, 32], sizes = [16, 32], strides = [1, 1]} : vector<16x96xf32> to vector<16x32xf32>
    %112 = vector.extract_strided_slice %91 {offsets = [0, 32], sizes = [16, 32], strides = [1, 1]} : vector<16x96xf32> to vector<16x32xf32>
    %113 = arith.addf %111, %112 : vector<16x32xf32>
    %114 = arith.negf %113 : vector<16x32xf32>
    %115 = math.exp %114 : vector<16x32xf32>
    %cst_35 = arith.constant 1.000000e+00 : f32
    %116 = vector.broadcast %cst_35 : f32 to vector<16x32xf32>
    %117 = arith.addf %116, %115 : vector<16x32xf32>
    %118 = arith.divf %116, %117 : vector<16x32xf32>
    %119 = vector.extract_strided_slice %97 {offsets = [0, 64], sizes = [16, 32], strides = [1, 1]} : vector<16x96xf32> to vector<16x32xf32>
    %120 = vector.extract_strided_slice %91 {offsets = [0, 64], sizes = [16, 32], strides = [1, 1]} : vector<16x96xf32> to vector<16x32xf32>
    %121 = arith.addf %120, %7 : vector<16x32xf32>
    %122 = arith.mulf %110, %121 : vector<16x32xf32>
    %123 = arith.addf %119, %122 : vector<16x32xf32>
    %124 = math.tanh %123 : vector<16x32xf32>
    %cst_36 = arith.constant 1.000000e+00 : f32
    %125 = vector.broadcast %cst_36 : f32 to vector<16x32xf32>
    %126 = arith.subf %125, %118 : vector<16x32xf32>
    %127 = arith.mulf %126, %124 : vector<16x32xf32>
    %128 = arith.mulf %118, %52 : vector<16x32xf32>
    %129 = arith.addf %127, %128 : vector<16x32xf32>
    %130 = vector.extract_strided_slice %102 {offsets = [0, 0], sizes = [16, 32], strides = [1, 1]} : vector<16x96xf32> to vector<16x32xf32>
    %131 = vector.extract_strided_slice %93 {offsets = [0, 0], sizes = [16, 32], strides = [1, 1]} : vector<16x96xf32> to vector<16x32xf32>
    %132 = arith.addf %130, %131 : vector<16x32xf32>
    %133 = arith.negf %132 : vector<16x32xf32>
    %134 = math.exp %133 : vector<16x32xf32>
    %cst_37 = arith.constant 1.000000e+00 : f32
    %135 = vector.broadcast %cst_37 : f32 to vector<16x32xf32>
    %136 = arith.addf %135, %134 : vector<16x32xf32>
    %137 = arith.divf %135, %136 : vector<16x32xf32>
    %138 = vector.extract_strided_slice %102 {offsets = [0, 32], sizes = [16, 32], strides = [1, 1]} : vector<16x96xf32> to vector<16x32xf32>
    %139 = vector.extract_strided_slice %93 {offsets = [0, 32], sizes = [16, 32], strides = [1, 1]} : vector<16x96xf32> to vector<16x32xf32>
    %140 = arith.addf %138, %139 : vector<16x32xf32>
    %141 = arith.negf %140 : vector<16x32xf32>
    %142 = math.exp %141 : vector<16x32xf32>
    %cst_38 = arith.constant 1.000000e+00 : f32
    %143 = vector.broadcast %cst_38 : f32 to vector<16x32xf32>
    %144 = arith.addf %143, %142 : vector<16x32xf32>
    %145 = arith.divf %143, %144 : vector<16x32xf32>
    %146 = vector.extract_strided_slice %102 {offsets = [0, 64], sizes = [16, 32], strides = [1, 1]} : vector<16x96xf32> to vector<16x32xf32>
    %147 = vector.extract_strided_slice %93 {offsets = [0, 64], sizes = [16, 32], strides = [1, 1]} : vector<16x96xf32> to vector<16x32xf32>
    %148 = arith.addf %147, %10 : vector<16x32xf32>
    %149 = arith.mulf %137, %148 : vector<16x32xf32>
    %150 = arith.addf %146, %149 : vector<16x32xf32>
    %151 = math.tanh %150 : vector<16x32xf32>
    %cst_39 = arith.constant 1.000000e+00 : f32
    %152 = vector.broadcast %cst_39 : f32 to vector<16x32xf32>
    %153 = arith.subf %152, %145 : vector<16x32xf32>
    %154 = arith.mulf %153, %151 : vector<16x32xf32>
    %155 = arith.mulf %145, %79 : vector<16x32xf32>
    %156 = arith.addf %154, %155 : vector<16x32xf32>
    %157 = arith.truncf %129 : vector<16x32xf32> to vector<16x32xbf16>
    %158 = arith.index_cast %c1_i32 : i32 to index
    %c0_40 = arith.constant 0 : index
    %c0_41 = arith.constant 0 : index
    %159 = vector.load %arg7[%158, %c0_40, %c0_41] : memref<8x16x32xbf16, #tpu.memory_space<vmem>>, vector<1x16x32xbf16>
    %160 = vector.shape_cast %159 : vector<1x16x32xbf16> to vector<16x32xbf16>
    %161 = vector.shape_cast %157 : vector<16x32xbf16> to vector<1x16x32xbf16>
    tpu.vector_store %arg7[%158, %c0_40, %c0_41], %161 {strides = array<i32>} : memref<8x16x32xbf16, #tpu.memory_space<vmem>>, vector<1x16x32xbf16>,
    %162 = arith.truncf %156 : vector<16x32xf32> to vector<16x32xbf16>
    %163 = arith.index_cast %98 : i32 to index
    %c0_42 = arith.constant 0 : index
    %c0_43 = arith.constant 0 : index
    %164 = vector.load %arg8[%163, %c0_42, %c0_43] : memref<8x16x32xbf16, #tpu.memory_space<vmem>>, vector<1x16x32xbf16>
    %165 = vector.shape_cast %164 : vector<1x16x32xbf16> to vector<16x32xbf16>
    %166 = vector.shape_cast %162 : vector<16x32xbf16> to vector<1x16x32xbf16>
    tpu.vector_store %arg8[%163, %c0_42, %c0_43], %166 {strides = array<i32>} : memref<8x16x32xbf16, #tpu.memory_space<vmem>>, vector<1x16x32xbf16>,
    %c2_i32 = arith.constant 2 : i32
    %167 = arith.truncf %129 : vector<16x32xf32> to vector<16x32xbf16>
    %cst_44 = arith.constant dense<0.000000e+00> : vector<16x96xf32>
    %168 = tpu.matmul %167, %3, %cst_44 {dimension_numbers = #tpu.dot_dimension_numbers<[1], [0], [0], [1], [0, 0, 1, 1], [], []>} : vector<16x32xbf16>, vector<32x96xbf16>, vector<16x96xf32> -> vector<16x96xf32>
    %169 = arith.truncf %156 : vector<16x32xf32> to vector<16x32xbf16>
    %cst_45 = arith.constant dense<0.000000e+00> : vector<16x96xf32>
    %170 = tpu.matmul %169, %4, %cst_45 {dimension_numbers = #tpu.dot_dimension_numbers<[1], [0], [0], [1], [0, 0, 1, 1], [], []>} : vector<16x32xbf16>, vector<32x96xbf16>, vector<16x96xf32> -> vector<16x96xf32>
    %171 = arith.index_cast %c2_i32 : i32 to index
    %c0_46 = arith.constant 0 : index
    %c0_47 = arith.constant 0 : index
    %172 = vector.load %arg2[%171, %c0_46, %c0_47] : memref<8x16x96xbf16, #tpu.memory_space<vmem>>, vector<1x16x96xbf16>
    %173 = vector.shape_cast %172 : vector<1x16x96xbf16> to vector<16x96xbf16>
    %174 = arith.extf %173 : vector<16x96xbf16> to vector<16x96xf32>
    %c7_i32_48 = arith.constant 7 : i32
    %175 = arith.subi %c7_i32_48, %c2_i32 : i32
    %176 = arith.index_cast %175 : i32 to index
    %c0_49 = arith.constant 0 : index
    %c0_50 = arith.constant 0 : index
    %177 = vector.load %arg3[%176, %c0_49, %c0_50] : memref<8x16x96xbf16, #tpu.memory_space<vmem>>, vector<1x16x96xbf16>
    %178 = vector.shape_cast %177 : vector<1x16x96xbf16> to vector<16x96xbf16>
    %179 = arith.extf %178 : vector<16x96xbf16> to vector<16x96xf32>
    %180 = vector.extract_strided_slice %174 {offsets = [0, 0], sizes = [16, 32], strides = [1, 1]} : vector<16x96xf32> to vector<16x32xf32>
    %181 = vector.extract_strided_slice %168 {offsets = [0, 0], sizes = [16, 32], strides = [1, 1]} : vector<16x96xf32> to vector<16x32xf32>
    %182 = arith.addf %180, %181 : vector<16x32xf32>
    %183 = arith.negf %182 : vector<16x32xf32>
    %184 = math.exp %183 : vector<16x32xf32>
    %cst_51 = arith.constant 1.000000e+00 : f32
    %185 = vector.broadcast %cst_51 : f32 to vector<16x32xf32>
    %186 = arith.addf %185, %184 : vector<16x32xf32>
    %187 = arith.divf %185, %186 : vector<16x32xf32>
    %188 = vector.extract_strided_slice %174 {offsets = [0, 32], sizes = [16, 32], strides = [1, 1]} : vector<16x96xf32> to vector<16x32xf32>
    %189 = vector.extract_strided_slice %168 {offsets = [0, 32], sizes = [16, 32], strides = [1, 1]} : vector<16x96xf32> to vector<16x32xf32>
    %190 = arith.addf %188, %189 : vector<16x32xf32>
    %191 = arith.negf %190 : vector<16x32xf32>
    %192 = math.exp %191 : vector<16x32xf32>
    %cst_52 = arith.constant 1.000000e+00 : f32
    %193 = vector.broadcast %cst_52 : f32 to vector<16x32xf32>
    %194 = arith.addf %193, %192 : vector<16x32xf32>
    %195 = arith.divf %193, %194 : vector<16x32xf32>
    %196 = vector.extract_strided_slice %174 {offsets = [0, 64], sizes = [16, 32], strides = [1, 1]} : vector<16x96xf32> to vector<16x32xf32>
    %197 = vector.extract_strided_slice %168 {offsets = [0, 64], sizes = [16, 32], strides = [1, 1]} : vector<16x96xf32> to vector<16x32xf32>
    %198 = arith.addf %197, %7 : vector<16x32xf32>
    %199 = arith.mulf %187, %198 : vector<16x32xf32>
    %200 = arith.addf %196, %199 : vector<16x32xf32>
    %201 = math.tanh %200 : vector<16x32xf32>
    %cst_53 = arith.constant 1.000000e+00 : f32
    %202 = vector.broadcast %cst_53 : f32 to vector<16x32xf32>
    %203 = arith.subf %202, %195 : vector<16x32xf32>
    %204 = arith.mulf %203, %201 : vector<16x32xf32>
    %205 = arith.mulf %195, %129 : vector<16x32xf32>
    %206 = arith.addf %204, %205 : vector<16x32xf32>
    %207 = vector.extract_strided_slice %179 {offsets = [0, 0], sizes = [16, 32], strides = [1, 1]} : vector<16x96xf32> to vector<16x32xf32>
    %208 = vector.extract_strided_slice %170 {offsets = [0, 0], sizes = [16, 32], strides = [1, 1]} : vector<16x96xf32> to vector<16x32xf32>
    %209 = arith.addf %207, %208 : vector<16x32xf32>
    %210 = arith.negf %209 : vector<16x32xf32>
    %211 = math.exp %210 : vector<16x32xf32>
    %cst_54 = arith.constant 1.000000e+00 : f32
    %212 = vector.broadcast %cst_54 : f32 to vector<16x32xf32>
    %213 = arith.addf %212, %211 : vector<16x32xf32>
    %214 = arith.divf %212, %213 : vector<16x32xf32>
    %215 = vector.extract_strided_slice %179 {offsets = [0, 32], sizes = [16, 32], strides = [1, 1]} : vector<16x96xf32> to vector<16x32xf32>
    %216 = vector.extract_strided_slice %170 {offsets = [0, 32], sizes = [16, 32], strides = [1, 1]} : vector<16x96xf32> to vector<16x32xf32>
    %217 = arith.addf %215, %216 : vector<16x32xf32>
    %218 = arith.negf %217 : vector<16x32xf32>
    %219 = math.exp %218 : vector<16x32xf32>
    %cst_55 = arith.constant 1.000000e+00 : f32
    %220 = vector.broadcast %cst_55 : f32 to vector<16x32xf32>
    %221 = arith.addf %220, %219 : vector<16x32xf32>
    %222 = arith.divf %220, %221 : vector<16x32xf32>
    %223 = vector.extract_strided_slice %179 {offsets = [0, 64], sizes = [16, 32], strides = [1, 1]} : vector<16x96xf32> to vector<16x32xf32>
    %224 = vector.extract_strided_slice %170 {offsets = [0, 64], sizes = [16, 32], strides = [1, 1]} : vector<16x96xf32> to vector<16x32xf32>
    %225 = arith.addf %224, %10 : vector<16x32xf32>
    %226 = arith.mulf %214, %225 : vector<16x32xf32>
    %227 = arith.addf %223, %226 : vector<16x32xf32>
    %228 = math.tanh %227 : vector<16x32xf32>
    %cst_56 = arith.constant 1.000000e+00 : f32
    %229 = vector.broadcast %cst_56 : f32 to vector<16x32xf32>
    %230 = arith.subf %229, %222 : vector<16x32xf32>
    %231 = arith.mulf %230, %228 : vector<16x32xf32>
    %232 = arith.mulf %222, %156 : vector<16x32xf32>
    %233 = arith.addf %231, %232 : vector<16x32xf32>
    %234 = arith.truncf %206 : vector<16x32xf32> to vector<16x32xbf16>
    %235 = arith.index_cast %c2_i32 : i32 to index
    %c0_57 = arith.constant 0 : index
    %c0_58 = arith.constant 0 : index
    %236 = vector.load %arg7[%235, %c0_57, %c0_58] : memref<8x16x32xbf16, #tpu.memory_space<vmem>>, vector<1x16x32xbf16>
    %237 = vector.shape_cast %236 : vector<1x16x32xbf16> to vector<16x32xbf16>
    %238 = vector.shape_cast %234 : vector<16x32xbf16> to vector<1x16x32xbf16>
    tpu.vector_store %arg7[%235, %c0_57, %c0_58], %238 {strides = array<i32>} : memref<8x16x32xbf16, #tpu.memory_space<vmem>>, vector<1x16x32xbf16>,
    %239 = arith.truncf %233 : vector<16x32xf32> to vector<16x32xbf16>
    %240 = arith.index_cast %175 : i32 to index
    %c0_59 = arith.constant 0 : index
    %c0_60 = arith.constant 0 : index
    %241 = vector.load %arg8[%240, %c0_59, %c0_60] : memref<8x16x32xbf16, #tpu.memory_space<vmem>>, vector<1x16x32xbf16>
    %242 = vector.shape_cast %241 : vector<1x16x32xbf16> to vector<16x32xbf16>
    %243 = vector.shape_cast %239 : vector<16x32xbf16> to vector<1x16x32xbf16>
    tpu.vector_store %arg8[%240, %c0_59, %c0_60], %243 {strides = array<i32>} : memref<8x16x32xbf16, #tpu.memory_space<vmem>>, vector<1x16x32xbf16>,
    %c3_i32 = arith.constant 3 : i32
    %244 = arith.truncf %206 : vector<16x32xf32> to vector<16x32xbf16>
    %cst_61 = arith.constant dense<0.000000e+00> : vector<16x96xf32>
    %245 = tpu.matmul %244, %3, %cst_61 {dimension_numbers = #tpu.dot_dimension_numbers<[1], [0], [0], [1], [0, 0, 1, 1], [], []>} : vector<16x32xbf16>, vector<32x96xbf16>, vector<16x96xf32> -> vector<16x96xf32>
    %246 = arith.truncf %233 : vector<16x32xf32> to vector<16x32xbf16>
    %cst_62 = arith.constant dense<0.000000e+00> : vector<16x96xf32>
    %247 = tpu.matmul %246, %4, %cst_62 {dimension_numbers = #tpu.dot_dimension_numbers<[1], [0], [0], [1], [0, 0, 1, 1], [], []>} : vector<16x32xbf16>, vector<32x96xbf16>, vector<16x96xf32> -> vector<16x96xf32>
    %248 = arith.index_cast %c3_i32 : i32 to index
    %c0_63 = arith.constant 0 : index
    %c0_64 = arith.constant 0 : index
    %249 = vector.load %arg2[%248, %c0_63, %c0_64] : memref<8x16x96xbf16, #tpu.memory_space<vmem>>, vector<1x16x96xbf16>
    %250 = vector.shape_cast %249 : vector<1x16x96xbf16> to vector<16x96xbf16>
    %251 = arith.extf %250 : vector<16x96xbf16> to vector<16x96xf32>
    %c7_i32_65 = arith.constant 7 : i32
    %252 = arith.subi %c7_i32_65, %c3_i32 : i32
    %253 = arith.index_cast %252 : i32 to index
    %c0_66 = arith.constant 0 : index
    %c0_67 = arith.constant 0 : index
    %254 = vector.load %arg3[%253, %c0_66, %c0_67] : memref<8x16x96xbf16, #tpu.memory_space<vmem>>, vector<1x16x96xbf16>
    %255 = vector.shape_cast %254 : vector<1x16x96xbf16> to vector<16x96xbf16>
    %256 = arith.extf %255 : vector<16x96xbf16> to vector<16x96xf32>
    %257 = vector.extract_strided_slice %251 {offsets = [0, 0], sizes = [16, 32], strides = [1, 1]} : vector<16x96xf32> to vector<16x32xf32>
    %258 = vector.extract_strided_slice %245 {offsets = [0, 0], sizes = [16, 32], strides = [1, 1]} : vector<16x96xf32> to vector<16x32xf32>
    %259 = arith.addf %257, %258 : vector<16x32xf32>
    %260 = arith.negf %259 : vector<16x32xf32>
    %261 = math.exp %260 : vector<16x32xf32>
    %cst_68 = arith.constant 1.000000e+00 : f32
    %262 = vector.broadcast %cst_68 : f32 to vector<16x32xf32>
    %263 = arith.addf %262, %261 : vector<16x32xf32>
    %264 = arith.divf %262, %263 : vector<16x32xf32>
    %265 = vector.extract_strided_slice %251 {offsets = [0, 32], sizes = [16, 32], strides = [1, 1]} : vector<16x96xf32> to vector<16x32xf32>
    %266 = vector.extract_strided_slice %245 {offsets = [0, 32], sizes = [16, 32], strides = [1, 1]} : vector<16x96xf32> to vector<16x32xf32>
    %267 = arith.addf %265, %266 : vector<16x32xf32>
    %268 = arith.negf %267 : vector<16x32xf32>
    %269 = math.exp %268 : vector<16x32xf32>
    %cst_69 = arith.constant 1.000000e+00 : f32
    %270 = vector.broadcast %cst_69 : f32 to vector<16x32xf32>
    %271 = arith.addf %270, %269 : vector<16x32xf32>
    %272 = arith.divf %270, %271 : vector<16x32xf32>
    %273 = vector.extract_strided_slice %251 {offsets = [0, 64], sizes = [16, 32], strides = [1, 1]} : vector<16x96xf32> to vector<16x32xf32>
    %274 = vector.extract_strided_slice %245 {offsets = [0, 64], sizes = [16, 32], strides = [1, 1]} : vector<16x96xf32> to vector<16x32xf32>
    %275 = arith.addf %274, %7 : vector<16x32xf32>
    %276 = arith.mulf %264, %275 : vector<16x32xf32>
    %277 = arith.addf %273, %276 : vector<16x32xf32>
    %278 = math.tanh %277 : vector<16x32xf32>
    %cst_70 = arith.constant 1.000000e+00 : f32
    %279 = vector.broadcast %cst_70 : f32 to vector<16x32xf32>
    %280 = arith.subf %279, %272 : vector<16x32xf32>
    %281 = arith.mulf %280, %278 : vector<16x32xf32>
    %282 = arith.mulf %272, %206 : vector<16x32xf32>
    %283 = arith.addf %281, %282 : vector<16x32xf32>
    %284 = vector.extract_strided_slice %256 {offsets = [0, 0], sizes = [16, 32], strides = [1, 1]} : vector<16x96xf32> to vector<16x32xf32>
    %285 = vector.extract_strided_slice %247 {offsets = [0, 0], sizes = [16, 32], strides = [1, 1]} : vector<16x96xf32> to vector<16x32xf32>
    %286 = arith.addf %284, %285 : vector<16x32xf32>
    %287 = arith.negf %286 : vector<16x32xf32>
    %288 = math.exp %287 : vector<16x32xf32>
    %cst_71 = arith.constant 1.000000e+00 : f32
    %289 = vector.broadcast %cst_71 : f32 to vector<16x32xf32>
    %290 = arith.addf %289, %288 : vector<16x32xf32>
    %291 = arith.divf %289, %290 : vector<16x32xf32>
    %292 = vector.extract_strided_slice %256 {offsets = [0, 32], sizes = [16, 32], strides = [1, 1]} : vector<16x96xf32> to vector<16x32xf32>
    %293 = vector.extract_strided_slice %247 {offsets = [0, 32], sizes = [16, 32], strides = [1, 1]} : vector<16x96xf32> to vector<16x32xf32>
    %294 = arith.addf %292, %293 : vector<16x32xf32>
    %295 = arith.negf %294 : vector<16x32xf32>
    %296 = math.exp %295 : vector<16x32xf32>
    %cst_72 = arith.constant 1.000000e+00 : f32
    %297 = vector.broadcast %cst_72 : f32 to vector<16x32xf32>
    %298 = arith.addf %297, %296 : vector<16x32xf32>
    %299 = arith.divf %297, %298 : vector<16x32xf32>
    %300 = vector.extract_strided_slice %256 {offsets = [0, 64], sizes = [16, 32], strides = [1, 1]} : vector<16x96xf32> to vector<16x32xf32>
    %301 = vector.extract_strided_slice %247 {offsets = [0, 64], sizes = [16, 32], strides = [1, 1]} : vector<16x96xf32> to vector<16x32xf32>
    %302 = arith.addf %301, %10 : vector<16x32xf32>
    %303 = arith.mulf %291, %302 : vector<16x32xf32>
    %304 = arith.addf %300, %303 : vector<16x32xf32>
    %305 = math.tanh %304 : vector<16x32xf32>
    %cst_73 = arith.constant 1.000000e+00 : f32
    %306 = vector.broadcast %cst_73 : f32 to vector<16x32xf32>
    %307 = arith.subf %306, %299 : vector<16x32xf32>
    %308 = arith.mulf %307, %305 : vector<16x32xf32>
    %309 = arith.mulf %299, %233 : vector<16x32xf32>
    %310 = arith.addf %308, %309 : vector<16x32xf32>
    %311 = arith.truncf %283 : vector<16x32xf32> to vector<16x32xbf16>
    %312 = arith.index_cast %c3_i32 : i32 to index
    %c0_74 = arith.constant 0 : index
    %c0_75 = arith.constant 0 : index
    %313 = vector.load %arg7[%312, %c0_74, %c0_75] : memref<8x16x32xbf16, #tpu.memory_space<vmem>>, vector<1x16x32xbf16>
    %314 = vector.shape_cast %313 : vector<1x16x32xbf16> to vector<16x32xbf16>
    %315 = vector.shape_cast %311 : vector<16x32xbf16> to vector<1x16x32xbf16>
    tpu.vector_store %arg7[%312, %c0_74, %c0_75], %315 {strides = array<i32>} : memref<8x16x32xbf16, #tpu.memory_space<vmem>>, vector<1x16x32xbf16>,
    %316 = arith.truncf %310 : vector<16x32xf32> to vector<16x32xbf16>
    %317 = arith.index_cast %252 : i32 to index
    %c0_76 = arith.constant 0 : index
    %c0_77 = arith.constant 0 : index
    %318 = vector.load %arg8[%317, %c0_76, %c0_77] : memref<8x16x32xbf16, #tpu.memory_space<vmem>>, vector<1x16x32xbf16>
    %319 = vector.shape_cast %318 : vector<1x16x32xbf16> to vector<16x32xbf16>
    %320 = vector.shape_cast %316 : vector<16x32xbf16> to vector<1x16x32xbf16>
    tpu.vector_store %arg8[%317, %c0_76, %c0_77], %320 {strides = array<i32>} : memref<8x16x32xbf16, #tpu.memory_space<vmem>>, vector<1x16x32xbf16>,
    %c4_i32 = arith.constant 4 : i32
    %321 = arith.truncf %283 : vector<16x32xf32> to vector<16x32xbf16>
    %cst_78 = arith.constant dense<0.000000e+00> : vector<16x96xf32>
    %322 = tpu.matmul %321, %3, %cst_78 {dimension_numbers = #tpu.dot_dimension_numbers<[1], [0], [0], [1], [0, 0, 1, 1], [], []>} : vector<16x32xbf16>, vector<32x96xbf16>, vector<16x96xf32> -> vector<16x96xf32>
    %323 = arith.truncf %310 : vector<16x32xf32> to vector<16x32xbf16>
    %cst_79 = arith.constant dense<0.000000e+00> : vector<16x96xf32>
    %324 = tpu.matmul %323, %4, %cst_79 {dimension_numbers = #tpu.dot_dimension_numbers<[1], [0], [0], [1], [0, 0, 1, 1], [], []>} : vector<16x32xbf16>, vector<32x96xbf16>, vector<16x96xf32> -> vector<16x96xf32>
    %325 = arith.index_cast %c4_i32 : i32 to index
    %c0_80 = arith.constant 0 : index
    %c0_81 = arith.constant 0 : index
    %326 = vector.load %arg2[%325, %c0_80, %c0_81] : memref<8x16x96xbf16, #tpu.memory_space<vmem>>, vector<1x16x96xbf16>
    %327 = vector.shape_cast %326 : vector<1x16x96xbf16> to vector<16x96xbf16>
    %328 = arith.extf %327 : vector<16x96xbf16> to vector<16x96xf32>
    %c7_i32_82 = arith.constant 7 : i32
    %329 = arith.subi %c7_i32_82, %c4_i32 : i32
    %330 = arith.index_cast %329 : i32 to index
    %c0_83 = arith.constant 0 : index
    %c0_84 = arith.constant 0 : index
    %331 = vector.load %arg3[%330, %c0_83, %c0_84] : memref<8x16x96xbf16, #tpu.memory_space<vmem>>, vector<1x16x96xbf16>
    %332 = vector.shape_cast %331 : vector<1x16x96xbf16> to vector<16x96xbf16>
    %333 = arith.extf %332 : vector<16x96xbf16> to vector<16x96xf32>
    %334 = vector.extract_strided_slice %328 {offsets = [0, 0], sizes = [16, 32], strides = [1, 1]} : vector<16x96xf32> to vector<16x32xf32>
    %335 = vector.extract_strided_slice %322 {offsets = [0, 0], sizes = [16, 32], strides = [1, 1]} : vector<16x96xf32> to vector<16x32xf32>
    %336 = arith.addf %334, %335 : vector<16x32xf32>
    %337 = arith.negf %336 : vector<16x32xf32>
    %338 = math.exp %337 : vector<16x32xf32>
    %cst_85 = arith.constant 1.000000e+00 : f32
    %339 = vector.broadcast %cst_85 : f32 to vector<16x32xf32>
    %340 = arith.addf %339, %338 : vector<16x32xf32>
    %341 = arith.divf %339, %340 : vector<16x32xf32>
    %342 = vector.extract_strided_slice %328 {offsets = [0, 32], sizes = [16, 32], strides = [1, 1]} : vector<16x96xf32> to vector<16x32xf32>
    %343 = vector.extract_strided_slice %322 {offsets = [0, 32], sizes = [16, 32], strides = [1, 1]} : vector<16x96xf32> to vector<16x32xf32>
    %344 = arith.addf %342, %343 : vector<16x32xf32>
    %345 = arith.negf %344 : vector<16x32xf32>
    %346 = math.exp %345 : vector<16x32xf32>
    %cst_86 = arith.constant 1.000000e+00 : f32
    %347 = vector.broadcast %cst_86 : f32 to vector<16x32xf32>
    %348 = arith.addf %347, %346 : vector<16x32xf32>
    %349 = arith.divf %347, %348 : vector<16x32xf32>
    %350 = vector.extract_strided_slice %328 {offsets = [0, 64], sizes = [16, 32], strides = [1, 1]} : vector<16x96xf32> to vector<16x32xf32>
    %351 = vector.extract_strided_slice %322 {offsets = [0, 64], sizes = [16, 32], strides = [1, 1]} : vector<16x96xf32> to vector<16x32xf32>
    %352 = arith.addf %351, %7 : vector<16x32xf32>
    %353 = arith.mulf %341, %352 : vector<16x32xf32>
    %354 = arith.addf %350, %353 : vector<16x32xf32>
    %355 = math.tanh %354 : vector<16x32xf32>
    %cst_87 = arith.constant 1.000000e+00 : f32
    %356 = vector.broadcast %cst_87 : f32 to vector<16x32xf32>
    %357 = arith.subf %356, %349 : vector<16x32xf32>
    %358 = arith.mulf %357, %355 : vector<16x32xf32>
    %359 = arith.mulf %349, %283 : vector<16x32xf32>
    %360 = arith.addf %358, %359 : vector<16x32xf32>
    %361 = vector.extract_strided_slice %333 {offsets = [0, 0], sizes = [16, 32], strides = [1, 1]} : vector<16x96xf32> to vector<16x32xf32>
    %362 = vector.extract_strided_slice %324 {offsets = [0, 0], sizes = [16, 32], strides = [1, 1]} : vector<16x96xf32> to vector<16x32xf32>
    %363 = arith.addf %361, %362 : vector<16x32xf32>
    %364 = arith.negf %363 : vector<16x32xf32>
    %365 = math.exp %364 : vector<16x32xf32>
    %cst_88 = arith.constant 1.000000e+00 : f32
    %366 = vector.broadcast %cst_88 : f32 to vector<16x32xf32>
    %367 = arith.addf %366, %365 : vector<16x32xf32>
    %368 = arith.divf %366, %367 : vector<16x32xf32>
    %369 = vector.extract_strided_slice %333 {offsets = [0, 32], sizes = [16, 32], strides = [1, 1]} : vector<16x96xf32> to vector<16x32xf32>
    %370 = vector.extract_strided_slice %324 {offsets = [0, 32], sizes = [16, 32], strides = [1, 1]} : vector<16x96xf32> to vector<16x32xf32>
    %371 = arith.addf %369, %370 : vector<16x32xf32>
    %372 = arith.negf %371 : vector<16x32xf32>
    %373 = math.exp %372 : vector<16x32xf32>
    %cst_89 = arith.constant 1.000000e+00 : f32
    %374 = vector.broadcast %cst_89 : f32 to vector<16x32xf32>
    %375 = arith.addf %374, %373 : vector<16x32xf32>
    %376 = arith.divf %374, %375 : vector<16x32xf32>
    %377 = vector.extract_strided_slice %333 {offsets = [0, 64], sizes = [16, 32], strides = [1, 1]} : vector<16x96xf32> to vector<16x32xf32>
    %378 = vector.extract_strided_slice %324 {offsets = [0, 64], sizes = [16, 32], strides = [1, 1]} : vector<16x96xf32> to vector<16x32xf32>
    %379 = arith.addf %378, %10 : vector<16x32xf32>
    %380 = arith.mulf %368, %379 : vector<16x32xf32>
    %381 = arith.addf %377, %380 : vector<16x32xf32>
    %382 = math.tanh %381 : vector<16x32xf32>
    %cst_90 = arith.constant 1.000000e+00 : f32
    %383 = vector.broadcast %cst_90 : f32 to vector<16x32xf32>
    %384 = arith.subf %383, %376 : vector<16x32xf32>
    %385 = arith.mulf %384, %382 : vector<16x32xf32>
    %386 = arith.mulf %376, %310 : vector<16x32xf32>
    %387 = arith.addf %385, %386 : vector<16x32xf32>
    %388 = arith.truncf %360 : vector<16x32xf32> to vector<16x32xbf16>
    %389 = arith.index_cast %c4_i32 : i32 to index
    %c0_91 = arith.constant 0 : index
    %c0_92 = arith.constant 0 : index
    %390 = vector.load %arg7[%389, %c0_91, %c0_92] : memref<8x16x32xbf16, #tpu.memory_space<vmem>>, vector<1x16x32xbf16>
    %391 = vector.shape_cast %390 : vector<1x16x32xbf16> to vector<16x32xbf16>
    %392 = vector.shape_cast %388 : vector<16x32xbf16> to vector<1x16x32xbf16>
    tpu.vector_store %arg7[%389, %c0_91, %c0_92], %392 {strides = array<i32>} : memref<8x16x32xbf16, #tpu.memory_space<vmem>>, vector<1x16x32xbf16>,
    %393 = arith.truncf %387 : vector<16x32xf32> to vector<16x32xbf16>
    %394 = arith.index_cast %329 : i32 to index
    %c0_93 = arith.constant 0 : index
    %c0_94 = arith.constant 0 : index
    %395 = vector.load %arg8[%394, %c0_93, %c0_94] : memref<8x16x32xbf16, #tpu.memory_space<vmem>>, vector<1x16x32xbf16>
    %396 = vector.shape_cast %395 : vector<1x16x32xbf16> to vector<16x32xbf16>
    %397 = vector.shape_cast %393 : vector<16x32xbf16> to vector<1x16x32xbf16>
    tpu.vector_store %arg8[%394, %c0_93, %c0_94], %397 {strides = array<i32>} : memref<8x16x32xbf16, #tpu.memory_space<vmem>>, vector<1x16x32xbf16>,
    %c5_i32 = arith.constant 5 : i32
    %398 = arith.truncf %360 : vector<16x32xf32> to vector<16x32xbf16>
    %cst_95 = arith.constant dense<0.000000e+00> : vector<16x96xf32>
    %399 = tpu.matmul %398, %3, %cst_95 {dimension_numbers = #tpu.dot_dimension_numbers<[1], [0], [0], [1], [0, 0, 1, 1], [], []>} : vector<16x32xbf16>, vector<32x96xbf16>, vector<16x96xf32> -> vector<16x96xf32>
    %400 = arith.truncf %387 : vector<16x32xf32> to vector<16x32xbf16>
    %cst_96 = arith.constant dense<0.000000e+00> : vector<16x96xf32>
    %401 = tpu.matmul %400, %4, %cst_96 {dimension_numbers = #tpu.dot_dimension_numbers<[1], [0], [0], [1], [0, 0, 1, 1], [], []>} : vector<16x32xbf16>, vector<32x96xbf16>, vector<16x96xf32> -> vector<16x96xf32>
    %402 = arith.index_cast %c5_i32 : i32 to index
    %c0_97 = arith.constant 0 : index
    %c0_98 = arith.constant 0 : index
    %403 = vector.load %arg2[%402, %c0_97, %c0_98] : memref<8x16x96xbf16, #tpu.memory_space<vmem>>, vector<1x16x96xbf16>
    %404 = vector.shape_cast %403 : vector<1x16x96xbf16> to vector<16x96xbf16>
    %405 = arith.extf %404 : vector<16x96xbf16> to vector<16x96xf32>
    %c7_i32_99 = arith.constant 7 : i32
    %406 = arith.subi %c7_i32_99, %c5_i32 : i32
    %407 = arith.index_cast %406 : i32 to index
    %c0_100 = arith.constant 0 : index
    %c0_101 = arith.constant 0 : index
    %408 = vector.load %arg3[%407, %c0_100, %c0_101] : memref<8x16x96xbf16, #tpu.memory_space<vmem>>, vector<1x16x96xbf16>
    %409 = vector.shape_cast %408 : vector<1x16x96xbf16> to vector<16x96xbf16>
    %410 = arith.extf %409 : vector<16x96xbf16> to vector<16x96xf32>
    %411 = vector.extract_strided_slice %405 {offsets = [0, 0], sizes = [16, 32], strides = [1, 1]} : vector<16x96xf32> to vector<16x32xf32>
    %412 = vector.extract_strided_slice %399 {offsets = [0, 0], sizes = [16, 32], strides = [1, 1]} : vector<16x96xf32> to vector<16x32xf32>
    %413 = arith.addf %411, %412 : vector<16x32xf32>
    %414 = arith.negf %413 : vector<16x32xf32>
    %415 = math.exp %414 : vector<16x32xf32>
    %cst_102 = arith.constant 1.000000e+00 : f32
    %416 = vector.broadcast %cst_102 : f32 to vector<16x32xf32>
    %417 = arith.addf %416, %415 : vector<16x32xf32>
    %418 = arith.divf %416, %417 : vector<16x32xf32>
    %419 = vector.extract_strided_slice %405 {offsets = [0, 32], sizes = [16, 32], strides = [1, 1]} : vector<16x96xf32> to vector<16x32xf32>
    %420 = vector.extract_strided_slice %399 {offsets = [0, 32], sizes = [16, 32], strides = [1, 1]} : vector<16x96xf32> to vector<16x32xf32>
    %421 = arith.addf %419, %420 : vector<16x32xf32>
    %422 = arith.negf %421 : vector<16x32xf32>
    %423 = math.exp %422 : vector<16x32xf32>
    %cst_103 = arith.constant 1.000000e+00 : f32
    %424 = vector.broadcast %cst_103 : f32 to vector<16x32xf32>
    %425 = arith.addf %424, %423 : vector<16x32xf32>
    %426 = arith.divf %424, %425 : vector<16x32xf32>
    %427 = vector.extract_strided_slice %405 {offsets = [0, 64], sizes = [16, 32], strides = [1, 1]} : vector<16x96xf32> to vector<16x32xf32>
    %428 = vector.extract_strided_slice %399 {offsets = [0, 64], sizes = [16, 32], strides = [1, 1]} : vector<16x96xf32> to vector<16x32xf32>
    %429 = arith.addf %428, %7 : vector<16x32xf32>
    %430 = arith.mulf %418, %429 : vector<16x32xf32>
    %431 = arith.addf %427, %430 : vector<16x32xf32>
    %432 = math.tanh %431 : vector<16x32xf32>
    %cst_104 = arith.constant 1.000000e+00 : f32
    %433 = vector.broadcast %cst_104 : f32 to vector<16x32xf32>
    %434 = arith.subf %433, %426 : vector<16x32xf32>
    %435 = arith.mulf %434, %432 : vector<16x32xf32>
    %436 = arith.mulf %426, %360 : vector<16x32xf32>
    %437 = arith.addf %435, %436 : vector<16x32xf32>
    %438 = vector.extract_strided_slice %410 {offsets = [0, 0], sizes = [16, 32], strides = [1, 1]} : vector<16x96xf32> to vector<16x32xf32>
    %439 = vector.extract_strided_slice %401 {offsets = [0, 0], sizes = [16, 32], strides = [1, 1]} : vector<16x96xf32> to vector<16x32xf32>
    %440 = arith.addf %438, %439 : vector<16x32xf32>
    %441 = arith.negf %440 : vector<16x32xf32>
    %442 = math.exp %441 : vector<16x32xf32>
    %cst_105 = arith.constant 1.000000e+00 : f32
    %443 = vector.broadcast %cst_105 : f32 to vector<16x32xf32>
    %444 = arith.addf %443, %442 : vector<16x32xf32>
    %445 = arith.divf %443, %444 : vector<16x32xf32>
    %446 = vector.extract_strided_slice %410 {offsets = [0, 32], sizes = [16, 32], strides = [1, 1]} : vector<16x96xf32> to vector<16x32xf32>
    %447 = vector.extract_strided_slice %401 {offsets = [0, 32], sizes = [16, 32], strides = [1, 1]} : vector<16x96xf32> to vector<16x32xf32>
    %448 = arith.addf %446, %447 : vector<16x32xf32>
    %449 = arith.negf %448 : vector<16x32xf32>
    %450 = math.exp %449 : vector<16x32xf32>
    %cst_106 = arith.constant 1.000000e+00 : f32
    %451 = vector.broadcast %cst_106 : f32 to vector<16x32xf32>
    %452 = arith.addf %451, %450 : vector<16x32xf32>
    %453 = arith.divf %451, %452 : vector<16x32xf32>
    %454 = vector.extract_strided_slice %410 {offsets = [0, 64], sizes = [16, 32], strides = [1, 1]} : vector<16x96xf32> to vector<16x32xf32>
    %455 = vector.extract_strided_slice %401 {offsets = [0, 64], sizes = [16, 32], strides = [1, 1]} : vector<16x96xf32> to vector<16x32xf32>
    %456 = arith.addf %455, %10 : vector<16x32xf32>
    %457 = arith.mulf %445, %456 : vector<16x32xf32>
    %458 = arith.addf %454, %457 : vector<16x32xf32>
    %459 = math.tanh %458 : vector<16x32xf32>
    %cst_107 = arith.constant 1.000000e+00 : f32
    %460 = vector.broadcast %cst_107 : f32 to vector<16x32xf32>
    %461 = arith.subf %460, %453 : vector<16x32xf32>
    %462 = arith.mulf %461, %459 : vector<16x32xf32>
    %463 = arith.mulf %453, %387 : vector<16x32xf32>
    %464 = arith.addf %462, %463 : vector<16x32xf32>
    %465 = arith.truncf %437 : vector<16x32xf32> to vector<16x32xbf16>
    %466 = arith.index_cast %c5_i32 : i32 to index
    %c0_108 = arith.constant 0 : index
    %c0_109 = arith.constant 0 : index
    %467 = vector.load %arg7[%466, %c0_108, %c0_109] : memref<8x16x32xbf16, #tpu.memory_space<vmem>>, vector<1x16x32xbf16>
    %468 = vector.shape_cast %467 : vector<1x16x32xbf16> to vector<16x32xbf16>
    %469 = vector.shape_cast %465 : vector<16x32xbf16> to vector<1x16x32xbf16>
    tpu.vector_store %arg7[%466, %c0_108, %c0_109], %469 {strides = array<i32>} : memref<8x16x32xbf16, #tpu.memory_space<vmem>>, vector<1x16x32xbf16>,
    %470 = arith.truncf %464 : vector<16x32xf32> to vector<16x32xbf16>
    %471 = arith.index_cast %406 : i32 to index
    %c0_110 = arith.constant 0 : index
    %c0_111 = arith.constant 0 : index
    %472 = vector.load %arg8[%471, %c0_110, %c0_111] : memref<8x16x32xbf16, #tpu.memory_space<vmem>>, vector<1x16x32xbf16>
    %473 = vector.shape_cast %472 : vector<1x16x32xbf16> to vector<16x32xbf16>
    %474 = vector.shape_cast %470 : vector<16x32xbf16> to vector<1x16x32xbf16>
    tpu.vector_store %arg8[%471, %c0_110, %c0_111], %474 {strides = array<i32>} : memref<8x16x32xbf16, #tpu.memory_space<vmem>>, vector<1x16x32xbf16>,
    %c6_i32 = arith.constant 6 : i32
    %475 = arith.truncf %437 : vector<16x32xf32> to vector<16x32xbf16>
    %cst_112 = arith.constant dense<0.000000e+00> : vector<16x96xf32>
    %476 = tpu.matmul %475, %3, %cst_112 {dimension_numbers = #tpu.dot_dimension_numbers<[1], [0], [0], [1], [0, 0, 1, 1], [], []>} : vector<16x32xbf16>, vector<32x96xbf16>, vector<16x96xf32> -> vector<16x96xf32>
    %477 = arith.truncf %464 : vector<16x32xf32> to vector<16x32xbf16>
    %cst_113 = arith.constant dense<0.000000e+00> : vector<16x96xf32>
    %478 = tpu.matmul %477, %4, %cst_113 {dimension_numbers = #tpu.dot_dimension_numbers<[1], [0], [0], [1], [0, 0, 1, 1], [], []>} : vector<16x32xbf16>, vector<32x96xbf16>, vector<16x96xf32> -> vector<16x96xf32>
    %479 = arith.index_cast %c6_i32 : i32 to index
    %c0_114 = arith.constant 0 : index
    %c0_115 = arith.constant 0 : index
    %480 = vector.load %arg2[%479, %c0_114, %c0_115] : memref<8x16x96xbf16, #tpu.memory_space<vmem>>, vector<1x16x96xbf16>
    %481 = vector.shape_cast %480 : vector<1x16x96xbf16> to vector<16x96xbf16>
    %482 = arith.extf %481 : vector<16x96xbf16> to vector<16x96xf32>
    %c7_i32_116 = arith.constant 7 : i32
    %483 = arith.subi %c7_i32_116, %c6_i32 : i32
    %484 = arith.index_cast %483 : i32 to index
    %c0_117 = arith.constant 0 : index
    %c0_118 = arith.constant 0 : index
    %485 = vector.load %arg3[%484, %c0_117, %c0_118] : memref<8x16x96xbf16, #tpu.memory_space<vmem>>, vector<1x16x96xbf16>
    %486 = vector.shape_cast %485 : vector<1x16x96xbf16> to vector<16x96xbf16>
    %487 = arith.extf %486 : vector<16x96xbf16> to vector<16x96xf32>
    %488 = vector.extract_strided_slice %482 {offsets = [0, 0], sizes = [16, 32], strides = [1, 1]} : vector<16x96xf32> to vector<16x32xf32>
    %489 = vector.extract_strided_slice %476 {offsets = [0, 0], sizes = [16, 32], strides = [1, 1]} : vector<16x96xf32> to vector<16x32xf32>
    %490 = arith.addf %488, %489 : vector<16x32xf32>
    %491 = arith.negf %490 : vector<16x32xf32>
    %492 = math.exp %491 : vector<16x32xf32>
    %cst_119 = arith.constant 1.000000e+00 : f32
    %493 = vector.broadcast %cst_119 : f32 to vector<16x32xf32>
    %494 = arith.addf %493, %492 : vector<16x32xf32>
    %495 = arith.divf %493, %494 : vector<16x32xf32>
    %496 = vector.extract_strided_slice %482 {offsets = [0, 32], sizes = [16, 32], strides = [1, 1]} : vector<16x96xf32> to vector<16x32xf32>
    %497 = vector.extract_strided_slice %476 {offsets = [0, 32], sizes = [16, 32], strides = [1, 1]} : vector<16x96xf32> to vector<16x32xf32>
    %498 = arith.addf %496, %497 : vector<16x32xf32>
    %499 = arith.negf %498 : vector<16x32xf32>
    %500 = math.exp %499 : vector<16x32xf32>
    %cst_120 = arith.constant 1.000000e+00 : f32
    %501 = vector.broadcast %cst_120 : f32 to vector<16x32xf32>
    %502 = arith.addf %501, %500 : vector<16x32xf32>
    %503 = arith.divf %501, %502 : vector<16x32xf32>
    %504 = vector.extract_strided_slice %482 {offsets = [0, 64], sizes = [16, 32], strides = [1, 1]} : vector<16x96xf32> to vector<16x32xf32>
    %505 = vector.extract_strided_slice %476 {offsets = [0, 64], sizes = [16, 32], strides = [1, 1]} : vector<16x96xf32> to vector<16x32xf32>
    %506 = arith.addf %505, %7 : vector<16x32xf32>
    %507 = arith.mulf %495, %506 : vector<16x32xf32>
    %508 = arith.addf %504, %507 : vector<16x32xf32>
    %509 = math.tanh %508 : vector<16x32xf32>
    %cst_121 = arith.constant 1.000000e+00 : f32
    %510 = vector.broadcast %cst_121 : f32 to vector<16x32xf32>
    %511 = arith.subf %510, %503 : vector<16x32xf32>
    %512 = arith.mulf %511, %509 : vector<16x32xf32>
    %513 = arith.mulf %503, %437 : vector<16x32xf32>
    %514 = arith.addf %512, %513 : vector<16x32xf32>
    %515 = vector.extract_strided_slice %487 {offsets = [0, 0], sizes = [16, 32], strides = [1, 1]} : vector<16x96xf32> to vector<16x32xf32>
    %516 = vector.extract_strided_slice %478 {offsets = [0, 0], sizes = [16, 32], strides = [1, 1]} : vector<16x96xf32> to vector<16x32xf32>
    %517 = arith.addf %515, %516 : vector<16x32xf32>
    %518 = arith.negf %517 : vector<16x32xf32>
    %519 = math.exp %518 : vector<16x32xf32>
    %cst_122 = arith.constant 1.000000e+00 : f32
    %520 = vector.broadcast %cst_122 : f32 to vector<16x32xf32>
    %521 = arith.addf %520, %519 : vector<16x32xf32>
    %522 = arith.divf %520, %521 : vector<16x32xf32>
    %523 = vector.extract_strided_slice %487 {offsets = [0, 32], sizes = [16, 32], strides = [1, 1]} : vector<16x96xf32> to vector<16x32xf32>
    %524 = vector.extract_strided_slice %478 {offsets = [0, 32], sizes = [16, 32], strides = [1, 1]} : vector<16x96xf32> to vector<16x32xf32>
    %525 = arith.addf %523, %524 : vector<16x32xf32>
    %526 = arith.negf %525 : vector<16x32xf32>
    %527 = math.exp %526 : vector<16x32xf32>
    %cst_123 = arith.constant 1.000000e+00 : f32
    %528 = vector.broadcast %cst_123 : f32 to vector<16x32xf32>
    %529 = arith.addf %528, %527 : vector<16x32xf32>
    %530 = arith.divf %528, %529 : vector<16x32xf32>
    %531 = vector.extract_strided_slice %487 {offsets = [0, 64], sizes = [16, 32], strides = [1, 1]} : vector<16x96xf32> to vector<16x32xf32>
    %532 = vector.extract_strided_slice %478 {offsets = [0, 64], sizes = [16, 32], strides = [1, 1]} : vector<16x96xf32> to vector<16x32xf32>
    %533 = arith.addf %532, %10 : vector<16x32xf32>
    %534 = arith.mulf %522, %533 : vector<16x32xf32>
    %535 = arith.addf %531, %534 : vector<16x32xf32>
    %536 = math.tanh %535 : vector<16x32xf32>
    %cst_124 = arith.constant 1.000000e+00 : f32
    %537 = vector.broadcast %cst_124 : f32 to vector<16x32xf32>
    %538 = arith.subf %537, %530 : vector<16x32xf32>
    %539 = arith.mulf %538, %536 : vector<16x32xf32>
    %540 = arith.mulf %530, %464 : vector<16x32xf32>
    %541 = arith.addf %539, %540 : vector<16x32xf32>
    %542 = arith.truncf %514 : vector<16x32xf32> to vector<16x32xbf16>
    %543 = arith.index_cast %c6_i32 : i32 to index
    %c0_125 = arith.constant 0 : index
    %c0_126 = arith.constant 0 : index
    %544 = vector.load %arg7[%543, %c0_125, %c0_126] : memref<8x16x32xbf16, #tpu.memory_space<vmem>>, vector<1x16x32xbf16>
    %545 = vector.shape_cast %544 : vector<1x16x32xbf16> to vector<16x32xbf16>
    %546 = vector.shape_cast %542 : vector<16x32xbf16> to vector<1x16x32xbf16>
    tpu.vector_store %arg7[%543, %c0_125, %c0_126], %546 {strides = array<i32>} : memref<8x16x32xbf16, #tpu.memory_space<vmem>>, vector<1x16x32xbf16>,
    %547 = arith.truncf %541 : vector<16x32xf32> to vector<16x32xbf16>
    %548 = arith.index_cast %483 : i32 to index
    %c0_127 = arith.constant 0 : index
    %c0_128 = arith.constant 0 : index
    %549 = vector.load %arg8[%548, %c0_127, %c0_128] : memref<8x16x32xbf16, #tpu.memory_space<vmem>>, vector<1x16x32xbf16>
    %550 = vector.shape_cast %549 : vector<1x16x32xbf16> to vector<16x32xbf16>
    %551 = vector.shape_cast %547 : vector<16x32xbf16> to vector<1x16x32xbf16>
    tpu.vector_store %arg8[%548, %c0_127, %c0_128], %551 {strides = array<i32>} : memref<8x16x32xbf16, #tpu.memory_space<vmem>>, vector<1x16x32xbf16>,
    %c7_i32_129 = arith.constant 7 : i32
    %552 = arith.truncf %514 : vector<16x32xf32> to vector<16x32xbf16>
    %cst_130 = arith.constant dense<0.000000e+00> : vector<16x96xf32>
    %553 = tpu.matmul %552, %3, %cst_130 {dimension_numbers = #tpu.dot_dimension_numbers<[1], [0], [0], [1], [0, 0, 1, 1], [], []>} : vector<16x32xbf16>, vector<32x96xbf16>, vector<16x96xf32> -> vector<16x96xf32>
    %554 = arith.truncf %541 : vector<16x32xf32> to vector<16x32xbf16>
    %cst_131 = arith.constant dense<0.000000e+00> : vector<16x96xf32>
    %555 = tpu.matmul %554, %4, %cst_131 {dimension_numbers = #tpu.dot_dimension_numbers<[1], [0], [0], [1], [0, 0, 1, 1], [], []>} : vector<16x32xbf16>, vector<32x96xbf16>, vector<16x96xf32> -> vector<16x96xf32>
    %556 = arith.index_cast %c7_i32_129 : i32 to index
    %c0_132 = arith.constant 0 : index
    %c0_133 = arith.constant 0 : index
    %557 = vector.load %arg2[%556, %c0_132, %c0_133] : memref<8x16x96xbf16, #tpu.memory_space<vmem>>, vector<1x16x96xbf16>
    %558 = vector.shape_cast %557 : vector<1x16x96xbf16> to vector<16x96xbf16>
    %559 = arith.extf %558 : vector<16x96xbf16> to vector<16x96xf32>
    %c7_i32_134 = arith.constant 7 : i32
    %560 = arith.subi %c7_i32_134, %c7_i32_129 : i32
    %561 = arith.index_cast %560 : i32 to index
    %c0_135 = arith.constant 0 : index
    %c0_136 = arith.constant 0 : index
    %562 = vector.load %arg3[%561, %c0_135, %c0_136] : memref<8x16x96xbf16, #tpu.memory_space<vmem>>, vector<1x16x96xbf16>
    %563 = vector.shape_cast %562 : vector<1x16x96xbf16> to vector<16x96xbf16>
    %564 = arith.extf %563 : vector<16x96xbf16> to vector<16x96xf32>
    %565 = vector.extract_strided_slice %559 {offsets = [0, 0], sizes = [16, 32], strides = [1, 1]} : vector<16x96xf32> to vector<16x32xf32>
    %566 = vector.extract_strided_slice %553 {offsets = [0, 0], sizes = [16, 32], strides = [1, 1]} : vector<16x96xf32> to vector<16x32xf32>
    %567 = arith.addf %565, %566 : vector<16x32xf32>
    %568 = arith.negf %567 : vector<16x32xf32>
    %569 = math.exp %568 : vector<16x32xf32>
    %cst_137 = arith.constant 1.000000e+00 : f32
    %570 = vector.broadcast %cst_137 : f32 to vector<16x32xf32>
    %571 = arith.addf %570, %569 : vector<16x32xf32>
    %572 = arith.divf %570, %571 : vector<16x32xf32>
    %573 = vector.extract_strided_slice %559 {offsets = [0, 32], sizes = [16, 32], strides = [1, 1]} : vector<16x96xf32> to vector<16x32xf32>
    %574 = vector.extract_strided_slice %553 {offsets = [0, 32], sizes = [16, 32], strides = [1, 1]} : vector<16x96xf32> to vector<16x32xf32>
    %575 = arith.addf %573, %574 : vector<16x32xf32>
    %576 = arith.negf %575 : vector<16x32xf32>
    %577 = math.exp %576 : vector<16x32xf32>
    %cst_138 = arith.constant 1.000000e+00 : f32
    %578 = vector.broadcast %cst_138 : f32 to vector<16x32xf32>
    %579 = arith.addf %578, %577 : vector<16x32xf32>
    %580 = arith.divf %578, %579 : vector<16x32xf32>
    %581 = vector.extract_strided_slice %559 {offsets = [0, 64], sizes = [16, 32], strides = [1, 1]} : vector<16x96xf32> to vector<16x32xf32>
    %582 = vector.extract_strided_slice %553 {offsets = [0, 64], sizes = [16, 32], strides = [1, 1]} : vector<16x96xf32> to vector<16x32xf32>
    %583 = arith.addf %582, %7 : vector<16x32xf32>
    %584 = arith.mulf %572, %583 : vector<16x32xf32>
    %585 = arith.addf %581, %584 : vector<16x32xf32>
    %586 = math.tanh %585 : vector<16x32xf32>
    %cst_139 = arith.constant 1.000000e+00 : f32
    %587 = vector.broadcast %cst_139 : f32 to vector<16x32xf32>
    %588 = arith.subf %587, %580 : vector<16x32xf32>
    %589 = arith.mulf %588, %586 : vector<16x32xf32>
    %590 = arith.mulf %580, %514 : vector<16x32xf32>
    %591 = arith.addf %589, %590 : vector<16x32xf32>
    %592 = vector.extract_strided_slice %564 {offsets = [0, 0], sizes = [16, 32], strides = [1, 1]} : vector<16x96xf32> to vector<16x32xf32>
    %593 = vector.extract_strided_slice %555 {offsets = [0, 0], sizes = [16, 32], strides = [1, 1]} : vector<16x96xf32> to vector<16x32xf32>
    %594 = arith.addf %592, %593 : vector<16x32xf32>
    %595 = arith.negf %594 : vector<16x32xf32>
    %596 = math.exp %595 : vector<16x32xf32>
    %cst_140 = arith.constant 1.000000e+00 : f32
    %597 = vector.broadcast %cst_140 : f32 to vector<16x32xf32>
    %598 = arith.addf %597, %596 : vector<16x32xf32>
    %599 = arith.divf %597, %598 : vector<16x32xf32>
    %600 = vector.extract_strided_slice %564 {offsets = [0, 32], sizes = [16, 32], strides = [1, 1]} : vector<16x96xf32> to vector<16x32xf32>
    %601 = vector.extract_strided_slice %555 {offsets = [0, 32], sizes = [16, 32], strides = [1, 1]} : vector<16x96xf32> to vector<16x32xf32>
    %602 = arith.addf %600, %601 : vector<16x32xf32>
    %603 = arith.negf %602 : vector<16x32xf32>
    %604 = math.exp %603 : vector<16x32xf32>
    %cst_141 = arith.constant 1.000000e+00 : f32
    %605 = vector.broadcast %cst_141 : f32 to vector<16x32xf32>
    %606 = arith.addf %605, %604 : vector<16x32xf32>
    %607 = arith.divf %605, %606 : vector<16x32xf32>
    %608 = vector.extract_strided_slice %564 {offsets = [0, 64], sizes = [16, 32], strides = [1, 1]} : vector<16x96xf32> to vector<16x32xf32>
    %609 = vector.extract_strided_slice %555 {offsets = [0, 64], sizes = [16, 32], strides = [1, 1]} : vector<16x96xf32> to vector<16x32xf32>
    %610 = arith.addf %609, %10 : vector<16x32xf32>
    %611 = arith.mulf %599, %610 : vector<16x32xf32>
    %612 = arith.addf %608, %611 : vector<16x32xf32>
    %613 = math.tanh %612 : vector<16x32xf32>
    %cst_142 = arith.constant 1.000000e+00 : f32
    %614 = vector.broadcast %cst_142 : f32 to vector<16x32xf32>
    %615 = arith.subf %614, %607 : vector<16x32xf32>
    %616 = arith.mulf %615, %613 : vector<16x32xf32>
    %617 = arith.mulf %607, %541 : vector<16x32xf32>
    %618 = arith.addf %616, %617 : vector<16x32xf32>
    %619 = arith.truncf %591 : vector<16x32xf32> to vector<16x32xbf16>
    %620 = arith.index_cast %c7_i32_129 : i32 to index
    %c0_143 = arith.constant 0 : index
    %c0_144 = arith.constant 0 : index
    %621 = vector.load %arg7[%620, %c0_143, %c0_144] : memref<8x16x32xbf16, #tpu.memory_space<vmem>>, vector<1x16x32xbf16>
    %622 = vector.shape_cast %621 : vector<1x16x32xbf16> to vector<16x32xbf16>
    %623 = vector.shape_cast %619 : vector<16x32xbf16> to vector<1x16x32xbf16>
    tpu.vector_store %arg7[%620, %c0_143, %c0_144], %623 {strides = array<i32>} : memref<8x16x32xbf16, #tpu.memory_space<vmem>>, vector<1x16x32xbf16>,
    %624 = arith.truncf %618 : vector<16x32xf32> to vector<16x32xbf16>
    %625 = arith.index_cast %560 : i32 to index
    %c0_145 = arith.constant 0 : index
    %c0_146 = arith.constant 0 : index
    %626 = vector.load %arg8[%625, %c0_145, %c0_146] : memref<8x16x32xbf16, #tpu.memory_space<vmem>>, vector<1x16x32xbf16>
    %627 = vector.shape_cast %626 : vector<1x16x32xbf16> to vector<16x32xbf16>
    %628 = vector.shape_cast %624 : vector<16x32xbf16> to vector<1x16x32xbf16>
    tpu.vector_store %arg8[%625, %c0_145, %c0_146], %628 {strides = array<i32>} : memref<8x16x32xbf16, #tpu.memory_space<vmem>>, vector<1x16x32xbf16>,
    %c8_i32 = arith.constant 8 : i32
    %c0_147 = arith.constant 0 : index
    %c0_148 = arith.constant 0 : index
    %629 = vector.load %arg11[%c0_147, %c0_148] : memref<16x32xf32, #tpu.memory_space<vmem>>, vector<16x32xf32>
    tpu.vector_store %arg11[%c0_147, %c0_148], %591 {strides = array<i32>} : memref<16x32xf32, #tpu.memory_space<vmem>>, vector<16x32xf32>,
    %c0_149 = arith.constant 0 : index
    %c0_150 = arith.constant 0 : index
    %630 = vector.load %arg12[%c0_149, %c0_150] : memref<16x32xf32, #tpu.memory_space<vmem>>, vector<16x32xf32>
    tpu.vector_store %arg12[%c0_149, %c0_150], %618 {strides = array<i32>} : memref<16x32xf32, #tpu.memory_space<vmem>>, vector<16x32xf32>,
    return
  }
  func.func @transform_0(%arg0: i32, %arg1: i32) -> (i32, i32, i32) {
    %c0_i32 = arith.constant 0 : i32
    %c0_i32_0 = arith.constant 0 : i32
    return %arg1, %arg0, %c0_i32 : i32, i32, i32
  }
  func.func @transform_1(%arg0: i32, %arg1: i32) -> (i32, i32, i32) {
    %c0_i32 = arith.constant 0 : i32
    %0 = arith.subi %c0_i32, %arg1 : i32
    %c0_i32_0 = arith.constant 0 : i32
    %c0_i32_1 = arith.constant 0 : i32
    return %0, %arg0, %c0_i32_0 : i32, i32, i32
  }
  func.func @transform_4(%arg0: i32, %arg1: i32) -> (i32, i32) {
    %c0_i32 = arith.constant 0 : i32
    %c0_i32_0 = arith.constant 0 : i32
    %c0_i32_1 = arith.constant 0 : i32
    return %c0_i32, %c0_i32_0 : i32, i32
  }
  func.func @transform_5(%arg0: i32, %arg1: i32) -> (i32, i32, i32) {
    %c0_i32 = arith.constant 0 : i32
    %c0_i32_0 = arith.constant 0 : i32
    return %arg1, %arg0, %c0_i32 : i32, i32, i32
  }
  func.func @transform_6(%arg0: i32, %arg1: i32) -> (i32, i32, i32) {
    %c0_i32 = arith.constant 0 : i32
    %0 = arith.subi %c0_i32, %arg1 : i32
    %c0_i32_0 = arith.constant 0 : i32
    %c0_i32_1 = arith.constant 0 : i32
    return %0, %arg0, %c0_i32_0 : i32, i32, i32
  }
}

</mosaic_0001>

<bundles_post_ra>
// kernel: encoder_forward.2
= control target key start
LH: loop header
LB: loop body
LE: loop exit
PB: predicated region body
PF: predicated region fallthrough
CT: control target
= control target key end

     0   :  { %s3624_s0 = inlined_call_operand.vmem [shape: bf16[8,16,96], index: 0, kind: input, shape index: {}]   ;;  %s3625_s1 = inlined_call_operand.vmem [shape: bf16[8,16,96], index: 1, kind: input, shape index: {}]   ;;  %s3626_s2 = inlined_call_operand.vmem [shape: bf16[32,96], index: 2, kind: input, shape index: {}]   ;;  %s3627_s3 = inlined_call_operand.vmem [shape: bf16[32,96], index: 3, kind: input, shape index: {}]   ;;  %s3628_s4 = inlined_call_operand.vmem [shape: f32[1,64], index: 4, kind: input, shape index: {}]   ;;  %s3629_s5 = inlined_call_operand.vmem [shape: bf16[8,16,32], index: 5, kind: output, shape index: {0}]   ;;  %s3630_s6 = inlined_call_operand.vmem [shape: bf16[8,16,32], index: 6, kind: output, shape index: {1}]  }
   0x1   :  { %v97_v0 = vld [vmem:[%s3626_s2] sm:$0xff]  ;;  %v99_v1 = vld [vmem:[%s3626_s2 + $0x8] sm:$0xff] }
   0x2   :  { %98 = vst [vmem:[#allocation2] sm:$0xff] %v97_v0  ;;  %100 = vst [vmem:[#allocation2 + $0x8] sm:$0xff] %v99_v1 }
   0x3   :  { %108 = vsyncadd [#allocation6], 256 }
   0x4   :  { %2853 = dma.done.wait [#allocation6], 256 }
   0x5   :  { %2854 = vsyncadd [#allocation6], 4294967040 }
   0x6   :  { %v146_v2 = vld [vmem:[%s3627_s3] sm:$0xff]  ;;  %v148_v3 = vld [vmem:[%s3627_s3 + $0x8] sm:$0xff] }
   0x7   :  { %147 = vst [vmem:[#allocation3] sm:$0xff] %v146_v2  ;;  %149 = vst [vmem:[#allocation3 + $0x8] sm:$0xff] %v148_v3 }
   0x8   :  { %157 = vsyncadd [#allocation8], 256 }
   0x9   :  { %2855 = dma.done.wait [#allocation8], 256 }
   0xa   :  { %2856 = vsyncadd [#allocation8], 4294967040  ;;  %v2909_v4 = vld [vmem:[#allocation2 + $0x8] sm:$0xff]   ;;  %v2857_v5 = vmov 0.0   ;;  %v2916_v7 = vld [vmem:[#allocation2] sm:$0xff]   ;;  %vm2858_vm0 = vmmov 0  }
   0xb   :  { %2520 = vmatprep.subr.bf16.mxu0 %v2857_v5  ;;  %2528 = vmatprep.subr.bf16.mxu1 %v2857_v5  ;;  %vm162_vm1 = vcmask 261120   ;;  %v2221_v9 = vld [vmem:[%s3628_s4] ss:$0 sm:$0xff]  ;;  %s2859_s29 = smov 64   ;;  %s2860_s30 = smov 32   ;;  %v2458_v32 = vld [vmem:[%s3625_s1 + $0x38] sm:$0xff]  }
   0xc   :  { %2521 = vmatpush3.bf16.msra.mxu0 %v2909_v4  ;;  %2524 = vmatprep.mubr.msk.bf16.mxu0 %vm2858_vm0, %v2857_v5  ;;  %163 = vst.msk [vmem:[#allocation4] sm:$0xff] %vm162_vm1, %v2857_v5  ;;  %164 = vst.msk [vmem:[#allocation4 + $0x8] sm:$0xff] %vm162_vm1, %v2857_v5  ;;  %v2395_v30 = vld [vmem:[%s3624_s0] sm:$0xff]   ;;  %v2400_v33 = vunpack.c.l.bf16 %v2458_v32  ;;  %v2401_v39 = vunpack.c.h.bf16 %v2458_v32  ;;  %s2861_s10 = smov 96   ;;  %vm451_vm2 = vcmask 257024  }
   0xd   :  { %2522 = vmatprep.subr.bf16.mxu0 %v2857_v5  ;;  %165 = vst.msk [vmem:[#allocation5] sm:$0xff] %vm162_vm1, %v2857_v5  ;;  %166 = vst.msk [vmem:[#allocation5 + $0x8] sm:$0xff] %vm162_vm1, %v2857_v5  ;;  %2532 = vmatprep.mubr.msk.bf16.mxu1 %vm2858_vm0, %v2857_v5  ;;  %v2396_v31 = vunpack.c.l.bf16 %v2395_v30  ;;  %v2397_v35 = vunpack.c.h.bf16 %v2395_v30 }
   0xe   :  { %v2913_v6 = vld [vmem:[#allocation3 + $0x8] sm:$0xff]   ;;  %v2922_v8 = vld [vmem:[#allocation3] sm:$0xff]   ;;  %323 = vrot.lane.b32.xlu0 %v2221_v9, %s2859_s29 }
   0xf   :  { %2529 = vmatpush3.bf16.msra.mxu1 %v2913_v6 }
  0x10   :  { %2530 = vmatprep.subr.bf16.mxu1 %v2857_v5  ;;  %2523 = vmatpush3.bf16.msra.mxu0 %v2916_v7 }
  0x11   :  { %2536 = vmatprep.subr.bf16.mxu0 %v2857_v5 }
  0x12   :  { %388 = vrot.lane.b32.xlu0 %v2221_v9, %s2860_s30 }
  0x13   :  { %2531 = vmatpush3.bf16.msra.mxu1 %v2922_v8  ;;  %v2944_v10 = vld [vmem:[#allocation4] sm:$0xff]  ;;  %v2946_v11 = vld [vmem:[#allocation4 + $0x8] sm:$0xff] }
  0x14   :  { %2544 = vmatprep.subr.bf16.mxu1 %v2857_v5  ;;  %v2948_v12 = vld [vmem:[#allocation5] sm:$0xff]  ;;  %v185_v13 = vpack.c.bf16 %v2946_v11, %v2944_v10  ;;  %v2952_v14 = vld [vmem:[#allocation5 + $0x8] sm:$0xff] }
  0x15   :  { %v243_v15 = vpack.c.bf16 %v2952_v14, %v2948_v12 }
  0x16   :  { %2525 = vmatmul.mubr.msk.bf16.vlgmr.msra.gmra.mxu0 %vm162_vm1, %v185_v13 }
  0x17   :  { %2533 = vmatmul.mubr.msk.bf16.vlgmr.msra.gmra.mxu1 %vm162_vm1, %v243_v15  ;;  %2537 = vmatpush3.bf16.msra.mxu0 %v2909_v4 }
  0x18   :  { %2538 = vmatprep.subr.bf16.mxu0 %v2857_v5  ;;  %2540 = vmatprep.mubr.msk.bf16.mxu0 %vm2858_vm0, %v2857_v5 }
  0x19   :  { %2545 = vmatpush3.bf16.msra.mxu1 %v2913_v6  ;;  %2548 = vmatprep.mubr.msk.bf16.mxu1 %vm2858_vm0, %v2857_v5 }
  0x1a   :  { %2546 = vmatprep.subr.bf16.mxu1 %v2857_v5 }
  0x1b   :  { %2539 = vmatpush3.bf16.msra.mxu0 %v2916_v7 }
  0x1c   :  { %2552 = vmatprep.subr.bf16.mxu0 %v2857_v5 }
  0x1d   :  { %2547 = vmatpush3.bf16.msra.mxu1 %v2922_v8 }
  0x1e   :  { %2560 = vmatprep.subr.bf16.mxu1 %v2857_v5 }
  0x80   :  { %v2970_v16 = vpop.permute.xlu0 %323 }
  0x84   :  { %v2972_v17 = vpop.permute.xlu0 %388 }
  0xd6   :  { %v236_v18 = vpop.f32.mrf.mxu0 }
  0xd7   :  { %v293_v19 = vpop.f32.mrf.mxu1  ;;  %v326_v20 = vadd.f32 %v2970_v16, %v236_v18  ;;  %v309_v34 = vadd.f32 %v2396_v31, %v236_v18 }
  0xd8   :  { %v391_v21 = vadd.f32 %v2972_v17, %v293_v19  ;;  %v2526_v22 = vpop.f32.mrf.mxu0  ;;  %v374_v36 = vadd.f32 %v2400_v33, %v293_v19 }
  0xd9   :  { %v2534_v23 = vpop.f32.mrf.mxu1  ;;  %330 = vrot.lane.b32.xlu1 %v326_v20, %s2859_s29  ;;  %v2230_v37 = vmul.f32 -1.442695, %v309_v34 }
  0xda   :  { %395 = vrot.lane.b32.xlu0 %v391_v21, %s2859_s29  ;;  %v239_v24 = vpop.f32.mrf.mxu0  ;;  %v2232_v40 = vmul.f32 -1.442695, %v374_v36 }
  0xdb   :  { %v327_v25 = vadd.f32 %v2970_v16, %v239_v24  ;;  %v296_v26 = vpop.f32.mrf.mxu1  ;;  %v310_v38 = vadd.f32 %v2397_v35, %v239_v24  ;;  %2657 = vpow2.f32 %v2230_v37 }
  0xdc   :  { %v2527_v27 = vpop.f32.mrf.mxu0  ;;  %v392_v29 = vadd.f32 %v2972_v17, %v296_v26  ;;  %v375_v42 = vadd.f32 %v2401_v39, %v296_v26  ;;  %2659 = vpow2.f32 %v2232_v40 }
  0xdd   :  { %v2535_v28 = vpop.f32.mrf.mxu1  ;;  %332 = vrot.lane.b32.xlu1 %v327_v25, %s2859_s29  ;;  %v2231_v41 = vmul.f32 -1.442695, %v310_v38 }
  0xde   :  { %v2233_v43 = vmul.f32 -1.442695, %v375_v42 }
  0xdf   :  { %2661 = vpow2.f32 %v2231_v41 }
  0xe0   :  { %2663 = vpow2.f32 %v2233_v43 }
  0xe1   :  { %397 = vrot.lane.b32.xlu1 %v392_v29, %s2859_s29 }
  0xe8   :  { %v2658_v44 = vpop.eup %2657 }
  0xe9   :  { %v2660_v45 = vpop.eup %2659  ;;  %v317_v46 = vadd.f32 1.0, %v2658_v44 }
  0xea   :  { %v382_v48 = vadd.f32 1.0, %v2660_v45 }
  0xeb   :  { %2665 = vrcp.f32 %v317_v46 }
  0xec   :  { %v2662_v47 = vpop.eup %2661  ;;  %2667 = vrcp.f32 %v382_v48 }
  0xed   :  { %v318_v49 = vadd.f32 1.0, %v2662_v47  ;;  %v2664_v50 = vpop.eup %2663 }
  0xee   :  { %v383_v51 = vadd.f32 1.0, %v2664_v50 }
  0xef   :  { %2669 = vrcp.f32 %v318_v49 }
  0xf0   :  { %2671 = vrcp.f32 %v383_v51 }
  0xf8   :  { %v2666_v52 = vpop.eup %2665 }
  0xf9   :  { %v2668_v56 = vpop.eup %2667  ;;  %v350_v24 = vsub.f32 1.0, %v2666_v52 }
  0xfc   :  { %v2670_v57 = vpop.eup %2669 }
  0xfd   :  { %v2672_v61 = vpop.eup %2671  ;;  %v351_v27 = vsub.f32 1.0, %v2670_v57 }
  0xfe   :  { %v416_v37 = vsub.f32 1.0, %v2672_v61 }
 0x14b   :  { %v331_v53 = vpop.permute.xlu1 %330 }
 0x14c   :  { %v336_v54 = vmul.f32 %v2666_v52, %v331_v53  ;;  %v396_v55 = vpop.permute.xlu0 %395 }
 0x14d   :  { %v401_v59 = vmul.f32 %v2668_v56, %v396_v55 }
 0x14e   :  { %340 = vrot.lane.b32.xlu0 %v336_v54, %s2859_s29 }
 0x14f   :  { %v333_v58 = vpop.permute.xlu1 %332 }
 0x150   :  { %v337_v60 = vmul.f32 %v2670_v57, %v333_v58 }
 0x152   :  { %405 = vrot.lane.b32.xlu0 %v401_v59, %s2859_s29  ;;  %342 = vrot.lane.b32.xlu1 %v337_v60, %s2859_s29  ;;  %v2459_v59 = vld [vmem:[%s3624_s0 + $0x8] sm:$0xff]  }
 0x153   :  { %v398_v62 = vpop.permute.xlu1 %397  ;;  %v2404_v60 = vunpack.c.l.bf16 %v2459_v59 }
 0x154   :  { %v402_v63 = vmul.f32 %v2672_v61, %v398_v62  ;;  %v2405_v62 = vunpack.c.h.bf16 %v2459_v59 }
 0x156   :  { %364 = vrot.lane.b32.xlu0 %v2944_v10, %s2860_s30  ;;  %407 = vrot.lane.b32.xlu1 %v402_v63, %s2859_s29  ;;  %v2460_v63 = vld [vmem:[%s3625_s1 + $0x30] sm:$0xff]  }
 0x15a   :  { %366 = vrot.lane.b32.xlu1 %v2946_v11, %s2860_s30 }
 0x1c0   :  { %v341_v0 = vpop.permute.xlu0 %340 }
 0x1c1   :  { %v346_v1 = vadd.f32 %v2396_v31, %v341_v0 }
 0x1c3   :  { %2673 = vtanh.f32 %v346_v1 }
 0x1c4   :  { %v406_v2 = vpop.permute.xlu0 %405  ;;  %v343_v3 = vpop.permute.xlu1 %342 }
 0x1c5   :  { %v411_v9 = vadd.f32 %v2400_v33, %v406_v2  ;;  %v347_v13 = vadd.f32 %v2397_v35, %v343_v3  ;;  %v415_v35 = vsub.f32 1.0, %v2668_v56  ;;  %v2408_v2 = vunpack.c.l.bf16 %v2460_v63 }
 0x1c7   :  { %2675 = vtanh.f32 %v411_v9 }
 0x1c8   :  { %2677 = vtanh.f32 %v347_v13  ;;  %v408_v15 = vpop.permute.xlu1 %407  ;;  %v365_v21 = vpop.permute.xlu0 %364  ;;  %v2409_v13 = vunpack.c.h.bf16 %v2460_v63 }
 0x1c9   :  { %v412_v18 = vadd.f32 %v2401_v39, %v408_v15  ;;  %v370_v29 = vmul.f32 %v2666_v52, %v365_v21 }
 0x1cb   :  { %2679 = vtanh.f32 %v412_v18 }
 0x1cc   :  { %v367_v23 = vpop.permute.xlu1 %366 }
 0x1cd   :  { %v371_v30 = vmul.f32 %v2670_v57, %v367_v23 }
 0x1d0   :  { %v2674_v19 = vpop.eup %2673 }
 0x1d1   :  { %354 = vrot.lane.b32.xlu0 %v2674_v19, %s2861_s10 }
 0x1d4   :  { %v2676_v10 = vpop.eup %2675 }
 0x1d5   :  { %v2678_v20 = vpop.eup %2677  ;;  %419 = vrot.lane.b32.xlu0 %v2676_v10, %s2861_s10 }
 0x1d6   :  { %356 = vrot.lane.b32.xlu1 %v2678_v20, %s2861_s10 }
 0x1d8   :  { %v2680_v11 = vpop.eup %2679 }
 0x1d9   :  { %429 = vrot.lane.b32.xlu0 %v2948_v12, %s2860_s30 }
 0x1da   :  { %421 = vrot.lane.b32.xlu1 %v2680_v11, %s2861_s10 }
 0x1de   :  { %431 = vrot.lane.b32.xlu1 %v2952_v14, %s2860_s30 }
 0x243   :  { %v355_v22 = vpop.permute.xlu0 %354 }
 0x244   :  { %v360_v25 = vmul.f32 %v355_v22, %v350_v24 }
 0x246   :  { %v3004_v32 = vadd.f32 %v370_v29, %v360_v25 }
 0x247   :  { %v420_v26 = vpop.permute.xlu0 %419 }
 0x248   :  { %v357_v28 = vpop.permute.xlu1 %356  ;;  %v425_v39 = vmul.f32 %v420_v26, %v415_v35 }
 0x249   :  { %v361_v31 = vmul.f32 %v357_v28, %v351_v27 }
 0x24b   :  { %v3006_v33 = vadd.f32 %v371_v30, %v361_v31  ;;  %v430_v12 = vpop.permute.xlu0 %429 }
 0x24c   :  { %v422_v34 = vpop.permute.xlu1 %421  ;;  %v435_v36 = vmul.f32 %v2668_v56, %v430_v12 }
 0x24d   :  { %v439_v14 = vpack.c.bf16 %v3006_v33, %v3004_v32  ;;  %v426_v40 = vmul.f32 %v422_v34, %v416_v37 }
 0x24e   :  { %v3011_v42 = vadd.f32 %v435_v36, %v425_v39 }
 0x24f   :  { %469 = vrot.lane.b32.xlu0 %v439_v14, %s2861_s10 }
 0x250   :  { %v432_v38 = vpop.permute.xlu1 %431 }
 0x251   :  { %v436_v41 = vmul.f32 %v2672_v61, %v432_v38 }
 0x253   :  { %v3013_v43 = vadd.f32 %v436_v41, %v426_v40 }
 0x255   :  { %v454_v44 = vpack.c.bf16 %v3013_v43, %v3011_v42 }
 0x257   :  { %515 = vrot.lane.b32.xlu1 %v454_v44, %s2861_s10 }
 0x2c1   :  { %v470_v45 = vpop.permute.xlu0 %469 }
 0x2c2   :  { %2541 = vmatmul.mubr.msk.bf16.vlgmr.msra.gmra.mxu0 %vm162_vm1, %v470_v45 }
 0x2c3   :  { %2553 = vmatpush3.bf16.msra.mxu0 %v2909_v4  ;;  %2556 = vmatprep.mubr.msk.bf16.mxu0 %vm2858_vm0, %v2857_v5 }
 0x2c4   :  { %2554 = vmatprep.subr.bf16.mxu0 %v2857_v5 }
 0x2c7   :  { %2555 = vmatpush3.bf16.msra.mxu0 %v2916_v7 }
 0x2c8   :  { %2568 = vmatprep.subr.bf16.mxu0 %v2857_v5 }
 0x2c9   :  { %v516_v46 = vpop.permute.xlu1 %515 }
 0x2ca   :  { %2549 = vmatmul.mubr.msk.bf16.vlgmr.msra.gmra.mxu1 %vm162_vm1, %v516_v46 }
 0x2cb   :  { %2561 = vmatpush3.bf16.msra.mxu1 %v2913_v6  ;;  %2564 = vmatprep.mubr.msk.bf16.mxu1 %vm2858_vm0, %v2857_v5 }
 0x2cc   :  { %2562 = vmatprep.subr.bf16.mxu1 %v2857_v5 }
 0x2cf   :  { %2563 = vmatpush3.bf16.msra.mxu1 %v2922_v8 }
 0x2d0   :  { %2576 = vmatprep.subr.bf16.mxu1 %v2857_v5 }
 0x382   :  { %v508_v47 = vpop.f32.mrf.mxu0 }
 0x383   :  { %v585_v48 = vadd.f32 %v508_v47, %v2970_v16  ;;  %v571_v61 = vadd.f32 %v2404_v60, %v508_v47 }
 0x384   :  { %v2542_v49 = vpop.f32.mrf.mxu0 }
 0x385   :  { %589 = vrot.lane.b32.xlu0 %v585_v48, %s2859_s29  ;;  %v2246_v0 = vmul.f32 -1.442695, %v571_v61 }
 0x386   :  { %v511_v50 = vpop.f32.mrf.mxu0 }
 0x387   :  { %v586_v51 = vadd.f32 %v511_v50, %v2970_v16  ;;  %v572_v1 = vadd.f32 %v2405_v62, %v511_v50  ;;  %2681 = vpow2.f32 %v2246_v0 }
 0x388   :  { %v2543_v52 = vpop.f32.mrf.mxu0 }
 0x389   :  { %591 = vrot.lane.b32.xlu1 %v586_v51, %s2859_s29  ;;  %v2247_v3 = vmul.f32 -1.442695, %v572_v1 }
 0x38a   :  { %v554_v53 = vpop.f32.mrf.mxu1 }
 0x38b   :  { %v639_v54 = vadd.f32 %v554_v53, %v2972_v17  ;;  %v625_v9 = vadd.f32 %v2408_v2, %v554_v53  ;;  %2683 = vpow2.f32 %v2247_v3 }
 0x38c   :  { %v2550_v55 = vpop.f32.mrf.mxu1 }
 0x38d   :  { %643 = vrot.lane.b32.xlu0 %v639_v54, %s2859_s29  ;;  %v2248_v15 = vmul.f32 -1.442695, %v625_v9 }
 0x38e   :  { %v557_v56 = vpop.f32.mrf.mxu1 }
 0x38f   :  { %v640_v57 = vadd.f32 %v557_v56, %v2972_v17  ;;  %v626_v18 = vadd.f32 %v2409_v13, %v557_v56  ;;  %2685 = vpow2.f32 %v2248_v15 }
 0x390   :  { %v2551_v58 = vpop.f32.mrf.mxu1 }
 0x391   :  { %645 = vrot.lane.b32.xlu1 %v640_v57, %s2859_s29  ;;  %v2249_v19 = vmul.f32 -1.442695, %v626_v18 }
 0x393   :  { %2687 = vpow2.f32 %v2249_v19 }
 0x394   :  { %v2682_v10 = vpop.eup %2681 }
 0x395   :  { %v579_v20 = vadd.f32 1.0, %v2682_v10 }
 0x397   :  { %2689 = vrcp.f32 %v579_v20 }
 0x398   :  { %v2684_v11 = vpop.eup %2683 }
 0x399   :  { %v580_v21 = vadd.f32 1.0, %v2684_v11 }
 0x39b   :  { %2691 = vrcp.f32 %v580_v21 }
 0x39c   :  { %v2686_v22 = vpop.eup %2685 }
 0x39d   :  { %v633_v23 = vadd.f32 1.0, %v2686_v22 }
 0x39f   :  { %2693 = vrcp.f32 %v633_v23 }
 0x3a0   :  { %v2688_v24 = vpop.eup %2687 }
 0x3a1   :  { %v634_v25 = vadd.f32 1.0, %v2688_v24 }
 0x3a3   :  { %2695 = vrcp.f32 %v634_v25 }
 0x3a4   :  { %v2690_v26 = vpop.eup %2689 }
 0x3a5   :  { %v609_v53 = vsub.f32 1.0, %v2690_v26  ;;  %v621_v57 = vmul.f32 %v2690_v26, %v3004_v32 }
 0x3a8   :  { %v2692_v29 = vpop.eup %2691 }
 0x3a9   :  { %v610_v55 = vsub.f32 1.0, %v2692_v29  ;;  %v622_v58 = vmul.f32 %v2692_v29, %v3006_v33 }
 0x3ac   :  { %v2694_v12 = vpop.eup %2693 }
 0x3ad   :  { %v663_v63 = vsub.f32 1.0, %v2694_v12  ;;  %v675_v9 = vmul.f32 %v2694_v12, %v3011_v42 }
 0x3b0   :  { %v2696_v35 = vpop.eup %2695 }
 0x3f7   :  { %v590_v27 = vpop.permute.xlu0 %589 }
 0x3f8   :  { %v595_v28 = vmul.f32 %v2690_v26, %v590_v27 }
 0x3fa   :  { %599 = vrot.lane.b32.xlu0 %v595_v28, %s2859_s29 }
 0x3fb   :  { %v592_v30 = vpop.permute.xlu1 %591 }
 0x3fc   :  { %v596_v31 = vmul.f32 %v2692_v29, %v592_v30 }
 0x3fe   :  { %601 = vrot.lane.b32.xlu1 %v596_v31, %s2859_s29 }
 0x3ff   :  { %v644_v34 = vpop.permute.xlu0 %643 }
 0x400   :  { %v649_v14 = vmul.f32 %v2694_v12, %v644_v34  ;;  %v2461_v34 = vld [vmem:[%s3624_s0 + $0x10] sm:$0xff]  }
 0x402   :  { %653 = vrot.lane.b32.xlu0 %v649_v14, %s2859_s29  ;;  %v2412_v14 = vunpack.c.l.bf16 %v2461_v34 }
 0x403   :  { %v646_v36 = vpop.permute.xlu1 %645 }
 0x404   :  { %v650_v37 = vmul.f32 %v2696_v35, %v646_v36  ;;  %v2413_v36 = vunpack.c.h.bf16 %v2461_v34 }
 0x406   :  { %655 = vrot.lane.b32.xlu1 %v650_v37, %s2859_s29  ;;  %v2462_v37 = vld [vmem:[%s3625_s1 + $0x28] sm:$0xff]  }
 0x46c   :  { %v600_v38 = vpop.permute.xlu0 %599 }
 0x46d   :  { %v605_v39 = vadd.f32 %v2404_v60, %v600_v38 }
 0x46f   :  { %2697 = vtanh.f32 %v605_v39 }
 0x470   :  { %v602_v40 = vpop.permute.xlu1 %601 }
 0x471   :  { %v606_v41 = vadd.f32 %v2405_v62, %v602_v40  ;;  %v2416_v40 = vunpack.c.l.bf16 %v2462_v37 }
 0x473   :  { %2699 = vtanh.f32 %v606_v41 }
 0x474   :  { %v654_v44 = vpop.permute.xlu0 %653 }
 0x475   :  { %v659_v45 = vadd.f32 %v2408_v2, %v654_v44  ;;  %v664_v2 = vsub.f32 1.0, %v2696_v35 }
 0x477   :  { %2701 = vtanh.f32 %v659_v45  ;;  %v2417_v45 = vunpack.c.h.bf16 %v2462_v37 }
 0x478   :  { %v656_v46 = vpop.permute.xlu1 %655 }
 0x479   :  { %v660_v47 = vadd.f32 %v2409_v13, %v656_v46  ;;  %v676_v13 = vmul.f32 %v2696_v35, %v3013_v43 }
 0x47b   :  { %2703 = vtanh.f32 %v660_v47 }
 0x47c   :  { %v2698_v48 = vpop.eup %2697 }
 0x47d   :  { %613 = vrot.lane.b32.xlu0 %v2698_v48, %s2861_s10 }
 0x480   :  { %v2700_v49 = vpop.eup %2699 }
 0x481   :  { %615 = vrot.lane.b32.xlu1 %v2700_v49, %s2861_s10 }
 0x484   :  { %v2702_v50 = vpop.eup %2701 }
 0x485   :  { %667 = vrot.lane.b32.xlu0 %v2702_v50, %s2861_s10 }
 0x488   :  { %v2704_v51 = vpop.eup %2703 }
 0x489   :  { %669 = vrot.lane.b32.xlu1 %v2704_v51, %s2861_s10 }
 0x4ef   :  { %v614_v52 = vpop.permute.xlu0 %613 }
 0x4f0   :  { %v619_v54 = vmul.f32 %v614_v52, %v609_v53 }
 0x4f2   :  { %v3056_v60 = vadd.f32 %v621_v57, %v619_v54 }
 0x4f3   :  { %v616_v56 = vpop.permute.xlu1 %615 }
 0x4f4   :  { %v620_v59 = vmul.f32 %v616_v56, %v610_v55 }
 0x4f6   :  { %v3058_v61 = vadd.f32 %v622_v58, %v620_v59 }
 0x4f7   :  { %v668_v62 = vpop.permute.xlu0 %667 }
 0x4f8   :  { %v679_v0 = vpack.c.bf16 %v3058_v61, %v3056_v60  ;;  %v673_v1 = vmul.f32 %v668_v62, %v663_v63 }
 0x4fa   :  { %709 = vrot.lane.b32.xlu0 %v679_v0, %s2861_s10  ;;  %v3065_v18 = vadd.f32 %v675_v9, %v673_v1 }
 0x4fb   :  { %v670_v3 = vpop.permute.xlu1 %669 }
 0x4fc   :  { %v674_v15 = vmul.f32 %v670_v3, %v664_v2 }
 0x4fe   :  { %v3067_v19 = vadd.f32 %v676_v13, %v674_v15 }
 0x500   :  { %v694_v10 = vpack.c.bf16 %v3067_v19, %v3065_v18 }
 0x502   :  { %755 = vrot.lane.b32.xlu1 %v694_v10, %s2861_s10 }
 0x56c   :  { %v710_v20 = vpop.permute.xlu0 %709 }
 0x56d   :  { %2557 = vmatmul.mubr.msk.bf16.vlgmr.msra.gmra.mxu0 %vm162_vm1, %v710_v20 }
 0x56e   :  { %2569 = vmatpush3.bf16.msra.mxu0 %v2909_v4  ;;  %2572 = vmatprep.mubr.msk.bf16.mxu0 %vm2858_vm0, %v2857_v5 }
 0x56f   :  { %2570 = vmatprep.subr.bf16.mxu0 %v2857_v5 }
 0x572   :  { %2571 = vmatpush3.bf16.msra.mxu0 %v2916_v7 }
 0x573   :  { %2584 = vmatprep.subr.bf16.mxu0 %v2857_v5 }
 0x574   :  { %v756_v11 = vpop.permute.xlu1 %755 }
 0x575   :  { %2565 = vmatmul.mubr.msk.bf16.vlgmr.msra.gmra.mxu1 %vm162_vm1, %v756_v11 }
 0x576   :  { %2577 = vmatpush3.bf16.msra.mxu1 %v2913_v6  ;;  %2580 = vmatprep.mubr.msk.bf16.mxu1 %vm2858_vm0, %v2857_v5 }
 0x577   :  { %2578 = vmatprep.subr.bf16.mxu1 %v2857_v5 }
 0x57a   :  { %2579 = vmatpush3.bf16.msra.mxu1 %v2922_v8 }
 0x57b   :  { %2592 = vmatprep.subr.bf16.mxu1 %v2857_v5 }
 0x62d   :  { %v748_v21 = vpop.f32.mrf.mxu0 }
 0x62e   :  { %v825_v22 = vadd.f32 %v748_v21, %v2970_v16  ;;  %v811_v35 = vadd.f32 %v2412_v14, %v748_v21 }
 0x62f   :  { %v2558_v23 = vpop.f32.mrf.mxu0 }
 0x630   :  { %829 = vrot.lane.b32.xlu0 %v825_v22, %s2859_s29  ;;  %v2264_v38 = vmul.f32 -1.442695, %v811_v35 }
 0x631   :  { %v751_v24 = vpop.f32.mrf.mxu0 }
 0x632   :  { %v826_v25 = vadd.f32 %v751_v24, %v2970_v16  ;;  %v812_v39 = vadd.f32 %v2413_v36, %v751_v24  ;;  %2705 = vpow2.f32 %v2264_v38 }
 0x633   :  { %v2559_v26 = vpop.f32.mrf.mxu0 }
 0x634   :  { %831 = vrot.lane.b32.xlu1 %v826_v25, %s2859_s29  ;;  %v2265_v41 = vmul.f32 -1.442695, %v812_v39 }
 0x635   :  { %v794_v27 = vpop.f32.mrf.mxu1 }
 0x636   :  { %v879_v28 = vadd.f32 %v794_v27, %v2972_v17  ;;  %v865_v44 = vadd.f32 %v2416_v40, %v794_v27  ;;  %2707 = vpow2.f32 %v2265_v41 }
 0x637   :  { %v2566_v29 = vpop.f32.mrf.mxu1 }
 0x638   :  { %883 = vrot.lane.b32.xlu0 %v879_v28, %s2859_s29  ;;  %v2266_v46 = vmul.f32 -1.442695, %v865_v44 }
 0x639   :  { %v797_v30 = vpop.f32.mrf.mxu1 }
 0x63a   :  { %v880_v31 = vadd.f32 %v797_v30, %v2972_v17  ;;  %v866_v47 = vadd.f32 %v2417_v45, %v797_v30  ;;  %2709 = vpow2.f32 %v2266_v46 }
 0x63b   :  { %v2567_v12 = vpop.f32.mrf.mxu1 }
 0x63c   :  { %885 = vrot.lane.b32.xlu1 %v880_v31, %s2859_s29  ;;  %v2267_v48 = vmul.f32 -1.442695, %v866_v47 }
 0x63e   :  { %2711 = vpow2.f32 %v2267_v48 }
 0x63f   :  { %v2706_v49 = vpop.eup %2705 }
 0x640   :  { %v819_v50 = vadd.f32 1.0, %v2706_v49 }
 0x642   :  { %2713 = vrcp.f32 %v819_v50 }
 0x643   :  { %v2708_v51 = vpop.eup %2707 }
 0x644   :  { %v820_v52 = vadd.f32 1.0, %v2708_v51 }
 0x646   :  { %2715 = vrcp.f32 %v820_v52 }
 0x647   :  { %v2710_v53 = vpop.eup %2709 }
 0x648   :  { %v873_v54 = vadd.f32 1.0, %v2710_v53 }
 0x64a   :  { %2717 = vrcp.f32 %v873_v54 }
 0x64b   :  { %v2712_v55 = vpop.eup %2711 }
 0x64c   :  { %v874_v56 = vadd.f32 1.0, %v2712_v55 }
 0x64e   :  { %2719 = vrcp.f32 %v874_v56 }
 0x64f   :  { %v2714_v57 = vpop.eup %2713 }
 0x650   :  { %v849_v31 = vsub.f32 1.0, %v2714_v57  ;;  %v861_v35 = vmul.f32 %v2714_v57, %v3056_v60 }
 0x653   :  { %v2716_v62 = vpop.eup %2715 }
 0x654   :  { %v850_v34 = vsub.f32 1.0, %v2716_v62 }
 0x657   :  { %v2718_v1 = vpop.eup %2717 }
 0x658   :  { %v903_v41 = vsub.f32 1.0, %v2718_v1  ;;  %v915_v48 = vmul.f32 %v2718_v1, %v3065_v18 }
 0x65b   :  { %v2720_v9 = vpop.eup %2719 }
 0x65c   :  { %v904_v46 = vsub.f32 1.0, %v2720_v9  ;;  %v916_v49 = vmul.f32 %v2720_v9, %v3067_v19 }
 0x6a2   :  { %v830_v58 = vpop.permute.xlu0 %829 }
 0x6a3   :  { %v835_v59 = vmul.f32 %v2714_v57, %v830_v58 }
 0x6a5   :  { %839 = vrot.lane.b32.xlu0 %v835_v59, %s2859_s29 }
 0x6a6   :  { %v832_v63 = vpop.permute.xlu1 %831 }
 0x6a7   :  { %v836_v0 = vmul.f32 %v2716_v62, %v832_v63 }
 0x6a9   :  { %841 = vrot.lane.b32.xlu1 %v836_v0, %s2859_s29 }
 0x6aa   :  { %v884_v2 = vpop.permute.xlu0 %883 }
 0x6ab   :  { %v889_v3 = vmul.f32 %v2718_v1, %v884_v2  ;;  %v2463_v2 = vld [vmem:[%s3624_s0 + $0x18] sm:$0xff]  }
 0x6ad   :  { %893 = vrot.lane.b32.xlu0 %v889_v3, %s2859_s29  ;;  %v2420_v3 = vunpack.c.l.bf16 %v2463_v2 }
 0x6ae   :  { %v886_v13 = vpop.permute.xlu1 %885 }
 0x6af   :  { %v890_v15 = vmul.f32 %v2720_v9, %v886_v13  ;;  %v2421_v13 = vunpack.c.h.bf16 %v2463_v2 }
 0x6b1   :  { %895 = vrot.lane.b32.xlu1 %v890_v15, %s2859_s29  ;;  %v2464_v15 = vld [vmem:[%s3625_s1 + $0x20] sm:$0xff]  }
 0x717   :  { %v840_v10 = vpop.permute.xlu0 %839 }
 0x718   :  { %v845_v20 = vadd.f32 %v2412_v14, %v840_v10 }
 0x71a   :  { %2721 = vtanh.f32 %v845_v20 }
 0x71b   :  { %v842_v11 = vpop.permute.xlu1 %841 }
 0x71c   :  { %v846_v21 = vadd.f32 %v2413_v36, %v842_v11  ;;  %v862_v36 = vmul.f32 %v2716_v62, %v3058_v61  ;;  %v2424_v11 = vunpack.c.l.bf16 %v2464_v15 }
 0x71e   :  { %2723 = vtanh.f32 %v846_v21 }
 0x71f   :  { %v894_v22 = vpop.permute.xlu0 %893 }
 0x720   :  { %v899_v23 = vadd.f32 %v2416_v40, %v894_v22 }
 0x722   :  { %2725 = vtanh.f32 %v899_v23  ;;  %v2425_v23 = vunpack.c.h.bf16 %v2464_v15 }
 0x723   :  { %v896_v24 = vpop.permute.xlu1 %895 }
 0x724   :  { %v900_v25 = vadd.f32 %v2417_v45, %v896_v24 }
 0x726   :  { %2727 = vtanh.f32 %v900_v25 }
 0x727   :  { %v2722_v26 = vpop.eup %2721 }
 0x728   :  { %853 = vrot.lane.b32.xlu0 %v2722_v26, %s2861_s10 }
 0x72b   :  { %v2724_v27 = vpop.eup %2723 }
 0x72c   :  { %855 = vrot.lane.b32.xlu1 %v2724_v27, %s2861_s10 }
 0x72f   :  { %v2726_v28 = vpop.eup %2725 }
 0x730   :  { %907 = vrot.lane.b32.xlu0 %v2726_v28, %s2861_s10 }
 0x733   :  { %v2728_v29 = vpop.eup %2727 }
 0x734   :  { %909 = vrot.lane.b32.xlu1 %v2728_v29, %s2861_s10 }
 0x79a   :  { %v854_v30 = vpop.permute.xlu0 %853 }
 0x79b   :  { %v859_v12 = vmul.f32 %v854_v30, %v849_v31 }
 0x79d   :  { %v3110_v38 = vadd.f32 %v861_v35, %v859_v12 }
 0x79e   :  { %v856_v14 = vpop.permute.xlu1 %855 }
 0x79f   :  { %v860_v37 = vmul.f32 %v856_v14, %v850_v34 }
 0x7a1   :  { %v3112_v39 = vadd.f32 %v862_v36, %v860_v37 }
 0x7a2   :  { %v908_v40 = vpop.permute.xlu0 %907 }
 0x7a3   :  { %v919_v44 = vpack.c.bf16 %v3112_v39, %v3110_v38  ;;  %v913_v45 = vmul.f32 %v908_v40, %v903_v41 }
 0x7a5   :  { %949 = vrot.lane.b32.xlu0 %v919_v44, %s2861_s10  ;;  %v3119_v51 = vadd.f32 %v915_v48, %v913_v45 }
 0x7a6   :  { %v910_v47 = vpop.permute.xlu1 %909 }
 0x7a7   :  { %v914_v50 = vmul.f32 %v910_v47, %v904_v46 }
 0x7a9   :  { %v3121_v52 = vadd.f32 %v916_v49, %v914_v50 }
 0x7ab   :  { %v934_v53 = vpack.c.bf16 %v3121_v52, %v3119_v51 }
 0x7ad   :  { %995 = vrot.lane.b32.xlu1 %v934_v53, %s2861_s10 }
 0x817   :  { %v950_v54 = vpop.permute.xlu0 %949 }
 0x818   :  { %2573 = vmatmul.mubr.msk.bf16.vlgmr.msra.gmra.mxu0 %vm162_vm1, %v950_v54 }
 0x819   :  { %2585 = vmatpush3.bf16.msra.mxu0 %v2909_v4  ;;  %2588 = vmatprep.mubr.msk.bf16.mxu0 %vm2858_vm0, %v2857_v5 }
 0x81a   :  { %2586 = vmatprep.subr.bf16.mxu0 %v2857_v5 }
 0x81d   :  { %2587 = vmatpush3.bf16.msra.mxu0 %v2916_v7 }
 0x81e   :  { %2600 = vmatprep.subr.bf16.mxu0 %v2857_v5 }
 0x81f   :  { %v996_v55 = vpop.permute.xlu1 %995 }
 0x820   :  { %2581 = vmatmul.mubr.msk.bf16.vlgmr.msra.gmra.mxu1 %vm162_vm1, %v996_v55 }
 0x821   :  { %2593 = vmatpush3.bf16.msra.mxu1 %v2913_v6  ;;  %2596 = vmatprep.mubr.msk.bf16.mxu1 %vm2858_vm0, %v2857_v5 }
 0x822   :  { %2594 = vmatprep.subr.bf16.mxu1 %v2857_v5 }
 0x825   :  { %2595 = vmatpush3.bf16.msra.mxu1 %v2922_v8 }
 0x826   :  { %2608 = vmatprep.subr.bf16.mxu1 %v2857_v5 }
 0x8d8   :  { %v988_v4 = vpop.f32.mrf.mxu0 }
 0x8d9   :  { %v1065_v56 = vadd.f32 %v988_v4, %v2970_v16  ;;  %v1051_v9 = vadd.f32 %v2420_v3, %v988_v4 }
 0x8da   :  { %v2574_v7 = vpop.f32.mrf.mxu0 }
 0x8db   :  { %1069 = vrot.lane.b32.xlu0 %v1065_v56, %s2859_s29  ;;  %v2282_v10 = vmul.f32 -1.442695, %v1051_v9 }
 0x8dc   :  { %v991_v57 = vpop.f32.mrf.mxu0 }
 0x8dd   :  { %v1066_v58 = vadd.f32 %v991_v57, %v2970_v16  ;;  %v1052_v20 = vadd.f32 %v2421_v13, %v991_v57  ;;  %2729 = vpow2.f32 %v2282_v10 }
 0x8de   :  { %v2575_v59 = vpop.f32.mrf.mxu0 }
 0x8df   :  { %1071 = vrot.lane.b32.xlu1 %v1066_v58, %s2859_s29  ;;  %v2283_v21 = vmul.f32 -1.442695, %v1052_v20 }
 0x8e0   :  { %v1034_v6 = vpop.f32.mrf.mxu1 }
 0x8e1   :  { %v1119_v62 = vadd.f32 %v1034_v6, %v2972_v17  ;;  %v1105_v22 = vadd.f32 %v2424_v11, %v1034_v6  ;;  %2731 = vpow2.f32 %v2283_v21 }
 0x8e2   :  { %v2582_v63 = vpop.f32.mrf.mxu1 }
 0x8e3   :  { %1123 = vrot.lane.b32.xlu0 %v1119_v62, %s2859_s29  ;;  %v2284_v24 = vmul.f32 -1.442695, %v1105_v22 }
 0x8e4   :  { %v1037_v8 = vpop.f32.mrf.mxu1 }
 0x8e5   :  { %v1120_v0 = vadd.f32 %v1037_v8, %v2972_v17  ;;  %v1106_v25 = vadd.f32 %v2425_v23, %v1037_v8  ;;  %2733 = vpow2.f32 %v2284_v24 }
 0x8e6   :  { %v2583_v1 = vpop.f32.mrf.mxu1 }
 0x8e7   :  { %1125 = vrot.lane.b32.xlu1 %v1120_v0, %s2859_s29  ;;  %v2285_v26 = vmul.f32 -1.442695, %v1106_v25 }
 0x8e9   :  { %2735 = vpow2.f32 %v2285_v26 }
 0x8ea   :  { %v2730_v27 = vpop.eup %2729 }
 0x8eb   :  { %v1059_v28 = vadd.f32 1.0, %v2730_v27 }
 0x8ed   :  { %2737 = vrcp.f32 %v1059_v28 }
 0x8ee   :  { %v2732_v29 = vpop.eup %2731 }
 0x8ef   :  { %v1060_v30 = vadd.f32 1.0, %v2732_v29 }
 0x8f1   :  { %2739 = vrcp.f32 %v1060_v30 }
 0x8f2   :  { %v2734_v31 = vpop.eup %2733 }
 0x8f3   :  { %v1113_v12 = vadd.f32 1.0, %v2734_v31 }
 0x8f5   :  { %2741 = vrcp.f32 %v1113_v12 }
 0x8f6   :  { %v2736_v34 = vpop.eup %2735 }
 0x8f7   :  { %v1114_v14 = vadd.f32 1.0, %v2736_v34  ;;  %v3181_v34 = vld [vmem:[#allocation2 + $0x8] sm:$0xff]  }
 0x8f9   :  { %2743 = vrcp.f32 %v1114_v14  ;;  %v3187_v14 = vld [vmem:[#allocation2] sm:$0xff]  }
 0x8fa   :  { %v2738_v35 = vpop.eup %2737 }
 0x8fb   :  { %v1089_v0 = vsub.f32 1.0, %v2738_v35  ;;  %v1101_v9 = vmul.f32 %v2738_v35, %v3110_v38 }
 0x8fe   :  { %v2740_v40 = vpop.eup %2739 }
 0x8ff   :  { %v1090_v2 = vsub.f32 1.0, %v2740_v40 }
 0x902   :  { %v2742_v45 = vpop.eup %2741 }
 0x903   :  { %v1143_v21 = vsub.f32 1.0, %v2742_v45  ;;  %v1155_v26 = vmul.f32 %v2742_v45, %v3119_v51 }
 0x906   :  { %v2744_v48 = vpop.eup %2743 }
 0x907   :  { %v1144_v24 = vsub.f32 1.0, %v2744_v48  ;;  %v1156_v27 = vmul.f32 %v2744_v48, %v3121_v52 }
 0x94d   :  { %v1070_v36 = vpop.permute.xlu0 %1069 }
 0x94e   :  { %v1075_v37 = vmul.f32 %v2738_v35, %v1070_v36  ;;  %v3192_v36 = vld [vmem:[#allocation3 + $0x8] sm:$0xff]  }
 0x950   :  { %1079 = vrot.lane.b32.xlu0 %v1075_v37, %s2859_s29  ;;  %v3198_v37 = vld [vmem:[#allocation3] sm:$0xff]  }
 0x951   :  { %v1072_v41 = vpop.permute.xlu1 %1071 }
 0x952   :  { %v1076_v44 = vmul.f32 %v2740_v40, %v1072_v41 }
 0x954   :  { %1081 = vrot.lane.b32.xlu1 %v1076_v44, %s2859_s29 }
 0x955   :  { %v1124_v46 = vpop.permute.xlu0 %1123 }
 0x956   :  { %v1129_v47 = vmul.f32 %v2742_v45, %v1124_v46 }
 0x958   :  { %1133 = vrot.lane.b32.xlu0 %v1129_v47, %s2859_s29 }
 0x959   :  { %v1126_v49 = vpop.permute.xlu1 %1125 }
 0x95a   :  { %v1130_v50 = vmul.f32 %v2744_v48, %v1126_v49 }
 0x95c   :  { %1135 = vrot.lane.b32.xlu1 %v1130_v50, %s2859_s29 }
 0x9c2   :  { %v1080_v53 = vpop.permute.xlu0 %1079 }
 0x9c3   :  { %v1085_v54 = vadd.f32 %v2420_v3, %v1080_v53 }
 0x9c5   :  { %2745 = vtanh.f32 %v1085_v54 }
 0x9c6   :  { %v1082_v55 = vpop.permute.xlu1 %1081 }
 0x9c7   :  { %v1086_v4 = vadd.f32 %v2421_v13, %v1082_v55  ;;  %v1102_v13 = vmul.f32 %v2740_v40, %v3112_v39 }
 0x9c9   :  { %2747 = vtanh.f32 %v1086_v4  ;;  %v2465_v4 = vld [vmem:[%s3624_s0 + $0x20] sm:$0xff]  }
 0x9ca   :  { %v1134_v56 = vpop.permute.xlu0 %1133 }
 0x9cb   :  { %v1139_v7 = vadd.f32 %v2424_v11, %v1134_v56  ;;  %v2428_v56 = vunpack.c.l.bf16 %v2465_v4 }
 0x9cd   :  { %2749 = vtanh.f32 %v1139_v7 }
 0x9ce   :  { %v1136_v57 = vpop.permute.xlu1 %1135 }
 0x9cf   :  { %v1140_v58 = vadd.f32 %v2425_v23, %v1136_v57  ;;  %v2429_v57 = vunpack.c.h.bf16 %v2465_v4 }
 0x9d1   :  { %2751 = vtanh.f32 %v1140_v58  ;;  %v2466_v58 = vld [vmem:[%s3625_s1 + $0x18] sm:$0xff]  }
 0x9d2   :  { %v2746_v59 = vpop.eup %2745 }
 0x9d3   :  { %1093 = vrot.lane.b32.xlu0 %v2746_v59, %s2861_s10 }
 0x9d6   :  { %v2748_v6 = vpop.eup %2747 }
 0x9d7   :  { %1095 = vrot.lane.b32.xlu1 %v2748_v6, %s2861_s10 }
 0x9da   :  { %v2750_v62 = vpop.eup %2749 }
 0x9db   :  { %1147 = vrot.lane.b32.xlu0 %v2750_v62, %s2861_s10  ;;  %v2432_v62 = vunpack.c.l.bf16 %v2466_v58 }
 0x9de   :  { %v2752_v63 = vpop.eup %2751 }
 0x9df   :  { %1149 = vrot.lane.b32.xlu1 %v2752_v63, %s2861_s10 }
 0xa45   :  { %v1094_v8 = vpop.permute.xlu0 %1093 }
 0xa46   :  { %v1099_v1 = vmul.f32 %v1094_v8, %v1089_v0  ;;  %v2433_v0 = vunpack.c.h.bf16 %v2466_v58 }
 0xa48   :  { %v3164_v10 = vadd.f32 %v1101_v9, %v1099_v1 }
 0xa49   :  { %v1096_v3 = vpop.permute.xlu1 %1095 }
 0xa4a   :  { %v1100_v15 = vmul.f32 %v1096_v3, %v1090_v2 }
 0xa4c   :  { %v3166_v20 = vadd.f32 %v1102_v13, %v1100_v15 }
 0xa4d   :  { %v1148_v11 = vpop.permute.xlu0 %1147 }
 0xa4e   :  { %v1159_v22 = vpack.c.bf16 %v3166_v20, %v3164_v10  ;;  %v1153_v23 = vmul.f32 %v1148_v11, %v1143_v21 }
 0xa50   :  { %1189 = vrot.lane.b32.xlu0 %v1159_v22, %s2861_s10  ;;  %v3173_v29 = vadd.f32 %v1155_v26, %v1153_v23 }
 0xa51   :  { %v1150_v25 = vpop.permute.xlu1 %1149 }
 0xa52   :  { %v1154_v28 = vmul.f32 %v1150_v25, %v1144_v24 }
 0xa54   :  { %v3175_v30 = vadd.f32 %v1156_v27, %v1154_v28 }
 0xa56   :  { %v1174_v31 = vpack.c.bf16 %v3175_v30, %v3173_v29 }
 0xa58   :  { %1235 = vrot.lane.b32.xlu1 %v1174_v31, %s2861_s10 }
 0xac2   :  { %v1190_v12 = vpop.permute.xlu0 %1189 }
 0xac3   :  { %2589 = vmatmul.mubr.msk.bf16.vlgmr.msra.gmra.mxu0 %vm162_vm1, %v1190_v12 }
 0xac4   :  { %2601 = vmatpush3.bf16.msra.mxu0 %v3181_v34  ;;  %2604 = vmatprep.mubr.msk.bf16.mxu0 %vm2858_vm0, %v2857_v5 }
 0xac5   :  { %2602 = vmatprep.subr.bf16.mxu0 %v2857_v5 }
 0xac8   :  { %2603 = vmatpush3.bf16.msra.mxu0 %v3187_v14 }
 0xac9   :  { %2616 = vmatprep.subr.bf16.mxu0 %v2857_v5 }
 0xaca   :  { %v1236_v35 = vpop.permute.xlu1 %1235 }
 0xacb   :  { %2597 = vmatmul.mubr.msk.bf16.vlgmr.msra.gmra.mxu1 %vm162_vm1, %v1236_v35 }
 0xacc   :  { %2609 = vmatpush3.bf16.msra.mxu1 %v3192_v36  ;;  %2612 = vmatprep.mubr.msk.bf16.mxu1 %vm2858_vm0, %v2857_v5 }
 0xacd   :  { %2610 = vmatprep.subr.bf16.mxu1 %v2857_v5 }
 0xad0   :  { %2611 = vmatpush3.bf16.msra.mxu1 %v3198_v37 }
 0xad1   :  { %2624 = vmatprep.subr.bf16.mxu1 %v2857_v5 }
 0xb83   :  { %v1228_v40 = vpop.f32.mrf.mxu0 }
 0xb84   :  { %v1305_v41 = vadd.f32 %v1228_v40, %v2970_v16  ;;  %v1291_v7 = vadd.f32 %v2428_v56, %v1228_v40 }
 0xb85   :  { %v2590_v44 = vpop.f32.mrf.mxu0 }
 0xb86   :  { %1309 = vrot.lane.b32.xlu0 %v1305_v41, %s2859_s29  ;;  %v2300_v59 = vmul.f32 -1.442695, %v1291_v7 }
 0xb87   :  { %v1231_v45 = vpop.f32.mrf.mxu0 }
 0xb88   :  { %v1306_v46 = vadd.f32 %v1231_v45, %v2970_v16  ;;  %v1292_v6 = vadd.f32 %v2429_v57, %v1231_v45  ;;  %2753 = vpow2.f32 %v2300_v59 }
 0xb89   :  { %v2591_v47 = vpop.f32.mrf.mxu0 }
 0xb8a   :  { %1311 = vrot.lane.b32.xlu1 %v1306_v46, %s2859_s29  ;;  %v2301_v63 = vmul.f32 -1.442695, %v1292_v6 }
 0xb8b   :  { %v1274_v48 = vpop.f32.mrf.mxu1 }
 0xb8c   :  { %v1359_v49 = vadd.f32 %v1274_v48, %v2972_v17  ;;  %v1345_v8 = vadd.f32 %v2432_v62, %v1274_v48  ;;  %2755 = vpow2.f32 %v2301_v63 }
 0xb8d   :  { %v2598_v50 = vpop.f32.mrf.mxu1 }
 0xb8e   :  { %1363 = vrot.lane.b32.xlu0 %v1359_v49, %s2859_s29  ;;  %v2302_v1 = vmul.f32 -1.442695, %v1345_v8 }
 0xb8f   :  { %v1277_v53 = vpop.f32.mrf.mxu1 }
 0xb90   :  { %v1360_v54 = vadd.f32 %v1277_v53, %v2972_v17  ;;  %v1346_v2 = vadd.f32 %v2433_v0, %v1277_v53  ;;  %2757 = vpow2.f32 %v2302_v1 }
 0xb91   :  { %v2599_v55 = vpop.f32.mrf.mxu1 }
 0xb92   :  { %1365 = vrot.lane.b32.xlu1 %v1360_v54, %s2859_s29  ;;  %v2303_v3 = vmul.f32 -1.442695, %v1346_v2 }
 0xb94   :  { %2759 = vpow2.f32 %v2303_v3 }
 0xb95   :  { %v2754_v9 = vpop.eup %2753 }
 0xb96   :  { %v1299_v13 = vadd.f32 1.0, %v2754_v9 }
 0xb98   :  { %2761 = vrcp.f32 %v1299_v13 }
 0xb99   :  { %v2756_v15 = vpop.eup %2755 }
 0xb9a   :  { %v1300_v11 = vadd.f32 1.0, %v2756_v15 }
 0xb9c   :  { %2763 = vrcp.f32 %v1300_v11 }
 0xb9d   :  { %v2758_v21 = vpop.eup %2757 }
 0xb9e   :  { %v1353_v22 = vadd.f32 1.0, %v2758_v21 }
 0xba0   :  { %2765 = vrcp.f32 %v1353_v22 }
 0xba1   :  { %v2760_v23 = vpop.eup %2759 }
 0xba2   :  { %v1354_v24 = vadd.f32 1.0, %v2760_v23 }
 0xba4   :  { %2767 = vrcp.f32 %v1354_v24 }
 0xba5   :  { %v2762_v25 = vpop.eup %2761 }
 0xba6   :  { %v1329_v6 = vsub.f32 1.0, %v2762_v25 }
 0xba9   :  { %v2764_v28 = vpop.eup %2763 }
 0xbaa   :  { %v1342_v1 = vmul.f32 %v2764_v28, %v3166_v20 }
 0xbad   :  { %v2766_v35 = vpop.eup %2765 }
 0xbae   :  { %v1383_v15 = vsub.f32 1.0, %v2766_v35  ;;  %v1395_v24 = vmul.f32 %v2766_v35, %v3173_v29 }
 0xbb1   :  { %v2768_v44 = vpop.eup %2767 }
 0xbb2   :  { %v1384_v22 = vsub.f32 1.0, %v2768_v44 }
 0xbf8   :  { %v1310_v26 = vpop.permute.xlu0 %1309 }
 0xbf9   :  { %v1315_v27 = vmul.f32 %v2762_v25, %v1310_v26 }
 0xbfb   :  { %1319 = vrot.lane.b32.xlu0 %v1315_v27, %s2859_s29 }
 0xbfc   :  { %v1312_v31 = vpop.permute.xlu1 %1311 }
 0xbfd   :  { %v1316_v12 = vmul.f32 %v2764_v28, %v1312_v31 }
 0xbff   :  { %1321 = vrot.lane.b32.xlu1 %v1316_v12, %s2859_s29 }
 0xc00   :  { %v1364_v40 = vpop.permute.xlu0 %1363 }
 0xc01   :  { %v1369_v41 = vmul.f32 %v2766_v35, %v1364_v40 }
 0xc03   :  { %1373 = vrot.lane.b32.xlu0 %v1369_v41, %s2859_s29 }
 0xc04   :  { %v1366_v45 = vpop.permute.xlu1 %1365 }
 0xc05   :  { %v1370_v46 = vmul.f32 %v2768_v44, %v1366_v45 }
 0xc07   :  { %1375 = vrot.lane.b32.xlu1 %v1370_v46, %s2859_s29 }
 0xc6d   :  { %v1320_v47 = vpop.permute.xlu0 %1319 }
 0xc6e   :  { %v1325_v48 = vadd.f32 %v2428_v56, %v1320_v47 }
 0xc70   :  { %2769 = vtanh.f32 %v1325_v48 }
 0xc71   :  { %v1322_v49 = vpop.permute.xlu1 %1321 }
 0xc72   :  { %v1326_v50 = vadd.f32 %v2429_v57, %v1322_v49 }
 0xc74   :  { %2771 = vtanh.f32 %v1326_v50 }
 0xc75   :  { %v1374_v53 = vpop.permute.xlu0 %1373 }
 0xc76   :  { %v1379_v54 = vadd.f32 %v2432_v62, %v1374_v53  ;;  %v1330_v62 = vsub.f32 1.0, %v2764_v28 }
 0xc78   :  { %2773 = vtanh.f32 %v1379_v54 }
 0xc79   :  { %v1376_v55 = vpop.permute.xlu1 %1375 }
 0xc7a   :  { %v1380_v4 = vadd.f32 %v2433_v0, %v1376_v55  ;;  %v1341_v0 = vmul.f32 %v2762_v25, %v3164_v10  ;;  %v1396_v25 = vmul.f32 %v2768_v44, %v3175_v30 }
 0xc7c   :  { %2775 = vtanh.f32 %v1380_v4  ;;  %v2467_v4 = vld [vmem:[%s3624_s0 + $0x28] sm:$0xff]  }
 0xc7d   :  { %v2770_v7 = vpop.eup %2769 }
 0xc7e   :  { %1333 = vrot.lane.b32.xlu0 %v2770_v7, %s2861_s10  ;;  %v2436_v7 = vunpack.c.l.bf16 %v2467_v4 }
 0xc81   :  { %v2772_v58 = vpop.eup %2771 }
 0xc82   :  { %1335 = vrot.lane.b32.xlu1 %v2772_v58, %s2861_s10 }
 0xc85   :  { %v2774_v59 = vpop.eup %2773 }
 0xc86   :  { %1387 = vrot.lane.b32.xlu0 %v2774_v59, %s2861_s10  ;;  %v2437_v59 = vunpack.c.h.bf16 %v2467_v4 }
 0xc89   :  { %v2776_v56 = vpop.eup %2775 }
 0xc8a   :  { %1389 = vrot.lane.b32.xlu1 %v2776_v56, %s2861_s10  ;;  %v2468_v56 = vld [vmem:[%s3625_s1 + $0x10] sm:$0xff]  }
 0xcf0   :  { %v1334_v57 = vpop.permute.xlu0 %1333 }
 0xcf1   :  { %v1339_v63 = vmul.f32 %v1334_v57, %v1329_v6 }
 0xcf3   :  { %v3226_v3 = vadd.f32 %v1341_v0, %v1339_v63  ;;  %v2440_v63 = vunpack.c.l.bf16 %v2468_v56  ;;  %v2441_v0 = vunpack.c.h.bf16 %v2468_v56 }
 0xcf4   :  { %v1336_v8 = vpop.permute.xlu1 %1335 }
 0xcf5   :  { %v1340_v2 = vmul.f32 %v1336_v8, %v1330_v62 }
 0xcf7   :  { %v3228_v9 = vadd.f32 %v1342_v1, %v1340_v2 }
 0xcf8   :  { %v1388_v13 = vpop.permute.xlu0 %1387 }
 0xcf9   :  { %v1399_v11 = vpack.c.bf16 %v3228_v9, %v3226_v3  ;;  %v1393_v21 = vmul.f32 %v1388_v13, %v1383_v15 }
 0xcfb   :  { %1429 = vrot.lane.b32.xlu0 %v1399_v11, %s2861_s10  ;;  %v3235_v27 = vadd.f32 %v1395_v24, %v1393_v21 }
 0xcfc   :  { %v1390_v23 = vpop.permute.xlu1 %1389 }
 0xcfd   :  { %v1394_v26 = vmul.f32 %v1390_v23, %v1384_v22 }
 0xcff   :  { %v3237_v28 = vadd.f32 %v1396_v25, %v1394_v26 }
 0xd01   :  { %v1414_v31 = vpack.c.bf16 %v3237_v28, %v3235_v27 }
 0xd03   :  { %1475 = vrot.lane.b32.xlu1 %v1414_v31, %s2861_s10 }
 0xd6d   :  { %v1430_v12 = vpop.permute.xlu0 %1429 }
 0xd6e   :  { %2605 = vmatmul.mubr.msk.bf16.vlgmr.msra.gmra.mxu0 %vm162_vm1, %v1430_v12 }
 0xd6f   :  { %2617 = vmatpush3.bf16.msra.mxu0 %v3181_v34  ;;  %2620 = vmatprep.mubr.msk.bf16.mxu0 %vm2858_vm0, %v2857_v5 }
 0xd70   :  { %2618 = vmatprep.subr.bf16.mxu0 %v2857_v5 }
 0xd73   :  { %2619 = vmatpush3.bf16.msra.mxu0 %v3187_v14 }
 0xd74   :  { %2632 = vmatprep.subr.bf16.mxu0 %v2857_v5 }
 0xd75   :  { %v1476_v35 = vpop.permute.xlu1 %1475 }
 0xd76   :  { %2613 = vmatmul.mubr.msk.bf16.vlgmr.msra.gmra.mxu1 %vm162_vm1, %v1476_v35 }
 0xd77   :  { %2625 = vmatpush3.bf16.msra.mxu1 %v3192_v36  ;;  %2628 = vmatprep.mubr.msk.bf16.mxu1 %vm2858_vm0, %v2857_v5 }
 0xd78   :  { %2626 = vmatprep.subr.bf16.mxu1 %v2857_v5 }
 0xd7b   :  { %2627 = vmatpush3.bf16.msra.mxu1 %v3198_v37 }
 0xd7c   :  { %2640 = vmatprep.subr.bf16.mxu1 %v2857_v5 }
 0xe2e   :  { %v1468_v40 = vpop.f32.mrf.mxu0 }
 0xe2f   :  { %v1545_v41 = vadd.f32 %v1468_v40, %v2970_v16  ;;  %v1531_v58 = vadd.f32 %v2436_v7, %v1468_v40 }
 0xe30   :  { %v2606_v44 = vpop.f32.mrf.mxu0 }
 0xe31   :  { %1549 = vrot.lane.b32.xlu0 %v1545_v41, %s2859_s29  ;;  %v2318_v57 = vmul.f32 -1.442695, %v1531_v58 }
 0xe32   :  { %v1471_v45 = vpop.f32.mrf.mxu0 }
 0xe33   :  { %v1546_v46 = vadd.f32 %v1471_v45, %v2970_v16  ;;  %v1532_v6 = vadd.f32 %v2437_v59, %v1471_v45  ;;  %2777 = vpow2.f32 %v2318_v57 }
 0xe34   :  { %v2607_v47 = vpop.f32.mrf.mxu0 }
 0xe35   :  { %1551 = vrot.lane.b32.xlu1 %v1546_v46, %s2859_s29  ;;  %v2319_v62 = vmul.f32 -1.442695, %v1532_v6 }
 0xe36   :  { %v1514_v48 = vpop.f32.mrf.mxu1 }
 0xe37   :  { %v1599_v49 = vadd.f32 %v1514_v48, %v2972_v17  ;;  %v1585_v8 = vadd.f32 %v2440_v63, %v1514_v48  ;;  %2779 = vpow2.f32 %v2319_v62 }
 0xe38   :  { %v2614_v50 = vpop.f32.mrf.mxu1 }
 0xe39   :  { %1603 = vrot.lane.b32.xlu0 %v1599_v49, %s2859_s29  ;;  %v2320_v1 = vmul.f32 -1.442695, %v1585_v8 }
 0xe3a   :  { %v1517_v53 = vpop.f32.mrf.mxu1 }
 0xe3b   :  { %v1600_v54 = vadd.f32 %v1517_v53, %v2972_v17  ;;  %v1586_v2 = vadd.f32 %v2441_v0, %v1517_v53  ;;  %2781 = vpow2.f32 %v2320_v1 }
 0xe3c   :  { %v2615_v55 = vpop.f32.mrf.mxu1 }
 0xe3d   :  { %1605 = vrot.lane.b32.xlu1 %v1600_v54, %s2859_s29  ;;  %v2321_v13 = vmul.f32 -1.442695, %v1586_v2 }
 0xe3f   :  { %2783 = vpow2.f32 %v2321_v13 }
 0xe40   :  { %v2778_v15 = vpop.eup %2777 }
 0xe41   :  { %v1539_v11 = vadd.f32 1.0, %v2778_v15 }
 0xe43   :  { %2785 = vrcp.f32 %v1539_v11 }
 0xe44   :  { %v2780_v21 = vpop.eup %2779 }
 0xe45   :  { %v1540_v22 = vadd.f32 1.0, %v2780_v21 }
 0xe47   :  { %2787 = vrcp.f32 %v1540_v22 }
 0xe48   :  { %v2782_v23 = vpop.eup %2781 }
 0xe49   :  { %v1593_v24 = vadd.f32 1.0, %v2782_v23 }
 0xe4b   :  { %2789 = vrcp.f32 %v1593_v24 }
 0xe4c   :  { %v2784_v25 = vpop.eup %2783 }
 0xe4d   :  { %v1594_v26 = vadd.f32 1.0, %v2784_v25 }
 0xe4f   :  { %2791 = vrcp.f32 %v1594_v26 }
 0xe50   :  { %v2786_v31 = vpop.eup %2785 }
 0xe51   :  { %v1569_v2 = vsub.f32 1.0, %v2786_v31 }
 0xe54   :  { %v2788_v40 = vpop.eup %2787 }
 0xe55   :  { %v1582_v11 = vmul.f32 %v2788_v40, %v3228_v9 }
 0xe58   :  { %v2790_v45 = vpop.eup %2789 }
 0xe59   :  { %v1623_v25 = vsub.f32 1.0, %v2790_v45 }
 0xe5c   :  { %v2792_v48 = vpop.eup %2791 }
 0xea3   :  { %v1550_v12 = vpop.permute.xlu0 %1549 }
 0xea4   :  { %v1555_v35 = vmul.f32 %v2786_v31, %v1550_v12 }
 0xea6   :  { %1559 = vrot.lane.b32.xlu0 %v1555_v35, %s2859_s29  ;;  %v1624_v35 = vsub.f32 1.0, %v2792_v48 }
 0xea7   :  { %v1552_v41 = vpop.permute.xlu1 %1551 }
 0xea8   :  { %v1556_v44 = vmul.f32 %v2788_v40, %v1552_v41 }
 0xeaa   :  { %1561 = vrot.lane.b32.xlu1 %v1556_v44, %s2859_s29  ;;  %v1635_v44 = vmul.f32 %v2790_v45, %v3235_v27 }
 0xeab   :  { %v1604_v46 = vpop.permute.xlu0 %1603 }
 0xeac   :  { %v1609_v47 = vmul.f32 %v2790_v45, %v1604_v46 }
 0xeae   :  { %1613 = vrot.lane.b32.xlu0 %v1609_v47, %s2859_s29 }
 0xeaf   :  { %v1606_v49 = vpop.permute.xlu1 %1605 }
 0xeb0   :  { %v1610_v50 = vmul.f32 %v2792_v48, %v1606_v49 }
 0xeb2   :  { %1615 = vrot.lane.b32.xlu1 %v1610_v50, %s2859_s29 }
 0xf18   :  { %v1560_v53 = vpop.permute.xlu0 %1559 }
 0xf19   :  { %v1565_v54 = vadd.f32 %v2436_v7, %v1560_v53 }
 0xf1b   :  { %2793 = vtanh.f32 %v1565_v54 }
 0xf1c   :  { %v1562_v55 = vpop.permute.xlu1 %1561 }
 0xf1d   :  { %v1566_v4 = vadd.f32 %v2437_v59, %v1562_v55 }
 0xf1f   :  { %2795 = vtanh.f32 %v1566_v4 }
 0xf20   :  { %v1614_v58 = vpop.permute.xlu0 %1613 }
 0xf21   :  { %v1619_v56 = vadd.f32 %v2440_v63, %v1614_v58  ;;  %v1570_v63 = vsub.f32 1.0, %v2788_v40 }
 0xf23   :  { %2797 = vtanh.f32 %v1619_v56 }
 0xf24   :  { %v1616_v57 = vpop.permute.xlu1 %1615 }
 0xf25   :  { %v1620_v6 = vadd.f32 %v2441_v0, %v1616_v57  ;;  %v1581_v0 = vmul.f32 %v2786_v31, %v3226_v3  ;;  %v1636_v31 = vmul.f32 %v2792_v48, %v3237_v28  ;;  %v2469_v57 = vld [vmem:[%s3624_s0 + $0x30] sm:$0xff]  }
 0xf27   :  { %2799 = vtanh.f32 %v1620_v6  ;;  %v2444_v6 = vunpack.c.l.bf16 %v2469_v57 }
 0xf28   :  { %v2794_v62 = vpop.eup %2793 }
 0xf29   :  { %1573 = vrot.lane.b32.xlu0 %v2794_v62, %s2861_s10 }
 0xf2c   :  { %v2796_v8 = vpop.eup %2795 }
 0xf2d   :  { %1575 = vrot.lane.b32.xlu1 %v2796_v8, %s2861_s10  ;;  %v2445_v8 = vunpack.c.h.bf16 %v2469_v57 }
 0xf30   :  { %v2798_v1 = vpop.eup %2797 }
 0xf31   :  { %1627 = vrot.lane.b32.xlu0 %v2798_v1, %s2861_s10  ;;  %v2470_v1 = vld [vmem:[%s3625_s1 + $0x8] sm:$0xff]  }
 0xf34   :  { %v2800_v7 = vpop.eup %2799 }
 0xf35   :  { %1629 = vrot.lane.b32.xlu1 %v2800_v7, %s2861_s10 }
 0xf9b   :  { %v1574_v59 = vpop.permute.xlu0 %1573 }
 0xf9c   :  { %v1579_v13 = vmul.f32 %v1574_v59, %v1569_v2  ;;  %v2448_v2 = vunpack.c.l.bf16 %v2470_v1 }
 0xf9e   :  { %v3280_v22 = vadd.f32 %v1581_v0, %v1579_v13 }
 0xf9f   :  { %v1576_v15 = vpop.permute.xlu1 %1575 }
 0xfa0   :  { %v1580_v21 = vmul.f32 %v1576_v15, %v1570_v63  ;;  %v2449_v15 = vunpack.c.h.bf16 %v2470_v1 }
 0xfa2   :  { %v3282_v23 = vadd.f32 %v1582_v11, %v1580_v21 }
 0xfa3   :  { %v1628_v24 = vpop.permute.xlu0 %1627 }
 0xfa4   :  { %v1639_v26 = vpack.c.bf16 %v3282_v23, %v3280_v22  ;;  %v1633_v12 = vmul.f32 %v1628_v24, %v1623_v25 }
 0xfa6   :  { %1669 = vrot.lane.b32.xlu0 %v1639_v26, %s2861_s10  ;;  %v3289_v46 = vadd.f32 %v1635_v44, %v1633_v12 }
 0xfa7   :  { %v1630_v41 = vpop.permute.xlu1 %1629 }
 0xfa8   :  { %v1634_v40 = vmul.f32 %v1630_v41, %v1624_v35 }
 0xfaa   :  { %v3291_v47 = vadd.f32 %v1636_v31, %v1634_v40 }
 0xfac   :  { %v1654_v49 = vpack.c.bf16 %v3291_v47, %v3289_v46 }
 0xfae   :  { %1715 = vrot.lane.b32.xlu1 %v1654_v49, %s2861_s10 }
0x1018   :  { %v1670_v50 = vpop.permute.xlu0 %1669 }
0x1019   :  { %2621 = vmatmul.mubr.msk.bf16.vlgmr.msra.gmra.mxu0 %vm162_vm1, %v1670_v50 }
0x101a   :  { %2633 = vmatpush3.bf16.msra.mxu0 %v3181_v34  ;;  %2636 = vmatprep.mubr.msk.bf16.mxu0 %vm2858_vm0, %v2857_v5 }
0x101b   :  { %2634 = vmatprep.subr.bf16.mxu0 %v2857_v5 }
0x101e   :  { %2635 = vmatpush3.bf16.msra.mxu0 %v3187_v14 }
0x1020   :  { %v1716_v45 = vpop.permute.xlu1 %1715 }
0x1021   :  { %2629 = vmatmul.mubr.msk.bf16.vlgmr.msra.gmra.mxu1 %vm162_vm1, %v1716_v45 }
0x1022   :  { %2641 = vmatpush3.bf16.msra.mxu1 %v3192_v36  ;;  %2644 = vmatprep.mubr.msk.bf16.mxu1 %vm2858_vm0, %v2857_v5 }
0x1023   :  { %2642 = vmatprep.subr.bf16.mxu1 %v2857_v5 }
0x1026   :  { %2643 = vmatpush3.bf16.msra.mxu1 %v3198_v37 }
0x10d9   :  { %v1708_v34 = vpop.f32.mrf.mxu0 }
0x10da   :  { %v1785_v48 = vadd.f32 %v1708_v34, %v2970_v16  ;;  %v1771_v62 = vadd.f32 %v2444_v6, %v1708_v34 }
0x10db   :  { %v2622_v53 = vpop.f32.mrf.mxu0 }
0x10dc   :  { %1789 = vrot.lane.b32.xlu0 %v1785_v48, %s2859_s29  ;;  %v2336_v7 = vmul.f32 -1.442695, %v1771_v62 }
0x10dd   :  { %v1711_v54 = vpop.f32.mrf.mxu0 }
0x10de   :  { %v1786_v14 = vadd.f32 %v1711_v54, %v2970_v16  ;;  %v1772_v59 = vadd.f32 %v2445_v8, %v1711_v54  ;;  %2801 = vpow2.f32 %v2336_v7 }
0x10df   :  { %v2623_v55 = vpop.f32.mrf.mxu0 }
0x10e0   :  { %1791 = vrot.lane.b32.xlu1 %v1786_v14, %s2859_s29  ;;  %v2337_v13 = vmul.f32 -1.442695, %v1772_v59 }
0x10e1   :  { %v1754_v36 = vpop.f32.mrf.mxu1 }
0x10e2   :  { %v1839_v4 = vadd.f32 %v1754_v36, %v2972_v17  ;;  %v1825_v63 = vadd.f32 %v2448_v2, %v1754_v36  ;;  %2803 = vpow2.f32 %v2337_v13 }
0x10e3   :  { %v2630_v58 = vpop.f32.mrf.mxu1 }
0x10e4   :  { %1843 = vrot.lane.b32.xlu0 %v1839_v4, %s2859_s29  ;;  %v2338_v0 = vmul.f32 -1.442695, %v1825_v63 }
0x10e5   :  { %v1757_v5 = vpop.f32.mrf.mxu1 }
0x10e6   :  { %v1840_v37 = vadd.f32 %v1757_v5, %v2972_v17  ;;  %v1826_v11 = vadd.f32 %v2449_v15, %v1757_v5  ;;  %2805 = vpow2.f32 %v2338_v0 }
0x10e7   :  { %v2631_v56 = vpop.f32.mrf.mxu1 }
0x10e8   :  { %1845 = vrot.lane.b32.xlu1 %v1840_v37, %s2859_s29  ;;  %v2339_v21 = vmul.f32 -1.442695, %v1826_v11 }
0x10ea   :  { %2807 = vpow2.f32 %v2339_v21 }
0x10eb   :  { %v2802_v24 = vpop.eup %2801 }
0x10ec   :  { %v1779_v25 = vadd.f32 1.0, %v2802_v24 }
0x10ee   :  { %2809 = vrcp.f32 %v1779_v25 }
0x10ef   :  { %v2804_v26 = vpop.eup %2803 }
0x10f0   :  { %v1780_v12 = vadd.f32 1.0, %v2804_v26 }
0x10f2   :  { %2811 = vrcp.f32 %v1780_v12 }
0x10f3   :  { %v2806_v35 = vpop.eup %2805 }
0x10f4   :  { %v1833_v41 = vadd.f32 1.0, %v2806_v35 }
0x10f6   :  { %2813 = vrcp.f32 %v1833_v41 }
0x10f7   :  { %v2808_v44 = vpop.eup %2807 }
0x10f8   :  { %v1834_v31 = vadd.f32 1.0, %v2808_v44 }
0x10fa   :  { %2815 = vrcp.f32 %v1834_v31 }
0x10fb   :  { %v2810_v40 = vpop.eup %2809 }
0x10fc   :  { %v1809_v0 = vsub.f32 1.0, %v2810_v40 }
0x10ff   :  { %v2812_v45 = vpop.eup %2811 }
0x1100   :  { %v1822_v24 = vmul.f32 %v2812_v45, %v3282_v23 }
0x1103   :  { %v2814_v53 = vpop.eup %2813 }
0x1104   :  { %v1863_v44 = vsub.f32 1.0, %v2814_v53 }
0x1107   :  { %v2816_v55 = vpop.eup %2815 }
0x114e   :  { %v1790_v49 = vpop.permute.xlu0 %1789 }
0x114f   :  { %v1795_v50 = vmul.f32 %v2810_v40, %v1790_v49  ;;  %v1864_v49 = vsub.f32 1.0, %v2816_v55 }
0x1151   :  { %1799 = vrot.lane.b32.xlu0 %v1795_v50, %s2859_s29 }
0x1152   :  { %v1792_v34 = vpop.permute.xlu1 %1791 }
0x1153   :  { %v1796_v48 = vmul.f32 %v2812_v45, %v1792_v34  ;;  %v1875_v34 = vmul.f32 %v2814_v53, %v3289_v46 }
0x1155   :  { %1801 = vrot.lane.b32.xlu1 %v1796_v48, %s2859_s29 }
0x1156   :  { %v1844_v54 = vpop.permute.xlu0 %1843 }
0x1157   :  { %v1849_v14 = vmul.f32 %v2814_v53, %v1844_v54 }
0x1159   :  { %1853 = vrot.lane.b32.xlu0 %v1849_v14, %s2859_s29 }
0x115a   :  { %v1846_v36 = vpop.permute.xlu1 %1845 }
0x115b   :  { %v1850_v4 = vmul.f32 %v2816_v55, %v1846_v36 }
0x115d   :  { %1855 = vrot.lane.b32.xlu1 %v1850_v4, %s2859_s29 }
0x11c3   :  { %v1800_v58 = vpop.permute.xlu0 %1799 }
0x11c4   :  { %v1805_v5 = vadd.f32 %v2444_v6, %v1800_v58 }
0x11c6   :  { %2817 = vtanh.f32 %v1805_v5 }
0x11c7   :  { %v1802_v37 = vpop.permute.xlu1 %1801 }
0x11c8   :  { %v1806_v56 = vadd.f32 %v2445_v8, %v1802_v37 }
0x11ca   :  { %2819 = vtanh.f32 %v1806_v56 }
0x11cb   :  { %v1854_v57 = vpop.permute.xlu0 %1853 }
0x11cc   :  { %v1859_v62 = vadd.f32 %v2448_v2, %v1854_v57  ;;  %v1810_v2 = vsub.f32 1.0, %v2812_v45 }
0x11ce   :  { %2821 = vtanh.f32 %v1859_v62 }
0x11cf   :  { %v1856_v1 = vpop.permute.xlu1 %1855 }
0x11d0   :  { %v1860_v7 = vadd.f32 %v2449_v15, %v1856_v1  ;;  %v1821_v15 = vmul.f32 %v2810_v40, %v3280_v22  ;;  %v1876_v40 = vmul.f32 %v2816_v55, %v3291_v47 }
0x11d2   :  { %2823 = vtanh.f32 %v1860_v7 }
0x11d3   :  { %v2818_v59 = vpop.eup %2817 }
0x11d4   :  { %1813 = vrot.lane.b32.xlu0 %v2818_v59, %s2861_s10 }
0x11d7   :  { %v2820_v13 = vpop.eup %2819 }
0x11d8   :  { %1815 = vrot.lane.b32.xlu1 %v2820_v13, %s2861_s10 }
0x11db   :  { %v2822_v63 = vpop.eup %2821 }
0x11dc   :  { %1867 = vrot.lane.b32.xlu0 %v2822_v63, %s2861_s10  ;;  %v2471_v63 = vld [vmem:[%s3624_s0 + $0x38] sm:$0xff]  }
0x11df   :  { %v2824_v6 = vpop.eup %2823 }
0x11e0   :  { %1869 = vrot.lane.b32.xlu1 %v2824_v6, %s2861_s10 }
0x1246   :  { %v1814_v8 = vpop.permute.xlu0 %1813 }
0x1247   :  { %v1819_v11 = vmul.f32 %v1814_v8, %v1809_v0  ;;  %v2453_v8 = vunpack.c.h.bf16 %v2471_v63  ;;  %v3364_v0 = vld [vmem:[%s3625_s1] sm:$0xff]  }
0x1249   :  { %v3332_v26 = vadd.f32 %v1821_v15, %v1819_v11 }
0x124a   :  { %v1816_v21 = vpop.permute.xlu1 %1815 }
0x124b   :  { %v1820_v25 = vmul.f32 %v1816_v21, %v1810_v2  ;;  %v2456_v21 = vunpack.c.l.bf16 %v3364_v0 }
0x124d   :  { %v3334_v12 = vadd.f32 %v1822_v24, %v1820_v25  ;;  %v2457_v24 = vunpack.c.h.bf16 %v3364_v0 }
0x124e   :  { %v1868_v35 = vpop.permute.xlu0 %1867 }
0x124f   :  { %v1879_v41 = vpack.c.bf16 %v3334_v12, %v3332_v26  ;;  %v1873_v31 = vmul.f32 %v1868_v35, %v1863_v44 }
0x1251   :  { %1909 = vrot.lane.b32.xlu0 %v1879_v41, %s2861_s10  ;;  %v3341_v48 = vadd.f32 %v1875_v34, %v1873_v31 }
0x1252   :  { %v1870_v50 = vpop.permute.xlu1 %1869 }
0x1253   :  { %v1874_v45 = vmul.f32 %v1870_v50, %v1864_v49 }
0x1255   :  { %v3343_v54 = vadd.f32 %v1876_v40, %v1874_v45 }
0x1257   :  { %v1894_v14 = vpack.c.bf16 %v3343_v54, %v3341_v48 }
0x1259   :  { %1955 = vrot.lane.b32.xlu1 %v1894_v14, %s2861_s10 }
0x12c3   :  { %v1910_v36 = vpop.permute.xlu0 %1909 }
0x12c4   :  { %2637 = vmatmul.mubr.msk.bf16.vlgmr.msra.gmra.mxu0 %vm162_vm1, %v1910_v36 }
0x12cb   :  { %v1956_v4 = vpop.permute.xlu1 %1955 }
0x12cc   :  { %2645 = vmatmul.mubr.msk.bf16.vlgmr.msra.gmra.mxu1 %vm162_vm1, %v1956_v4 }
0x1384   :  { %v1948_v58 = vpop.f32.mrf.mxu0 }
0x1385   :  { %v2024_v53 = vadd.f32 %v1948_v58, %v2970_v16 }
0x1386   :  { %v2638_v55 = vpop.f32.mrf.mxu0 }
0x1387   :  { %2028 = vrot.lane.b32.xlu0 %v2024_v53, %s2859_s29 }
0x1388   :  { %v1951_v5 = vpop.f32.mrf.mxu0 }
0x1389   :  { %v2025_v37 = vadd.f32 %v1951_v5, %v2970_v16  ;;  %v2452_v16 = vunpack.c.l.bf16 %v2471_v63  ;;  %v2011_v2 = vadd.f32 %v2453_v8, %v1951_v5  ;;  %v2363_v63 = vpack.c.bf16 %v3006_v33, %v3006_v33 }
0x138a   :  { %v2639_v56 = vpop.f32.mrf.mxu0 }
0x138b   :  { %2030 = vrot.lane.b32.xlu1 %v2025_v37, %s2859_s29  ;;  %v2010_v6 = vadd.f32 %v2452_v16, %v1948_v58 }
0x138c   :  { %v1994_v57 = vpop.f32.mrf.mxu1 }
0x138d   :  { %v2078_v62 = vadd.f32 %v1994_v57, %v2972_v17  ;;  %v2352_v11 = vmul.f32 -1.442695, %v2010_v6  ;;  %v2064_v15 = vadd.f32 %v2456_v21, %v1994_v57  ;;  %v2365_v6 = vpack.c.bf16 %v3013_v43, %v3013_v43 }
0x138e   :  { %v2646_v1 = vpop.f32.mrf.mxu1 }
0x138f   :  { %2082 = vrot.lane.b32.xlu0 %v2078_v62, %s2859_s29  ;;  %2825 = vpow2.f32 %v2352_v11  ;;  %v2354_v25 = vmul.f32 -1.442695, %v2064_v15 }
0x1390   :  { %v1997_v7 = vpop.f32.mrf.mxu1 }
0x1391   :  { %v2079_v59 = vadd.f32 %v1997_v7, %v2972_v17  ;;  %v2353_v17 = vmul.f32 -1.442695, %v2011_v2  ;;  %v2065_v35 = vadd.f32 %v2457_v24, %v1997_v7 }
0x1392   :  { %v2647_v13 = vpop.f32.mrf.mxu1 }
0x1393   :  { %2084 = vrot.lane.b32.xlu1 %v2079_v59, %s2859_s29  ;;  %2827 = vpow2.f32 %v2353_v17  ;;  %v2355_v41 = vmul.f32 -1.442695, %v2065_v35  ;;  %v2362_v59 = vpack.c.bf16 %v3004_v32, %v3004_v32  ;;  %v2364_v13 = vpack.c.bf16 %v3011_v42, %v3011_v42 }
0x1394   :  { %2829 = vpow2.f32 %v2354_v25 }
0x1395   :  { %2831 = vpow2.f32 %v2355_v41  ;;  %v2366_v41 = vpack.c.bf16 %v3056_v60, %v3056_v60  ;;  %v2369_v60 = vpack.c.bf16 %v3067_v19, %v3067_v19  ;;  %v2373_v19 = vpack.c.bf16 %v3121_v52, %v3121_v52 }
0x1396   :  { %v2378_v52 = vpack.c.bf16 %v3226_v3, %v3226_v3  ;;  %v2382_v3 = vpack.c.bf16 %v3280_v22, %v3280_v22  ;;  %v2386_v22 = vpack.c.bf16 %v3332_v26, %v3332_v26 }
0x139c   :  { %v2826_v44 = vpop.eup %2825 }
0x139d   :  { %v2018_v31 = vadd.f32 1.0, %v2826_v44 }
0x139f   :  { %2833 = vrcp.f32 %v2018_v31  ;;  %v2368_v31 = vpack.c.bf16 %v3065_v18, %v3065_v18  ;;  %v2372_v18 = vpack.c.bf16 %v3119_v51, %v3119_v51  ;;  %v2375_v51 = vpack.c.bf16 %v3166_v20, %v3166_v20 }
0x13a0   :  { %v2828_v49 = vpop.eup %2827  ;;  %v2379_v20 = vpack.c.bf16 %v3228_v9, %v3228_v9  ;;  %v2383_v9 = vpack.c.bf16 %v3282_v23, %v3282_v23  ;;  %v2387_v23 = vpack.c.bf16 %v3334_v12, %v3334_v12 }
0x13a1   :  { %v2019_v50 = vadd.f32 1.0, %v2828_v49  ;;  %v2830_v34 = vpop.eup %2829  ;;  %v2367_v49 = vpack.c.bf16 %v3058_v61, %v3058_v61  ;;  %v2371_v61 = vpack.c.bf16 %v3112_v39, %v3112_v39  ;;  %v2376_v39 = vpack.c.bf16 %v3173_v29, %v3173_v29 }
0x13a2   :  { %v2072_v40 = vadd.f32 1.0, %v2830_v34  ;;  %v2832_v45 = vpop.eup %2831  ;;  %v2380_v29 = vpack.c.bf16 %v3235_v27, %v3235_v27  ;;  %v2384_v27 = vpack.c.bf16 %v3289_v46, %v3289_v46  ;;  %v2388_v46 = vpack.c.bf16 %v3341_v48, %v3341_v48 }
0x13a3   :  { %2835 = vrcp.f32 %v2019_v50  ;;  %v2073_v14 = vadd.f32 1.0, %v2832_v45  ;;  %v2370_v50 = vpack.c.bf16 %v3110_v38, %v3110_v38  ;;  %v2374_v38 = vpack.c.bf16 %v3164_v10, %v3164_v10 }
0x13a4   :  { %2837 = vrcp.f32 %v2072_v40  ;;  %v2377_v10 = vpack.c.bf16 %v3175_v30, %v3175_v30  ;;  %v2381_v30 = vpack.c.bf16 %v3237_v28, %v3237_v28  ;;  %v2385_v28 = vpack.c.bf16 %v3291_v47, %v3291_v47 }
0x13a5   :  { %2839 = vrcp.f32 %v2073_v14  ;;  %v2389_v47 = vpack.c.bf16 %v3343_v54, %v3343_v54 }
0x13ac   :  { %v3368_v36 = vpop.eup %2833 }
0x13ad   :  { %v2048_v34 = vsub.f32 1.0, %v3368_v36  ;;  %v2060_v45 = vmul.f32 %v3368_v36, %v3332_v26 }
0x13b0   :  { %v3372_v53 = vpop.eup %2835 }
0x13b1   :  { %v3376_v37 = vpop.eup %2837 }
0x13b2   :  { %v3380_v62 = vpop.eup %2839 }
0x13f9   :  { %v2029_v4 = vpop.permute.xlu0 %2028 }
0x13fa   :  { %v2034_v58 = vmul.f32 %v3368_v36, %v2029_v4 }
0x13fc   :  { %2038 = vrot.lane.b32.xlu0 %v2034_v58, %s2859_s29  ;;  %v2049_v58 = vsub.f32 1.0, %v3372_v53 }
0x13fd   :  { %v2031_v55 = vpop.permute.xlu1 %2030 }
0x13fe   :  { %v2035_v5 = vmul.f32 %v3372_v53, %v2031_v55 }
0x1400   :  { %2040 = vrot.lane.b32.xlu1 %v2035_v5, %s2859_s29  ;;  %v2061_v5 = vmul.f32 %v3372_v53, %v3334_v12  ;;  %v2103_v12 = vsub.f32 1.0, %v3380_v62 }
0x1401   :  { %v2083_v56 = vpop.permute.xlu0 %2082 }
0x1402   :  { %v2088_v57 = vmul.f32 %v3376_v37, %v2083_v56 }
0x1404   :  { %2092 = vrot.lane.b32.xlu0 %v2088_v57, %s2859_s29 }
0x1405   :  { %v2085_v1 = vpop.permute.xlu1 %2084 }
0x1406   :  { %v2089_v7 = vmul.f32 %v3380_v62, %v2085_v1 }
0x1408   :  { %445 = vrot.lane.b32.xlu0 %v2362_v59, %s2861_s10  ;;  %2094 = vrot.lane.b32.xlu1 %v2089_v7, %s2859_s29  ;;  %v2102_v7 = vsub.f32 1.0, %v3376_v37 }
0x140c   :  { %460 = vrot.lane.b32.xlu0 %v2364_v13, %s2861_s10  ;;  %447 = vrot.lane.b32.xlu1 %v2363_v63, %s2861_s10  ;;  %v2114_v13 = vmul.f32 %v3376_v37, %v3341_v48  ;;  %v2115_v48 = vmul.f32 %v3380_v62, %v3343_v54 }
0x1410   :  { %462 = vrot.lane.b32.xlu1 %v2365_v6, %s2861_s10 }
0x146e   :  { %v2039_v32 = vpop.permute.xlu0 %2038 }
0x146f   :  { %v2044_v0 = vadd.f32 %v2452_v16, %v2039_v32 }
0x1471   :  { %2841 = vtanh.f32 %v2044_v0 }
0x1472   :  { %v2041_v11 = vpop.permute.xlu1 %2040 }
0x1473   :  { %v2045_v2 = vadd.f32 %v2453_v8, %v2041_v11 }
0x1475   :  { %2843 = vtanh.f32 %v2045_v2 }
0x1476   :  { %v2093_v17 = vpop.permute.xlu0 %2092 }
0x1477   :  { %v2098_v42 = vadd.f32 %v2456_v21, %v2093_v17 }
0x1479   :  { %2845 = vtanh.f32 %v2098_v42 }
0x147a   :  { %v446_v33 = vpop.permute.xlu0 %445  ;;  %v2095_v15 = vpop.permute.xlu1 %2094 }
0x147b   :  { %452 = vst.msk [vmem:[%s3629_s5] sm:$0xf] %vm451_vm2, %v446_v33  ;;  %v2099_v43 = vadd.f32 %v2457_v24, %v2095_v15 }
0x147d   :  { %2847 = vtanh.f32 %v2099_v43 }
0x147e   :  { %v2842_v25 = vpop.eup %2841  ;;  %v461_v35 = vpop.permute.xlu0 %460 }
0x147f   :  { %v448_v16 = vpop.permute.xlu1 %447  ;;  %2238 = vst.msk [vmem:[%s3630_s6 + $0x38] sm:$0xf] %vm451_vm2, %v461_v35  ;;  %2052 = vrot.lane.b32.xlu0 %v2842_v25, %s2861_s10 }
0x1480   :  { %453 = vst.msk [vmem:[%s3629_s5 + $0x4] sm:$0xf] %vm451_vm2, %v448_v16 }
0x1482   :  { %v2844_v8 = vpop.eup %2843 }
0x1483   :  { %v463_v21 = vpop.permute.xlu1 %462  ;;  %2054 = vrot.lane.b32.xlu1 %v2844_v8, %s2861_s10 }
0x1484   :  { %2239 = vst.msk [vmem:[%s3630_s6 + $0x3c] sm:$0xf] %vm451_vm2, %v463_v21 }
0x1486   :  { %v2846_v24 = vpop.eup %2845 }
0x1487   :  { %2106 = vrot.lane.b32.xlu0 %v2846_v24, %s2861_s10 }
0x148a   :  { %v2848_v44 = vpop.eup %2847 }
0x148b   :  { %685 = vrot.lane.b32.xlu0 %v2366_v41, %s2861_s10  ;;  %2108 = vrot.lane.b32.xlu1 %v2848_v44, %s2861_s10 }
0x148f   :  { %700 = vrot.lane.b32.xlu0 %v2368_v31, %s2861_s10  ;;  %687 = vrot.lane.b32.xlu1 %v2367_v49, %s2861_s10 }
0x1493   :  { %925 = vrot.lane.b32.xlu0 %v2370_v50, %s2861_s10  ;;  %702 = vrot.lane.b32.xlu1 %v2369_v60, %s2861_s10 }
0x1497   :  { %940 = vrot.lane.b32.xlu0 %v2372_v18, %s2861_s10  ;;  %927 = vrot.lane.b32.xlu1 %v2371_v61, %s2861_s10 }
0x149b   :  { %1165 = vrot.lane.b32.xlu0 %v2374_v38, %s2861_s10  ;;  %942 = vrot.lane.b32.xlu1 %v2373_v19, %s2861_s10 }
0x149f   :  { %1180 = vrot.lane.b32.xlu0 %v2376_v39, %s2861_s10  ;;  %1167 = vrot.lane.b32.xlu1 %v2375_v51, %s2861_s10 }
0x14a3   :  { %1405 = vrot.lane.b32.xlu0 %v2378_v52, %s2861_s10  ;;  %1182 = vrot.lane.b32.xlu1 %v2377_v10, %s2861_s10 }
0x14a7   :  { %1420 = vrot.lane.b32.xlu0 %v2380_v29, %s2861_s10  ;;  %1407 = vrot.lane.b32.xlu1 %v2379_v20, %s2861_s10 }
0x14ab   :  { %1645 = vrot.lane.b32.xlu0 %v2382_v3, %s2861_s10  ;;  %1422 = vrot.lane.b32.xlu1 %v2381_v30, %s2861_s10 }
0x14af   :  { %1660 = vrot.lane.b32.xlu0 %v2384_v27, %s2861_s10  ;;  %1647 = vrot.lane.b32.xlu1 %v2383_v9, %s2861_s10 }
0x14b3   :  { %1885 = vrot.lane.b32.xlu0 %v2386_v22, %s2861_s10  ;;  %1662 = vrot.lane.b32.xlu1 %v2385_v28, %s2861_s10 }
0x14b7   :  { %1900 = vrot.lane.b32.xlu0 %v2388_v46, %s2861_s10  ;;  %1887 = vrot.lane.b32.xlu1 %v2387_v23, %s2861_s10 }
0x14bb   :  { %1902 = vrot.lane.b32.xlu1 %v2389_v47, %s2861_s10 }
0x14f1   :  { %v2053_v40 = vpop.permute.xlu0 %2052 }
0x14f2   :  { %v2058_v14 = vmul.f32 %v2053_v40, %v2048_v34 }
0x14f4   :  { %v2062_v4 = vadd.f32 %v2060_v45, %v2058_v14 }
0x14f5   :  { %v2055_v55 = vpop.permute.xlu1 %2054 }
0x14f6   :  { %v2059_v56 = vmul.f32 %v2055_v55, %v2049_v58  ;;  %2149 = vrot.lane.b32.xlu0 %v2062_v4, %s2861_s10  ;;  %v2390_v57 = vpack.c.bf16 %v2062_v4, %v2062_v4 }
0x14f8   :  { %v2063_v1 = vadd.f32 %v2061_v5, %v2059_v56 }
0x14f9   :  { %v2107_v59 = vpop.permute.xlu0 %2106 }
0x14fa   :  { %v2112_v26 = vmul.f32 %v2107_v59, %v2102_v7  ;;  %2124 = vrot.lane.b32.xlu0 %v2390_v57, %s2861_s10  ;;  %2151 = vrot.lane.b32.xlu1 %v2063_v1, %s2861_s10  ;;  %v2391_v36 = vpack.c.bf16 %v2063_v1, %v2063_v1 }
0x14fc   :  { %v2116_v63 = vadd.f32 %v2114_v13, %v2112_v26 }
0x14fd   :  { %v686_v53 = vpop.permute.xlu0 %685  ;;  %v2109_v6 = vpop.permute.xlu1 %2108 }
0x14fe   :  { %v2392_v32 = vpack.c.bf16 %v2116_v63, %v2116_v63  ;;  %2252 = vst.msk [vmem:[%s3629_s5 + $0x8] sm:$0xf] %vm451_vm2, %v686_v53  ;;  %v2113_v37 = vmul.f32 %v2109_v6, %v2103_v12  ;;  %2126 = vrot.lane.b32.xlu1 %v2391_v36, %s2861_s10 }
0x1500   :  { %v2117_v0 = vadd.f32 %v2115_v48, %v2113_v37  ;;  %2139 = vrot.lane.b32.xlu0 %v2392_v32, %s2861_s10 }
0x1501   :  { %v701_v11 = vpop.permute.xlu0 %700  ;;  %v688_v2 = vpop.permute.xlu1 %687 }
0x1502   :  { %v2393_v17 = vpack.c.bf16 %v2117_v0, %v2117_v0  ;;  %2256 = vst.msk [vmem:[%s3630_s6 + $0x30] sm:$0xf] %vm451_vm2, %v701_v11  ;;  %2253 = vst.msk [vmem:[%s3629_s5 + $0xc] sm:$0xf] %vm451_vm2, %v688_v2 }
0x1504   :  { %2159 = vrot.lane.b32.xlu0 %v2116_v63, %s2861_s10  ;;  %2141 = vrot.lane.b32.xlu1 %v2393_v17, %s2861_s10 }
0x1505   :  { %v926_v54 = vpop.permute.xlu0 %925  ;;  %v703_v62 = vpop.permute.xlu1 %702 }
0x1506   :  { %2270 = vst.msk [vmem:[%s3629_s5 + $0x10] sm:$0xf] %vm451_vm2, %v926_v54  ;;  %2257 = vst.msk [vmem:[%s3630_s6 + $0x34] sm:$0xf] %vm451_vm2, %v703_v62 }
0x1508   :  { %2161 = vrot.lane.b32.xlu1 %v2117_v0, %s2861_s10 }
0x1509   :  { %v941_v42 = vpop.permute.xlu0 %940  ;;  %v928_v33 = vpop.permute.xlu1 %927 }
0x150a   :  { %2274 = vst.msk [vmem:[%s3630_s6 + $0x28] sm:$0xf] %vm451_vm2, %v941_v42  ;;  %2271 = vst.msk [vmem:[%s3629_s5 + $0x14] sm:$0xf] %vm451_vm2, %v928_v33 }
0x150d   :  { %v1166_v15 = vpop.permute.xlu0 %1165  ;;  %v943_v43 = vpop.permute.xlu1 %942 }
0x150e   :  { %2288 = vst.msk [vmem:[%s3629_s5 + $0x18] sm:$0xf] %vm451_vm2, %v1166_v15  ;;  %2275 = vst.msk [vmem:[%s3630_s6 + $0x2c] sm:$0xf] %vm451_vm2, %v943_v43 }
0x1511   :  { %v1181_v25 = vpop.permute.xlu0 %1180  ;;  %v1168_v35 = vpop.permute.xlu1 %1167 }
0x1512   :  { %2292 = vst.msk [vmem:[%s3630_s6 + $0x20] sm:$0xf] %vm451_vm2, %v1181_v25  ;;  %2289 = vst.msk [vmem:[%s3629_s5 + $0x1c] sm:$0xf] %vm451_vm2, %v1168_v35 }
0x1515   :  { %v1406_v16 = vpop.permute.xlu0 %1405  ;;  %v1183_v8 = vpop.permute.xlu1 %1182 }
0x1516   :  { %2306 = vst.msk [vmem:[%s3629_s5 + $0x20] sm:$0xf] %vm451_vm2, %v1406_v16  ;;  %2293 = vst.msk [vmem:[%s3630_s6 + $0x24] sm:$0xf] %vm451_vm2, %v1183_v8 }
0x1519   :  { %v1421_v21 = vpop.permute.xlu0 %1420  ;;  %v1408_v24 = vpop.permute.xlu1 %1407 }
0x151a   :  { %2310 = vst.msk [vmem:[%s3630_s6 + $0x18] sm:$0xf] %vm451_vm2, %v1421_v21  ;;  %2307 = vst.msk [vmem:[%s3629_s5 + $0x24] sm:$0xf] %vm451_vm2, %v1408_v24 }
0x151d   :  { %v1646_v41 = vpop.permute.xlu0 %1645  ;;  %v1423_v44 = vpop.permute.xlu1 %1422 }
0x151e   :  { %2324 = vst.msk [vmem:[%s3629_s5 + $0x28] sm:$0xf] %vm451_vm2, %v1646_v41  ;;  %2311 = vst.msk [vmem:[%s3630_s6 + $0x1c] sm:$0xf] %vm451_vm2, %v1423_v44 }
0x1521   :  { %v1661_v31 = vpop.permute.xlu0 %1660  ;;  %v1648_v49 = vpop.permute.xlu1 %1647 }
0x1522   :  { %2328 = vst.msk [vmem:[%s3630_s6 + $0x10] sm:$0xf] %vm451_vm2, %v1661_v31  ;;  %2325 = vst.msk [vmem:[%s3629_s5 + $0x2c] sm:$0xf] %vm451_vm2, %v1648_v49 }
0x1525   :  { %v1886_v50 = vpop.permute.xlu0 %1885  ;;  %v1663_v60 = vpop.permute.xlu1 %1662 }
0x1526   :  { %2342 = vst.msk [vmem:[%s3629_s5 + $0x30] sm:$0xf] %vm451_vm2, %v1886_v50  ;;  %2329 = vst.msk [vmem:[%s3630_s6 + $0x14] sm:$0xf] %vm451_vm2, %v1663_v60 }
0x1529   :  { %v1901_v18 = vpop.permute.xlu0 %1900  ;;  %v1888_v61 = vpop.permute.xlu1 %1887 }
0x152a   :  { %2346 = vst.msk [vmem:[%s3630_s6 + $0x8] sm:$0xf] %vm451_vm2, %v1901_v18  ;;  %2343 = vst.msk [vmem:[%s3629_s5 + $0x34] sm:$0xf] %vm451_vm2, %v1888_v61 }
0x152d   :  { %v1903_v38 = vpop.permute.xlu1 %1902 }
0x152e   :  { %2347 = vst.msk [vmem:[%s3630_s6 + $0xc] sm:$0xf] %vm451_vm2, %v1903_v38 }
0x1568   :  { %v2150_v19 = vpop.permute.xlu0 %2149 }
0x1569   :  { %2155 = vst.msk [vmem:[#allocation4] sm:$0xff] %vm162_vm1, %v2150_v19 }
0x156c   :  { %v2125_v51 = vpop.permute.xlu0 %2124  ;;  %v2152_v39 = vpop.permute.xlu1 %2151 }
0x156d   :  { %2358 = vst.msk [vmem:[%s3629_s5 + $0x38] sm:$0xf] %vm451_vm2, %v2125_v51 }
0x156e   :  { %2156 = vst.msk [vmem:[#allocation4 + $0x8] sm:$0xff] %vm162_vm1, %v2152_v39 }
0x1570   :  { %v2127_v10 = vpop.permute.xlu1 %2126 }
0x1571   :  { %2359 = vst.msk [vmem:[%s3629_s5 + $0x3c] sm:$0xf] %vm451_vm2, %v2127_v10 }
0x1572   :  { %v2140_v52 = vpop.permute.xlu0 %2139 }
0x1573   :  { %2145 = vst.msk [vmem:[%s3630_s6] sm:$0xf] %vm451_vm2, %v2140_v52 }
0x1576   :  { %v2160_v20 = vpop.permute.xlu0 %2159  ;;  %v2142_v29 = vpop.permute.xlu1 %2141 }
0x1577   :  { %2165 = vst.msk [vmem:[#allocation5] sm:$0xff] %vm162_vm1, %v2160_v20 }
0x1578   :  { %2146 = vst.msk [vmem:[%s3630_s6 + $0x4] sm:$0xf] %vm451_vm2, %v2142_v29 }
0x157a   :  { %v2162_v30 = vpop.permute.xlu1 %2161 }
0x157b   :  { %2166 = vst.msk [vmem:[#allocation5 + $0x8] sm:$0xff] %vm162_vm1, %v2162_v30 }

</bundles_post_ra>
